<compile_context>
chip_gen: v7x
topology: tpu7x:2x2x1
jax: 0.10.0
libtpu: 0.0.40
codegen_flags: <defaults>
</compile_context>

<pallas_src>
import functools

import jax
import jax.numpy as jnp
from jax.experimental import pallas as pl
from jax.experimental.pallas import tpu as pltpu

EPS = 1e-5
_VMEM = pl.BlockSpec(memory_space=pltpu.MemorySpace.VMEM)


# ------------------------- shared in-kernel helpers ------------------------- #

def _bn_relu(y, gamma, beta, n):
    """One-pass batch-statistics BatchNorm1d + ReLU on an (n, C) f32 tensor.

    gamma/beta: (1, C).  Uses sum / sum-of-squares (single pass, one live copy of
    y) and biased variance, matching PyTorch training-mode forward with eps=1e-5.
    The preceding conv/linear bias is a per-channel constant and cancels exactly
    under batch statistics, so it is intentionally not applied.
    """
    s = jnp.sum(y, axis=0, keepdims=True)
    ss = jnp.sum(y * y, axis=0, keepdims=True)
    mean = s * (1.0 / n)
    var = ss * (1.0 / n) - mean * mean
    scale = gamma * jax.lax.rsqrt(var + EPS)
    shift = beta - mean * scale
    return jnp.maximum(y * scale + shift, 0.0)


# ------------------------------ Pallas kernels ------------------------------ #

def conv1_kernel(xcol_ref, w_ref, g_ref, b_ref, out_ref):
    """Layer 1: im2col'ed dilated Conv1d (single depth-K*Cin matmul) + BN + ReLU.

    xcol_ref: (B, L, K*Cin)   w_ref: (K*Cin, Cout)   g/b: (1, Cout)
    out_ref:  (B, L, Cout)
    """
    B, L, Cout = out_ref.shape
    n = B * L
    xcol = xcol_ref[...].reshape(n, -1)
    y = jnp.dot(xcol, w_ref[...], preferred_element_type=jnp.float32)
    out_ref[...] = _bn_relu(y, g_ref[...], b_ref[...], n).reshape(B, L, Cout)


def conv_bn_relu_kernel(x_ref, w_ref, g_ref, b_ref, out_ref, xpad_ref, *, dil, pad):
    """Dilated Conv1d (tap-accumulated MXU matmuls) + BN(batch stats) + ReLU.

    Padding halo is built inside the kernel in a VMEM scratch -- no wrapper-side
    jnp.pad HBM round trip of the wide activations.
    x_ref: (B, L, Cin)   w_ref: (K, Cin, Cout)   xpad_ref: (B, L+2*pad, Cin)
    """
    B, L, Cout = out_ref.shape
    Cin = x_ref.shape[2]
    K = w_ref.shape[0]
    n = B * L

    zero = jnp.zeros((B, pad, Cin), jnp.float32)
    xpad_ref[:, :pad, :] = zero                       # aligned: pad == 8
    xpad_ref[:, pad + L:2 * pad + L, :] = zero
    xpad_ref[:, pad:pad + L, :] = x_ref[...]
    xpad = xpad_ref[...]

    w = w_ref[...]
    y = jnp.zeros((n, Cout), jnp.float32)
    for k in range(K):                                # K is tiny and static (5 / 3)
        xs = xpad[:, k * dil:k * dil + L, :].reshape(n, Cin)
        y = y + jnp.dot(xs, w[k], preferred_element_type=jnp.float32)

    out_ref[...] = _bn_relu(y, g_ref[...], b_ref[...], n).reshape(B, L, Cout)


def conv3_pool_head_kernel(x_ref, w_ref, g3_ref, b3_ref, w1_ref, g4_ref, b4_ref,
                           w2_ref, lb2_ref, out_ref, h_ref, xpad_ref, *, dil, pad):
    """Fused: Conv1d(256->512) + BN + ReLU + AdaptiveAvgPool1d(1) + Flatten
              + Linear + BN + ReLU + Linear.

    The (B, L, 512) activation lives only in VMEM; outputs are (B, 512) out / h.
    """
    B, L, Cin = x_ref.shape
    K = w_ref.shape[0]
    C = h_ref.shape[1]                                # 512
    n = B * L

    zero = jnp.zeros((B, pad, Cin), jnp.float32)
    xpad_ref[:, :pad, :] = zero
    xpad_ref[:, pad + L:2 * pad + L, :] = zero
    xpad_ref[:, pad:pad + L, :] = x_ref[...]
    xpad = xpad_ref[...]

    w = w_ref[...]
    y = jnp.zeros((n, C), jnp.float32)
    for k in range(K):                                # K = 3, dil = 8 (aligned taps)
        xs = xpad[:, k * dil:k * dil + L, :].reshape(n, Cin)
        y = y + jnp.dot(xs, w[k], preferred_element_type=jnp.float32)

    a = _bn_relu(y, g3_ref[...], b3_ref[...], n)      # (B*L, 512)

    # AdaptiveAvgPool1d(1) + Flatten fused here: mean over L -> (B, 512).
    h = jnp.mean(a.reshape(B, L, C), axis=1)
    h_ref[...] = h

    # Projection head epilogue: Linear -> BN(batch stats) -> ReLU -> Linear.
    z = jnp.dot(h, w1_ref[...], preferred_element_type=jnp.float32)
    zn = _bn_relu(z, g4_ref[...], b4_ref[...], B)
    out_ref[...] = (jnp.dot(zn, w2_ref[...], preferred_element_type=jnp.float32)
                    + lb2_ref[...])


# ------------------------------ JAX wrappers -------------------------------- #

def conv1_bn_relu(x, w1c, gamma, beta, *, K, dil, pad):
    """x: (B, L, Cin=4).  im2col on the tiny layer-1 input (a few KiB) so the
    kernel issues one depth-K*Cin MXU matmul instead of K depth-4 pushes."""
    B, L, _ = x.shape
    Cout = w1c.shape[1]
    xp = jnp.pad(x, ((0, 0), (pad, pad), (0, 0)))
    xcol = jnp.concatenate([xp[:, k * dil:k * dil + L, :] for k in range(K)], axis=2)
    return pl.pallas_call(
        conv1_kernel,
        out_shape=jax.ShapeDtypeStruct((B, L, Cout), jnp.float32),
        in_specs=[_VMEM] * 4,
        out_specs=_VMEM,
    )(xcol, w1c, gamma.reshape(1, Cout), beta.reshape(1, Cout))


def conv_bn_relu(x, w, gamma, beta, *, dil, pad):
    """x: (B, L, Cin) channels-last.  Returns (B, L, Cout)."""
    B, L, Cin = x.shape
    Cout = w.shape[2]
    kernel = functools.partial(conv_bn_relu_kernel, dil=dil, pad=pad)
    return pl.pallas_call(
        kernel,
        out_shape=jax.ShapeDtypeStruct((B, L, Cout), jnp.float32),
        in_specs=[_VMEM] * 4,
        out_specs=_VMEM,
        scratch_shapes=[pltpu.VMEM((B, L + 2 * pad, Cin), jnp.float32)],
    )(x, w, gamma.reshape(1, Cout), beta.reshape(1, Cout))


def conv3_pool_head(x, w3, g3, b3, lw1, g4, b4, lw2, lb2, *, dil, pad):
    """Fused last conv + pool + projection head.  Returns (out, h), both (B, 512)."""
    B, L, Cin = x.shape
    C = w3.shape[2]
    kernel = functools.partial(conv3_pool_head_kernel, dil=dil, pad=pad)
    out, h = pl.pallas_call(
        kernel,
        out_shape=(jax.ShapeDtypeStruct((B, C), jnp.float32),
                   jax.ShapeDtypeStruct((B, C), jnp.float32)),
        in_specs=[_VMEM] * 9,
        out_specs=(_VMEM, _VMEM),
        scratch_shapes=[pltpu.VMEM((B, L + 2 * pad, Cin), jnp.float32)],
    )(x, w3, g3.reshape(1, C), b3.reshape(1, C),
      lw1, g4.reshape(1, C), b4.reshape(1, C), lw2, lb2.reshape(1, C))
    return out, h


# ------------------------------- Parameters --------------------------------- #

def init_params(key, n_in):
    ks = jax.random.split(key, 6)

    def conv_w(k, cout, cin, ksize):
        bound = 1.0 / (cin * ksize) ** 0.5
        # PyTorch Conv1d weight is (Cout, Cin, K); store transposed as (K, Cin, Cout).
        w = jax.random.uniform(k, (cout, cin, ksize), jnp.float32, -bound, bound)
        return jnp.transpose(w, (2, 1, 0))

    def linear_w(k, cout, cin):
        bound = 1.0 / cin ** 0.5
        # PyTorch Linear weight is (out, in); store transposed as (in, out).
        w = jax.random.uniform(k, (cout, cin), jnp.float32, -bound, bound)
        return jnp.transpose(w)

    p = {}
    # Note: conv1/conv2/conv3 and linear1 biases feed a batch-statistics BatchNorm
    # and cancel exactly in the forward pass, so they are not materialised.
    p['cw1'] = conv_w(ks[0], 128, n_in, 7).reshape(7 * n_in, 128)   # im2col layout
    p['cw2'] = conv_w(ks[1], 256, 128, 5)
    p['cw3'] = conv_w(ks[2], 512, 256, 3)
    for name, c in (('bn1', 128), ('bn2', 256), ('bn3', 512), ('bn4', 512)):
        p[name + '_g'] = jnp.ones((c,), jnp.float32)
        p[name + '_b'] = jnp.zeros((c,), jnp.float32)
    p['lw1'] = linear_w(ks[3], 512, 512)
    p['lw2'] = linear_w(ks[4], 512, 512)
    bound2 = 1.0 / 512 ** 0.5
    p['lb2'] = jax.random.uniform(ks[5], (512,), jnp.float32, -bound2, bound2)
    return p


def fcn_forward(params, x):
    """x: (B, n_in, L) in PyTorch NCL layout.  Returns (out, h) like FCN.forward."""
    a = jnp.transpose(x, (0, 2, 1)).astype(jnp.float32)    # -> channels-last (B, L, C)
    a = conv1_bn_relu(a, params['cw1'], params['bn1_g'], params['bn1_b'],
                      K=7, dil=2, pad=6)
    a = conv_bn_relu(a, params['cw2'], params['bn2_g'], params['bn2_b'],
                     dil=4, pad=8)
    out, h = conv3_pool_head(a, params['cw3'], params['bn3_g'], params['bn3_b'],
                             params['lw1'], params['bn4_g'], params['bn4_b'],
                             params['lw2'], params['lb2'],
                             dil=8, pad=8)
    return out, h


# ---------------------------------- main ------------------------------------ #

if __name__ == "__main__":
    key = jax.random.PRNGKey(0)
    k_param, k_x = jax.random.split(key)

    B, n_in, L = 2, 4, 16
    params = init_params(k_param, n_in)
    x = jax.random.normal(k_x, (B, n_in, L), jnp.float32)   # NCL, like PyTorch

    out, h = jax.jit(fcn_forward)(params, x)
    jax.block_until_ready((out, h))

    assert out.shape == (B, 512) and h.shape == (B, 512)
    assert jnp.all(jnp.isfinite(out)) and jnp.all(jnp.isfinite(h))
    print("KERNEL_OK")
</pallas_src>

<mosaic_0001>
module attributes {stable_mosaic.version = 11 : i64} {
  func.func @conv1_kernel(%arg0: memref<2x16x28xf32, #tpu.memory_space<vmem>>, %arg1: memref<28x128xf32, #tpu.memory_space<vmem>>, %arg2: memref<1x128xf32, #tpu.memory_space<vmem>>, %arg3: memref<1x128xf32, #tpu.memory_space<vmem>>, %arg4: memref<2x16x128xf32, #tpu.memory_space<vmem>>) attributes {dimension_semantics = [], scalar_prefetch = 0 : i64, scratch_operands = 0 : i64, tpu.core_type = #tpu.core_type<tc>} {
    %c0 = arith.constant 0 : index
    %c0_0 = arith.constant 0 : index
    %c0_1 = arith.constant 0 : index
    %0 = vector.load %arg0[%c0, %c0_0, %c0_1] : memref<2x16x28xf32, #tpu.memory_space<vmem>>, vector<2x16x28xf32>
    %1 = vector.shape_cast %0 : vector<2x16x28xf32> to vector<32x28xf32>
    %c0_2 = arith.constant 0 : index
    %c0_3 = arith.constant 0 : index
    %2 = vector.load %arg1[%c0_2, %c0_3] : memref<28x128xf32, #tpu.memory_space<vmem>>, vector<28x128xf32>
    %cst = arith.constant dense<0.000000e+00> : vector<32x128xf32>
    %3 = tpu.matmul %1, %2, %cst {dimension_numbers = #tpu.dot_dimension_numbers<[1], [0], [0], [1], [0, 0, 1, 1], [], []>} : vector<32x28xf32>, vector<28x128xf32>, vector<32x128xf32> -> vector<32x128xf32>
    %c0_4 = arith.constant 0 : index
    %c0_5 = arith.constant 0 : index
    %4 = vector.load %arg2[%c0_4, %c0_5] : memref<1x128xf32, #tpu.memory_space<vmem>>, vector<1x128xf32>
    %c0_6 = arith.constant 0 : index
    %c0_7 = arith.constant 0 : index
    %5 = vector.load %arg3[%c0_6, %c0_7] : memref<1x128xf32, #tpu.memory_space<vmem>>, vector<1x128xf32>
    %cst_8 = arith.constant dense<0.000000e+00> : vector<128xf32>
    %6 = vector.multi_reduction <add>, %3, %cst_8 [0] : vector<32x128xf32> to vector<128xf32>
    %7 = vector.shape_cast %6 : vector<128xf32> to vector<1x128xf32>
    %8 = arith.mulf %3, %3 : vector<32x128xf32>
    %cst_9 = arith.constant dense<0.000000e+00> : vector<128xf32>
    %9 = vector.multi_reduction <add>, %8, %cst_9 [0] : vector<32x128xf32> to vector<128xf32>
    %10 = vector.shape_cast %9 : vector<128xf32> to vector<1x128xf32>
    %cst_10 = arith.constant 3.125000e-02 : f32
    %11 = vector.broadcast %cst_10 : f32 to vector<1x128xf32>
    %12 = arith.mulf %7, %11 : vector<1x128xf32>
    %cst_11 = arith.constant 3.125000e-02 : f32
    %13 = vector.broadcast %cst_11 : f32 to vector<1x128xf32>
    %14 = arith.mulf %10, %13 : vector<1x128xf32>
    %15 = arith.mulf %12, %12 : vector<1x128xf32>
    %16 = arith.subf %14, %15 : vector<1x128xf32>
    %cst_12 = arith.constant 9.99999974E-6 : f32
    %17 = vector.broadcast %cst_12 : f32 to vector<1x128xf32>
    %18 = arith.addf %16, %17 : vector<1x128xf32>
    %19 = math.rsqrt %18 : vector<1x128xf32>
    %20 = arith.mulf %4, %19 : vector<1x128xf32>
    %21 = arith.mulf %12, %20 : vector<1x128xf32>
    %22 = arith.subf %5, %21 : vector<1x128xf32>
    %23 = vector.broadcast %20 : vector<1x128xf32> to vector<32x128xf32>
    %24 = arith.mulf %3, %23 : vector<32x128xf32>
    %25 = vector.broadcast %22 : vector<1x128xf32> to vector<32x128xf32>
    %26 = arith.addf %24, %25 : vector<32x128xf32>
    %cst_13 = arith.constant 0.000000e+00 : f32
    %27 = vector.broadcast %cst_13 : f32 to vector<32x128xf32>
    %28 = arith.maximumf %26, %27 : vector<32x128xf32>
    %29 = vector.shape_cast %28 : vector<32x128xf32> to vector<2x16x128xf32>
    %c0_14 = arith.constant 0 : index
    %c0_15 = arith.constant 0 : index
    %c0_16 = arith.constant 0 : index
    %30 = vector.load %arg4[%c0_14, %c0_15, %c0_16] : memref<2x16x128xf32, #tpu.memory_space<vmem>>, vector<2x16x128xf32>
    tpu.vector_store %arg4[%c0_14, %c0_15, %c0_16], %29 {strides = array<i32>} : memref<2x16x128xf32, #tpu.memory_space<vmem>>, vector<2x16x128xf32>,
    return
  }
}

module attributes {stable_mosaic.version = 11 : i64} {
  func.func @conv_bn_relu_kernel(%arg0: memref<2x16x128xf32, #tpu.memory_space<vmem>>, %arg1: memref<5x128x256xf32, #tpu.memory_space<vmem>>, %arg2: memref<1x256xf32, #tpu.memory_space<vmem>>, %arg3: memref<1x256xf32, #tpu.memory_space<vmem>>, %arg4: memref<2x16x256xf32, #tpu.memory_space<vmem>>, %arg5: memref<2x32x128xf32, #tpu.memory_space<vmem>>) attributes {dimension_semantics = [], scalar_prefetch = 0 : i64, scratch_operands = 1 : i64, tpu.core_type = #tpu.core_type<tc>} {
    %cst = arith.constant 0.000000e+00 : f32
    %0 = vector.broadcast %cst : f32 to vector<2x8x128xf32>
    %c0 = arith.constant 0 : index
    %c0_0 = arith.constant 0 : index
    %c0_1 = arith.constant 0 : index
    %1 = vector.load %arg5[%c0, %c0_0, %c0_1] : memref<2x32x128xf32, #tpu.memory_space<vmem>>, vector<2x8x128xf32>
    tpu.vector_store %arg5[%c0, %c0_0, %c0_1], %0 {strides = array<i32>} : memref<2x32x128xf32, #tpu.memory_space<vmem>>, vector<2x8x128xf32>,
    %c0_2 = arith.constant 0 : index
    %c24 = arith.constant 24 : index
    %c0_3 = arith.constant 0 : index
    %2 = vector.load %arg5[%c0_2, %c24, %c0_3] : memref<2x32x128xf32, #tpu.memory_space<vmem>>, vector<2x8x128xf32>
    tpu.vector_store %arg5[%c0_2, %c24, %c0_3], %0 {strides = array<i32>} : memref<2x32x128xf32, #tpu.memory_space<vmem>>, vector<2x8x128xf32>,
    %c0_4 = arith.constant 0 : index
    %c0_5 = arith.constant 0 : index
    %c0_6 = arith.constant 0 : index
    %3 = vector.load %arg0[%c0_4, %c0_5, %c0_6] : memref<2x16x128xf32, #tpu.memory_space<vmem>>, vector<2x16x128xf32>
    %c0_7 = arith.constant 0 : index
    %c8 = arith.constant 8 : index
    %c0_8 = arith.constant 0 : index
    %4 = vector.load %arg5[%c0_7, %c8, %c0_8] : memref<2x32x128xf32, #tpu.memory_space<vmem>>, vector<2x16x128xf32>
    tpu.vector_store %arg5[%c0_7, %c8, %c0_8], %3 {strides = array<i32>} : memref<2x32x128xf32, #tpu.memory_space<vmem>>, vector<2x16x128xf32>,
    %c0_9 = arith.constant 0 : index
    %c0_10 = arith.constant 0 : index
    %c0_11 = arith.constant 0 : index
    %5 = vector.load %arg5[%c0_9, %c0_10, %c0_11] : memref<2x32x128xf32, #tpu.memory_space<vmem>>, vector<2x32x128xf32>
    %c0_12 = arith.constant 0 : index
    %c0_13 = arith.constant 0 : index
    %c0_14 = arith.constant 0 : index
    %6 = vector.load %arg1[%c0_12, %c0_13, %c0_14] : memref<5x128x256xf32, #tpu.memory_space<vmem>>, vector<5x128x256xf32>
    %cst_15 = arith.constant 0.000000e+00 : f32
    %7 = vector.broadcast %cst_15 : f32 to vector<32x256xf32>
    %8 = vector.extract_strided_slice %5 {offsets = [0, 0, 0], sizes = [2, 16, 128], strides = [1, 1, 1]} : vector<2x32x128xf32> to vector<2x16x128xf32>
    %9 = vector.shape_cast %8 : vector<2x16x128xf32> to vector<32x128xf32>
    %10 = vector.extract_strided_slice %6 {offsets = [0, 0, 0], sizes = [1, 128, 256], strides = [1, 1, 1]} : vector<5x128x256xf32> to vector<1x128x256xf32>
    %11 = vector.shape_cast %10 : vector<1x128x256xf32> to vector<128x256xf32>
    %cst_16 = arith.constant dense<0.000000e+00> : vector<32x256xf32>
    %12 = tpu.matmul %9, %11, %cst_16 {dimension_numbers = #tpu.dot_dimension_numbers<[1], [0], [0], [1], [0, 0, 1, 1], [], []>} : vector<32x128xf32>, vector<128x256xf32>, vector<32x256xf32> -> vector<32x256xf32>
    %13 = arith.addf %7, %12 : vector<32x256xf32>
    %14 = vector.extract_strided_slice %5 {offsets = [0, 4, 0], sizes = [2, 16, 128], strides = [1, 1, 1]} : vector<2x32x128xf32> to vector<2x16x128xf32>
    %15 = vector.shape_cast %14 : vector<2x16x128xf32> to vector<32x128xf32>
    %16 = vector.extract_strided_slice %6 {offsets = [1, 0, 0], sizes = [1, 128, 256], strides = [1, 1, 1]} : vector<5x128x256xf32> to vector<1x128x256xf32>
    %17 = vector.shape_cast %16 : vector<1x128x256xf32> to vector<128x256xf32>
    %cst_17 = arith.constant dense<0.000000e+00> : vector<32x256xf32>
    %18 = tpu.matmul %15, %17, %cst_17 {dimension_numbers = #tpu.dot_dimension_numbers<[1], [0], [0], [1], [0, 0, 1, 1], [], []>} : vector<32x128xf32>, vector<128x256xf32>, vector<32x256xf32> -> vector<32x256xf32>
    %19 = arith.addf %13, %18 : vector<32x256xf32>
    %20 = vector.extract_strided_slice %5 {offsets = [0, 8, 0], sizes = [2, 16, 128], strides = [1, 1, 1]} : vector<2x32x128xf32> to vector<2x16x128xf32>
    %21 = vector.shape_cast %20 : vector<2x16x128xf32> to vector<32x128xf32>
    %22 = vector.extract_strided_slice %6 {offsets = [2, 0, 0], sizes = [1, 128, 256], strides = [1, 1, 1]} : vector<5x128x256xf32> to vector<1x128x256xf32>
    %23 = vector.shape_cast %22 : vector<1x128x256xf32> to vector<128x256xf32>
    %cst_18 = arith.constant dense<0.000000e+00> : vector<32x256xf32>
    %24 = tpu.matmul %21, %23, %cst_18 {dimension_numbers = #tpu.dot_dimension_numbers<[1], [0], [0], [1], [0, 0, 1, 1], [], []>} : vector<32x128xf32>, vector<128x256xf32>, vector<32x256xf32> -> vector<32x256xf32>
    %25 = arith.addf %19, %24 : vector<32x256xf32>
    %26 = vector.extract_strided_slice %5 {offsets = [0, 12, 0], sizes = [2, 16, 128], strides = [1, 1, 1]} : vector<2x32x128xf32> to vector<2x16x128xf32>
    %27 = vector.shape_cast %26 : vector<2x16x128xf32> to vector<32x128xf32>
    %28 = vector.extract_strided_slice %6 {offsets = [3, 0, 0], sizes = [1, 128, 256], strides = [1, 1, 1]} : vector<5x128x256xf32> to vector<1x128x256xf32>
    %29 = vector.shape_cast %28 : vector<1x128x256xf32> to vector<128x256xf32>
    %cst_19 = arith.constant dense<0.000000e+00> : vector<32x256xf32>
    %30 = tpu.matmul %27, %29, %cst_19 {dimension_numbers = #tpu.dot_dimension_numbers<[1], [0], [0], [1], [0, 0, 1, 1], [], []>} : vector<32x128xf32>, vector<128x256xf32>, vector<32x256xf32> -> vector<32x256xf32>
    %31 = arith.addf %25, %30 : vector<32x256xf32>
    %32 = vector.extract_strided_slice %5 {offsets = [0, 16, 0], sizes = [2, 16, 128], strides = [1, 1, 1]} : vector<2x32x128xf32> to vector<2x16x128xf32>
    %33 = vector.shape_cast %32 : vector<2x16x128xf32> to vector<32x128xf32>
    %34 = vector.extract_strided_slice %6 {offsets = [4, 0, 0], sizes = [1, 128, 256], strides = [1, 1, 1]} : vector<5x128x256xf32> to vector<1x128x256xf32>
    %35 = vector.shape_cast %34 : vector<1x128x256xf32> to vector<128x256xf32>
    %cst_20 = arith.constant dense<0.000000e+00> : vector<32x256xf32>
    %36 = tpu.matmul %33, %35, %cst_20 {dimension_numbers = #tpu.dot_dimension_numbers<[1], [0], [0], [1], [0, 0, 1, 1], [], []>} : vector<32x128xf32>, vector<128x256xf32>, vector<32x256xf32> -> vector<32x256xf32>
    %37 = arith.addf %31, %36 : vector<32x256xf32>
    %c0_21 = arith.constant 0 : index
    %c0_22 = arith.constant 0 : index
    %38 = vector.load %arg2[%c0_21, %c0_22] : memref<1x256xf32, #tpu.memory_space<vmem>>, vector<1x256xf32>
    %c0_23 = arith.constant 0 : index
    %c0_24 = arith.constant 0 : index
    %39 = vector.load %arg3[%c0_23, %c0_24] : memref<1x256xf32, #tpu.memory_space<vmem>>, vector<1x256xf32>
    %cst_25 = arith.constant dense<0.000000e+00> : vector<256xf32>
    %40 = vector.multi_reduction <add>, %37, %cst_25 [0] : vector<32x256xf32> to vector<256xf32>
    %41 = vector.shape_cast %40 : vector<256xf32> to vector<1x256xf32>
    %42 = arith.mulf %37, %37 : vector<32x256xf32>
    %cst_26 = arith.constant dense<0.000000e+00> : vector<256xf32>
    %43 = vector.multi_reduction <add>, %42, %cst_26 [0] : vector<32x256xf32> to vector<256xf32>
    %44 = vector.shape_cast %43 : vector<256xf32> to vector<1x256xf32>
    %cst_27 = arith.constant 3.125000e-02 : f32
    %45 = vector.broadcast %cst_27 : f32 to vector<1x256xf32>
    %46 = arith.mulf %41, %45 : vector<1x256xf32>
    %cst_28 = arith.constant 3.125000e-02 : f32
    %47 = vector.broadcast %cst_28 : f32 to vector<1x256xf32>
    %48 = arith.mulf %44, %47 : vector<1x256xf32>
    %49 = arith.mulf %46, %46 : vector<1x256xf32>
    %50 = arith.subf %48, %49 : vector<1x256xf32>
    %cst_29 = arith.constant 9.99999974E-6 : f32
    %51 = vector.broadcast %cst_29 : f32 to vector<1x256xf32>
    %52 = arith.addf %50, %51 : vector<1x256xf32>
    %53 = math.rsqrt %52 : vector<1x256xf32>
    %54 = arith.mulf %38, %53 : vector<1x256xf32>
    %55 = arith.mulf %46, %54 : vector<1x256xf32>
    %56 = arith.subf %39, %55 : vector<1x256xf32>
    %57 = vector.broadcast %54 : vector<1x256xf32> to vector<32x256xf32>
    %58 = arith.mulf %37, %57 : vector<32x256xf32>
    %59 = vector.broadcast %56 : vector<1x256xf32> to vector<32x256xf32>
    %60 = arith.addf %58, %59 : vector<32x256xf32>
    %cst_30 = arith.constant 0.000000e+00 : f32
    %61 = vector.broadcast %cst_30 : f32 to vector<32x256xf32>
    %62 = arith.maximumf %60, %61 : vector<32x256xf32>
    %63 = vector.shape_cast %62 : vector<32x256xf32> to vector<2x16x256xf32>
    %c0_31 = arith.constant 0 : index
    %c0_32 = arith.constant 0 : index
    %c0_33 = arith.constant 0 : index
    %64 = vector.load %arg4[%c0_31, %c0_32, %c0_33] : memref<2x16x256xf32, #tpu.memory_space<vmem>>, vector<2x16x256xf32>
    tpu.vector_store %arg4[%c0_31, %c0_32, %c0_33], %63 {strides = array<i32>} : memref<2x16x256xf32, #tpu.memory_space<vmem>>, vector<2x16x256xf32>,
    return
  }
}

module attributes {stable_mosaic.version = 11 : i64} {
  func.func @conv3_pool_head_kernel(%arg0: memref<2x16x256xf32, #tpu.memory_space<vmem>>, %arg1: memref<3x256x512xf32, #tpu.memory_space<vmem>>, %arg2: memref<1x512xf32, #tpu.memory_space<vmem>>, %arg3: memref<1x512xf32, #tpu.memory_space<vmem>>, %arg4: memref<512x512xf32, #tpu.memory_space<vmem>>, %arg5: memref<1x512xf32, #tpu.memory_space<vmem>>, %arg6: memref<1x512xf32, #tpu.memory_space<vmem>>, %arg7: memref<512x512xf32, #tpu.memory_space<vmem>>, %arg8: memref<1x512xf32, #tpu.memory_space<vmem>>, %arg9: memref<2x512xf32, #tpu.memory_space<vmem>>, %arg10: memref<2x512xf32, #tpu.memory_space<vmem>>, %arg11: memref<2x32x256xf32, #tpu.memory_space<vmem>>) attributes {dimension_semantics = [], scalar_prefetch = 0 : i64, scratch_operands = 1 : i64, tpu.core_type = #tpu.core_type<tc>} {
    %cst = arith.constant 0.000000e+00 : f32
    %0 = vector.broadcast %cst : f32 to vector<2x8x256xf32>
    %c0 = arith.constant 0 : index
    %c0_0 = arith.constant 0 : index
    %c0_1 = arith.constant 0 : index
    %1 = vector.load %arg11[%c0, %c0_0, %c0_1] : memref<2x32x256xf32, #tpu.memory_space<vmem>>, vector<2x8x256xf32>
    tpu.vector_store %arg11[%c0, %c0_0, %c0_1], %0 {strides = array<i32>} : memref<2x32x256xf32, #tpu.memory_space<vmem>>, vector<2x8x256xf32>,
    %c0_2 = arith.constant 0 : index
    %c24 = arith.constant 24 : index
    %c0_3 = arith.constant 0 : index
    %2 = vector.load %arg11[%c0_2, %c24, %c0_3] : memref<2x32x256xf32, #tpu.memory_space<vmem>>, vector<2x8x256xf32>
    tpu.vector_store %arg11[%c0_2, %c24, %c0_3], %0 {strides = array<i32>} : memref<2x32x256xf32, #tpu.memory_space<vmem>>, vector<2x8x256xf32>,
    %c0_4 = arith.constant 0 : index
    %c0_5 = arith.constant 0 : index
    %c0_6 = arith.constant 0 : index
    %3 = vector.load %arg0[%c0_4, %c0_5, %c0_6] : memref<2x16x256xf32, #tpu.memory_space<vmem>>, vector<2x16x256xf32>
    %c0_7 = arith.constant 0 : index
    %c8 = arith.constant 8 : index
    %c0_8 = arith.constant 0 : index
    %4 = vector.load %arg11[%c0_7, %c8, %c0_8] : memref<2x32x256xf32, #tpu.memory_space<vmem>>, vector<2x16x256xf32>
    tpu.vector_store %arg11[%c0_7, %c8, %c0_8], %3 {strides = array<i32>} : memref<2x32x256xf32, #tpu.memory_space<vmem>>, vector<2x16x256xf32>,
    %c0_9 = arith.constant 0 : index
    %c0_10 = arith.constant 0 : index
    %c0_11 = arith.constant 0 : index
    %5 = vector.load %arg11[%c0_9, %c0_10, %c0_11] : memref<2x32x256xf32, #tpu.memory_space<vmem>>, vector<2x32x256xf32>
    %c0_12 = arith.constant 0 : index
    %c0_13 = arith.constant 0 : index
    %c0_14 = arith.constant 0 : index
    %6 = vector.load %arg1[%c0_12, %c0_13, %c0_14] : memref<3x256x512xf32, #tpu.memory_space<vmem>>, vector<3x256x512xf32>
    %cst_15 = arith.constant 0.000000e+00 : f32
    %7 = vector.broadcast %cst_15 : f32 to vector<32x512xf32>
    %8 = vector.extract_strided_slice %5 {offsets = [0, 0, 0], sizes = [2, 16, 256], strides = [1, 1, 1]} : vector<2x32x256xf32> to vector<2x16x256xf32>
    %9 = vector.shape_cast %8 : vector<2x16x256xf32> to vector<32x256xf32>
    %10 = vector.extract_strided_slice %6 {offsets = [0, 0, 0], sizes = [1, 256, 512], strides = [1, 1, 1]} : vector<3x256x512xf32> to vector<1x256x512xf32>
    %11 = vector.shape_cast %10 : vector<1x256x512xf32> to vector<256x512xf32>
    %cst_16 = arith.constant dense<0.000000e+00> : vector<32x512xf32>
    %12 = tpu.matmul %9, %11, %cst_16 {dimension_numbers = #tpu.dot_dimension_numbers<[1], [0], [0], [1], [0, 0, 1, 1], [], []>} : vector<32x256xf32>, vector<256x512xf32>, vector<32x512xf32> -> vector<32x512xf32>
    %13 = arith.addf %7, %12 : vector<32x512xf32>
    %14 = vector.extract_strided_slice %5 {offsets = [0, 8, 0], sizes = [2, 16, 256], strides = [1, 1, 1]} : vector<2x32x256xf32> to vector<2x16x256xf32>
    %15 = vector.shape_cast %14 : vector<2x16x256xf32> to vector<32x256xf32>
    %16 = vector.extract_strided_slice %6 {offsets = [1, 0, 0], sizes = [1, 256, 512], strides = [1, 1, 1]} : vector<3x256x512xf32> to vector<1x256x512xf32>
    %17 = vector.shape_cast %16 : vector<1x256x512xf32> to vector<256x512xf32>
    %cst_17 = arith.constant dense<0.000000e+00> : vector<32x512xf32>
    %18 = tpu.matmul %15, %17, %cst_17 {dimension_numbers = #tpu.dot_dimension_numbers<[1], [0], [0], [1], [0, 0, 1, 1], [], []>} : vector<32x256xf32>, vector<256x512xf32>, vector<32x512xf32> -> vector<32x512xf32>
    %19 = arith.addf %13, %18 : vector<32x512xf32>
    %20 = vector.extract_strided_slice %5 {offsets = [0, 16, 0], sizes = [2, 16, 256], strides = [1, 1, 1]} : vector<2x32x256xf32> to vector<2x16x256xf32>
    %21 = vector.shape_cast %20 : vector<2x16x256xf32> to vector<32x256xf32>
    %22 = vector.extract_strided_slice %6 {offsets = [2, 0, 0], sizes = [1, 256, 512], strides = [1, 1, 1]} : vector<3x256x512xf32> to vector<1x256x512xf32>
    %23 = vector.shape_cast %22 : vector<1x256x512xf32> to vector<256x512xf32>
    %cst_18 = arith.constant dense<0.000000e+00> : vector<32x512xf32>
    %24 = tpu.matmul %21, %23, %cst_18 {dimension_numbers = #tpu.dot_dimension_numbers<[1], [0], [0], [1], [0, 0, 1, 1], [], []>} : vector<32x256xf32>, vector<256x512xf32>, vector<32x512xf32> -> vector<32x512xf32>
    %25 = arith.addf %19, %24 : vector<32x512xf32>
    %c0_19 = arith.constant 0 : index
    %c0_20 = arith.constant 0 : index
    %26 = vector.load %arg2[%c0_19, %c0_20] : memref<1x512xf32, #tpu.memory_space<vmem>>, vector<1x512xf32>
    %c0_21 = arith.constant 0 : index
    %c0_22 = arith.constant 0 : index
    %27 = vector.load %arg3[%c0_21, %c0_22] : memref<1x512xf32, #tpu.memory_space<vmem>>, vector<1x512xf32>
    %cst_23 = arith.constant dense<0.000000e+00> : vector<512xf32>
    %28 = vector.multi_reduction <add>, %25, %cst_23 [0] : vector<32x512xf32> to vector<512xf32>
    %29 = vector.shape_cast %28 : vector<512xf32> to vector<1x512xf32>
    %30 = arith.mulf %25, %25 : vector<32x512xf32>
    %cst_24 = arith.constant dense<0.000000e+00> : vector<512xf32>
    %31 = vector.multi_reduction <add>, %30, %cst_24 [0] : vector<32x512xf32> to vector<512xf32>
    %32 = vector.shape_cast %31 : vector<512xf32> to vector<1x512xf32>
    %cst_25 = arith.constant 3.125000e-02 : f32
    %33 = vector.broadcast %cst_25 : f32 to vector<1x512xf32>
    %34 = arith.mulf %29, %33 : vector<1x512xf32>
    %cst_26 = arith.constant 3.125000e-02 : f32
    %35 = vector.broadcast %cst_26 : f32 to vector<1x512xf32>
    %36 = arith.mulf %32, %35 : vector<1x512xf32>
    %37 = arith.mulf %34, %34 : vector<1x512xf32>
    %38 = arith.subf %36, %37 : vector<1x512xf32>
    %cst_27 = arith.constant 9.99999974E-6 : f32
    %39 = vector.broadcast %cst_27 : f32 to vector<1x512xf32>
    %40 = arith.addf %38, %39 : vector<1x512xf32>
    %41 = math.rsqrt %40 : vector<1x512xf32>
    %42 = arith.mulf %26, %41 : vector<1x512xf32>
    %43 = arith.mulf %34, %42 : vector<1x512xf32>
    %44 = arith.subf %27, %43 : vector<1x512xf32>
    %45 = vector.broadcast %42 : vector<1x512xf32> to vector<32x512xf32>
    %46 = arith.mulf %25, %45 : vector<32x512xf32>
    %47 = vector.broadcast %44 : vector<1x512xf32> to vector<32x512xf32>
    %48 = arith.addf %46, %47 : vector<32x512xf32>
    %cst_28 = arith.constant 0.000000e+00 : f32
    %49 = vector.broadcast %cst_28 : f32 to vector<32x512xf32>
    %50 = arith.maximumf %48, %49 : vector<32x512xf32>
    %51 = vector.shape_cast %50 : vector<32x512xf32> to vector<2x16x512xf32>
    %cst_29 = arith.constant dense<0.000000e+00> : vector<2x512xf32>
    %52 = vector.multi_reduction <add>, %51, %cst_29 [1] : vector<2x16x512xf32> to vector<2x512xf32>
    %cst_30 = arith.constant 1.600000e+01 : f32
    %53 = vector.broadcast %cst_30 : f32 to vector<2x512xf32>
    %54 = arith.divf %52, %53 : vector<2x512xf32>
    %c0_31 = arith.constant 0 : index
    %c0_32 = arith.constant 0 : index
    %55 = vector.load %arg10[%c0_31, %c0_32] : memref<2x512xf32, #tpu.memory_space<vmem>>, vector<2x512xf32>
    tpu.vector_store %arg10[%c0_31, %c0_32], %54 {strides = array<i32>} : memref<2x512xf32, #tpu.memory_space<vmem>>, vector<2x512xf32>,
    %c0_33 = arith.constant 0 : index
    %c0_34 = arith.constant 0 : index
    %56 = vector.load %arg4[%c0_33, %c0_34] : memref<512x512xf32, #tpu.memory_space<vmem>>, vector<512x512xf32>
    %cst_35 = arith.constant dense<0.000000e+00> : vector<2x512xf32>
    %57 = tpu.matmul %54, %56, %cst_35 {dimension_numbers = #tpu.dot_dimension_numbers<[1], [0], [0], [1], [0, 0, 1, 1], [], []>} : vector<2x512xf32>, vector<512x512xf32>, vector<2x512xf32> -> vector<2x512xf32>
    %c0_36 = arith.constant 0 : index
    %c0_37 = arith.constant 0 : index
    %58 = vector.load %arg5[%c0_36, %c0_37] : memref<1x512xf32, #tpu.memory_space<vmem>>, vector<1x512xf32>
    %c0_38 = arith.constant 0 : index
    %c0_39 = arith.constant 0 : index
    %59 = vector.load %arg6[%c0_38, %c0_39] : memref<1x512xf32, #tpu.memory_space<vmem>>, vector<1x512xf32>
    %cst_40 = arith.constant dense<0.000000e+00> : vector<512xf32>
    %60 = vector.multi_reduction <add>, %57, %cst_40 [0] : vector<2x512xf32> to vector<512xf32>
    %61 = vector.shape_cast %60 : vector<512xf32> to vector<1x512xf32>
    %62 = arith.mulf %57, %57 : vector<2x512xf32>
    %cst_41 = arith.constant dense<0.000000e+00> : vector<512xf32>
    %63 = vector.multi_reduction <add>, %62, %cst_41 [0] : vector<2x512xf32> to vector<512xf32>
    %64 = vector.shape_cast %63 : vector<512xf32> to vector<1x512xf32>
    %cst_42 = arith.constant 5.000000e-01 : f32
    %65 = vector.broadcast %cst_42 : f32 to vector<1x512xf32>
    %66 = arith.mulf %61, %65 : vector<1x512xf32>
    %cst_43 = arith.constant 5.000000e-01 : f32
    %67 = vector.broadcast %cst_43 : f32 to vector<1x512xf32>
    %68 = arith.mulf %64, %67 : vector<1x512xf32>
    %69 = arith.mulf %66, %66 : vector<1x512xf32>
    %70 = arith.subf %68, %69 : vector<1x512xf32>
    %cst_44 = arith.constant 9.99999974E-6 : f32
    %71 = vector.broadcast %cst_44 : f32 to vector<1x512xf32>
    %72 = arith.addf %70, %71 : vector<1x512xf32>
    %73 = math.rsqrt %72 : vector<1x512xf32>
    %74 = arith.mulf %58, %73 : vector<1x512xf32>
    %75 = arith.mulf %66, %74 : vector<1x512xf32>
    %76 = arith.subf %59, %75 : vector<1x512xf32>
    %77 = vector.broadcast %74 : vector<1x512xf32> to vector<2x512xf32>
    %78 = arith.mulf %57, %77 : vector<2x512xf32>
    %79 = vector.broadcast %76 : vector<1x512xf32> to vector<2x512xf32>
    %80 = arith.addf %78, %79 : vector<2x512xf32>
    %cst_45 = arith.constant 0.000000e+00 : f32
    %81 = vector.broadcast %cst_45 : f32 to vector<2x512xf32>
    %82 = arith.maximumf %80, %81 : vector<2x512xf32>
    %c0_46 = arith.constant 0 : index
    %c0_47 = arith.constant 0 : index
    %83 = vector.load %arg7[%c0_46, %c0_47] : memref<512x512xf32, #tpu.memory_space<vmem>>, vector<512x512xf32>
    %cst_48 = arith.constant dense<0.000000e+00> : vector<2x512xf32>
    %84 = tpu.matmul %82, %83, %cst_48 {dimension_numbers = #tpu.dot_dimension_numbers<[1], [0], [0], [1], [0, 0, 1, 1], [], []>} : vector<2x512xf32>, vector<512x512xf32>, vector<2x512xf32> -> vector<2x512xf32>
    %c0_49 = arith.constant 0 : index
    %c0_50 = arith.constant 0 : index
    %85 = vector.load %arg8[%c0_49, %c0_50] : memref<1x512xf32, #tpu.memory_space<vmem>>, vector<1x512xf32>
    %86 = vector.broadcast %85 : vector<1x512xf32> to vector<2x512xf32>
    %87 = arith.addf %84, %86 : vector<2x512xf32>
    %c0_51 = arith.constant 0 : index
    %c0_52 = arith.constant 0 : index
    %88 = vector.load %arg9[%c0_51, %c0_52] : memref<2x512xf32, #tpu.memory_space<vmem>>, vector<2x512xf32>
    tpu.vector_store %arg9[%c0_51, %c0_52], %87 {strides = array<i32>} : memref<2x512xf32, #tpu.memory_space<vmem>>, vector<2x512xf32>,
    return
  }
}

</mosaic_0001>

<bundles_post_ra>
// kernel: fcn_forward.3
= control target key start
LH: loop header
LB: loop body
LE: loop exit
PB: predicated region body
PF: predicated region fallthrough
CT: control target
= control target key end

     0   :  { %9 = vsyncpa [#allocation3], 0  ;;  %s452_s0 = inlined_call_operand.vmem [shape: f32[2,16,28], index: 0, kind: input, shape index: {}]   ;;  %s453_s1 = inlined_call_operand.hbm [shape: f32[28,128], index: 1, kind: input, shape index: {}]   ;;  %s454_s2 = inlined_call_operand.hbm [shape: f32[1,128], index: 2, kind: input, shape index: {}]   ;;  %s455_s3 = inlined_call_operand.hbm [shape: f32[1,128], index: 3, kind: input, shape index: {}]   ;;  %s456_s4 = inlined_call_operand.vmem [shape: f32[2,16,128], index: 4, kind: output, shape index: {}]  }
   0x1   :  { %10 = vsyncpa [#allocation5], 0  ;;  %s350_s15 = smov [#allocation4]   ;;  %s351_s17 = smov [#allocation2]  }
   0x2   :  { %s31_s16 = sshll.u32 %s350_s15, 4  ;;  %s18_s18 = sshll.u32 %s351_s17, 4  ;;  %s32_s16 = int_to_ptr.vmem [resolvable:$true] %s31_s16  ;;  %s381_s18 = int_to_ptr.vmem [resolvable:$true] %s18_s18 }
   0x3   :  { %s280_s21 = scalar_lea.hbm %s454_s2, 16 }
   0x4   :  { %p281_p0 = scmp.ne.s32.totalorder %s454_s2, %s280_s21  ;;  %p284_p1 = scmp.lt.u32.totalorder %s280_s21, %s454_s2 }
   0x6   :  { %p286_p2 = pnand %p284_p1, %p281_p0 }
   0x8   :  { %289 = shalt.err (!%p286_p2)
}
   0x9   :  { %s290_s26 = scalar_lea.vmem %s32_s16, 16  ;;  %s294_s27 = scalar_lea.vmem %s32_s16, 32 }
   0xa   :  { %p291_p3 = scmp.ne.s32.totalorder %s32_s16, %s290_s26  ;;  %p295_p4 = scmp.lt.s32.totalorder %s32_s16, %s32_s16 }
   0xb   :  { %p296_p5 = scmp.lt.s32.totalorder %s294_s27, %s290_s26 }
   0xd   :  { %p297_p6 = por %p296_p5, %p295_p4 }
   0xf   :  { %p298_p7 = pnand %p297_p6, %p291_p3 }
  0x11   :  { %301 = shalt.err (!%p298_p7)
}
  0x12   :  { %34 = dma.hbm_to_vmem [thread:$0]  %s454_s2, 16, %s32_s16, [#allocation5]  }
  0x13   :  { %s302_s6 = scalar_lea.hbm %s453_s1, 512 }
  0x14   :  { %p303_p8 = scmp.ne.s32.totalorder %s453_s1, %s302_s6  ;;  %p306_p9 = scmp.lt.u32.totalorder %s302_s6, %s453_s1 }
  0x16   :  { %p308_p10 = pnand %p306_p9, %p303_p8 }
  0x18   :  { %311 = shalt.err (!%p308_p10)
}
  0x19   :  { %s312_s11 = scalar_lea.vmem %s381_s18, 512  ;;  %p317_p12 = scmp.lt.s32.totalorder %s381_s18, %s381_s18 }
  0x1a   :  { %p313_p11 = scmp.ne.s32.totalorder %s381_s18, %s312_s11  ;;  %p318_p13 = scmp.lt.s32.totalorder %s312_s11, %s312_s11 }
  0x1c   :  { %p319_p0 = por %p318_p13, %p317_p12 }
  0x1e   :  { %p320_p1 = pnand %p319_p0, %p313_p11 }
  0x20   :  { %323 = shalt.err (!%p320_p1)
}
  0x21   :  { %s352_s2 = smov 128   ;;  %s353_s12 = smov 8  }
  0x22   :  { %24 = dma.hbm_to_vmem [thread:$0]  %s453_s1, 512, %s381_s18, [#allocation3], %s352_s2, %s352_s2, %s353_s12  }
  0x23   :  { %s354_s15 = smov [#allocation6]   ;;  %s324_s20 = scalar_lea.hbm %s455_s3, 16 }
  0x24   :  { %s41_s16 = sshll.u32 %s354_s15, 4  ;;  %p325_p2 = scmp.ne.s32.totalorder %s455_s3, %s324_s20  ;;  %s42_s16 = int_to_ptr.vmem [resolvable:$true] %s41_s16 }
  0x25   :  { %p328_p3 = scmp.lt.u32.totalorder %s324_s20, %s455_s3 }
  0x27   :  { %p330_p4 = pnand %p328_p3, %p325_p2 }
  0x29   :  { %333 = shalt.err (!%p330_p4)
}
  0x2a   :  { %s334_s25 = scalar_lea.vmem %s42_s16, 16  ;;  %s338_s1 = scalar_lea.vmem %s42_s16, 32 }
  0x2b   :  { %p335_p5 = scmp.ne.s32.totalorder %s42_s16, %s334_s25  ;;  %p339_p6 = scmp.lt.s32.totalorder %s42_s16, %s42_s16 }
  0x2c   :  { %p340_p7 = scmp.lt.s32.totalorder %s338_s1, %s334_s25 }
  0x2e   :  { %p341_p8 = por %p340_p7, %p339_p6 }
  0x30   :  { %p342_p9 = pnand %p341_p8, %p335_p5 }
  0x32   :  { %345 = shalt.err (!%p342_p9)
}
  0x33   :  { %44 = dma.hbm_to_vmem [thread:$0]  %s455_s3, 16, %s42_s16, [#allocation5]  }
  0x34   :  { %346 = dma.done.wait [#allocation3], 512  }
  0x35   :  { %347 = vsyncadd [#allocation3], 4294966784 }
  0x36   :  { %348 = dma.done.wait [#allocation5], 32  }
  0x37   :  { %349 = vsyncadd [#allocation5], 4294967264  ;;  %vm75_vm0 = vcmask 1043456   ;;  %vm62_vm1 = vcmask 228352   ;;  %v58_v0 = vld [vmem:[#allocation2] sm:$0xff]  ;;  %v59_v1 = vld [vmem:[#allocation2 + $0x8] sm:$0xff]  ;;  %v198_v41 = vlaneseq }
  0x38   :  { %v60_v2 = vld [vmem:[#allocation2 + $0x10] sm:$0xff]  ;;  %v258_v3 = vpack.c.bf16 %v59_v1, %v58_v0  ;;  %v61_v4 = vld [vmem:[#allocation2 + $0x18] sm:$0xf]  ;;  %v54_v5 = vld [vmem:[%s452_s0] sm:$0xff]  ;;  %vm355_vm2 = vmmov 1  }
  0x39   :  { %v262_v6 = vpack.c.bf16 %v61_v4, %v60_v2  ;;  %vm263_vm3 = vmpackc.low %vm75_vm0, %vm355_vm2  ;;  %252 = vmatprep.mubr.msk.f32.mxu0 %vm62_vm1, %v54_v5  ;;  %v56_v7 = vld [vmem:[%s452_s0 + $0x10] sm:$0xff]  ;;  %v55_v8 = vld [vmem:[%s452_s0 + $0x8] sm:$0xff]  ;;  %v199_v42 = vshrl.u32 %v198_v41, 7 }
  0x3a   :  { %259 = vmatprep.subr.bf16.mxu0 %v258_v3  ;;  %268 = vmatprep.subr.bf16.mxu1 %v258_v3  ;;  %v57_v9 = vld [vmem:[%s452_s0 + $0x18] sm:$0xff]  ;;  %v164_v43 = vld [vmem:[#allocation4] sm:$0x1]  ;;  %v165_v47 = vld [vmem:[#allocation6] sm:$0x1] }
  0x3b   :  { %261 = vmatpush3.bf16.msra.mxu0 %v258_v3  ;;  %270 = vmatpush3.bf16.msra.mxu1 %v258_v3  ;;  %v200_v44 = vsub.s32 0, %v199_v42 }
  0x3c   :  { %264 = vmatprep.subr.msk.bf16.mxu0 %vm263_vm3, %v262_v6  ;;  %269 = vmatprep.subr.msk.bf16.mxu1 %vm263_vm3, %v262_v6 }
  0x3d   :  { %255 = vmatprep.mubr.msk.f32.mxu1 %vm62_vm1, %v56_v7 }
  0x3f   :  { %267 = vmatpush3.bf16.msk.msra.mxu0 %vm263_vm3, %v262_v6  ;;  %271 = vmatpush3.bf16.msk.msra.mxu1 %vm263_vm3, %v262_v6 }
  0x42   :  { %253 = vmatmul.mubr.msk.f32.vlgmr.msra.gmra.mrb[0].mxu0 %vm62_vm1, %v55_v8  ;;  %256 = vmatmul.mubr.msk.f32.vlgmr.msra.gmra.mrb[0].mxu1 %vm62_vm1, %v57_v9 }
 0x115   :  { %v254_v10 = vpop.f32.mrb[0].mxu0  ;;  %v257_v11 = vpop.f32.mrb[0].mxu1 }
 0x116   :  { %v176_v12 = vmul.f32 %v254_v10, %v254_v10  ;;  %v145_v13 = vpop.f32.mrb[1].mxu0  ;;  %v155_v14 = vpop.f32.mrb[1].mxu1  ;;  %v178_v20 = vmul.f32 %v257_v11, %v257_v11 }
 0x117   :  { %v166_v15 = vadd.f32 %v254_v10, %v145_v13  ;;  %v175_v16 = vmul.f32 %v145_v13, %v145_v13  ;;  %v177_v17 = vmul.f32 %v155_v14, %v155_v14 }
 0x119   :  { %v179_v18 = vadd.f32 %v176_v12, %v175_v16  ;;  %v167_v19 = vadd.f32 %v166_v15, %v155_v14 }
 0x11b   :  { %v168_v21 = vadd.f32 %v257_v11, %v167_v19  ;;  %v180_v22 = vadd.f32 %v179_v18, %v177_v17 }
 0x11d   :  { %v169_v23 = vrot.slane %v168_v21, 4  ;;  %v181_v24 = vadd.f32 %v180_v22, %v178_v20 }
 0x11f   :  { %v170_v25 = vadd.f32 %v169_v23, %v168_v21  ;;  %v182_v26 = vrot.slane %v181_v24, 4 }
 0x121   :  { %v171_v27 = vrot.slane %v170_v25, 2  ;;  %v183_v28 = vadd.f32 %v182_v26, %v181_v24 }
 0x123   :  { %v172_v29 = vadd.f32 %v171_v27, %v170_v25  ;;  %v184_v30 = vrot.slane %v183_v28, 2 }
 0x125   :  { %v173_v31 = vrot.slane %v172_v29, 1  ;;  %v185_v32 = vadd.f32 %v184_v30, %v183_v28 }
 0x127   :  { %v174_v33 = vadd.f32 %v173_v31, %v172_v29  ;;  %v186_v34 = vrot.slane %v185_v32, 1 }
 0x129   :  { %v187_v35 = vadd.f32 %v186_v34, %v185_v32  ;;  %v188_v36 = vmul.f32 0.03125, %v174_v33 }
 0x12b   :  { %v189_v37 = vmul.f32 0.03125, %v187_v35  ;;  %v190_v38 = vmul.f32 %v188_v36, %v188_v36 }
 0x12d   :  { %v191_v39 = vsub.f32 %v189_v37, %v190_v38 }
 0x12f   :  { %v192_v40 = vadd.f32 1e-05, %v191_v39 }
 0x131   :  { %278 = vrsqrt.f32 %v192_v40 }
 0x13b   :  { %v279_v45 = vpop.eup %278 }
 0x13c   :  { %v194_v46 = vmul.f32 %v279_v45, %v164_v43 }
 0x13e   :  { %v195_v48 = vmul.f32 %v194_v46, %v188_v36  ;;  %v201_v49 = vrot.slane %v194_v46, %v200_v44 }
 0x140   :  { %v196_v50 = vsub.f32 %v165_v47, %v195_v48  ;;  %v203_v51 = vmul.f32 %v201_v49, %v145_v13  ;;  %v204_v52 = vmul.f32 %v254_v10, %v201_v49  ;;  %v205_v53 = vmul.f32 %v201_v49, %v155_v14 }
 0x141   :  { %v206_v54 = vmul.f32 %v257_v11, %v201_v49 }
 0x142   :  { %v211_v55 = vrot.slane %v196_v50, %v200_v44 }
 0x144   :  { %v213_v56 = vadd.f32 %v211_v55, %v203_v51  ;;  %v214_v57 = vadd.f32 %v211_v55, %v204_v52  ;;  %v215_v58 = vadd.f32 %v211_v55, %v205_v53  ;;  %v216_v59 = vadd.f32 %v211_v55, %v206_v54 }
 0x146   :  { %v217_v60 = vmax.f32 %v213_v56, 0.0  ;;  %v218_v61 = vmax.f32 %v214_v57, 0.0  ;;  %v219_v62 = vmax.f32 %v215_v58, 0.0  ;;  %v220_v63 = vmax.f32 %v216_v59, 0.0 }
 0x148   :  { %221 = vst [vmem:[%s456_s4] sm:$0xff] %v217_v60  ;;  %222 = vst [vmem:[%s456_s4 + $0x8] sm:$0xff] %v218_v61 }
 0x149   :  { %223 = vst [vmem:[%s456_s4 + $0x10] sm:$0xff] %v219_v62  ;;  %224 = vst [vmem:[%s456_s4 + $0x18] sm:$0xff] %v220_v63 }
 0x14a   :  { %229 = vsyncpa [#allocation3], 1 }
 0x14b   :  { %230 = vsyncpa [#allocation5], 1 }

// kernel: fcn_forward.4
= control target key start
LH: loop header
LB: loop body
LE: loop exit
PB: predicated region body
PF: predicated region fallthrough
CT: control target
= control target key end

     0   :  { %9 = vsyncpa [#allocation4], 0  ;;  %s1411_s0 = inlined_call_operand.vmem [shape: f32[2,16,128], index: 0, kind: input, shape index: {}]   ;;  %s1412_s1 = inlined_call_operand.hbm [shape: f32[5,128,256], index: 1, kind: input, shape index: {}]   ;;  %s1413_s2 = inlined_call_operand.hbm [shape: f32[1,256], index: 2, kind: input, shape index: {}]   ;;  %s1414_s3 = inlined_call_operand.hbm [shape: f32[1,256], index: 3, kind: input, shape index: {}]   ;;  %s1415_s4 = inlined_call_operand.vmem [shape: f32[2,16,256], index: 4, kind: output, shape index: {}]  }
   0x1   :  { %10 = vsyncpa [#allocation6], 0  ;;  %s1179_s15 = smov [#allocation5]   ;;  %s1180_s17 = smov [#allocation3]  }
   0x2   :  { %s31_s16 = sshll.u32 %s1179_s15, 4  ;;  %s18_s18 = sshll.u32 %s1180_s17, 4  ;;  %s32_s16 = int_to_ptr.vmem [resolvable:$true] %s31_s16  ;;  %s1211_s18 = int_to_ptr.vmem [resolvable:$true] %s18_s18 }
   0x3   :  { %s1109_s21 = scalar_lea.hbm %s1413_s2, 32 }
   0x4   :  { %p1110_p0 = scmp.ne.s32.totalorder %s1413_s2, %s1109_s21  ;;  %p1113_p1 = scmp.lt.u32.totalorder %s1109_s21, %s1413_s2 }
   0x6   :  { %p1115_p2 = pnand %p1113_p1, %p1110_p0 }
   0x8   :  { %1118 = shalt.err (!%p1115_p2)
}
   0x9   :  { %s1119_s26 = scalar_lea.vmem %s32_s16, 32  ;;  %p1124_p4 = scmp.lt.s32.totalorder %s32_s16, %s32_s16 }
   0xa   :  { %p1120_p3 = scmp.ne.s32.totalorder %s32_s16, %s1119_s26  ;;  %p1125_p5 = scmp.lt.s32.totalorder %s1119_s26, %s1119_s26 }
   0xc   :  { %p1126_p6 = por %p1125_p5, %p1124_p4 }
   0xe   :  { %p1127_p7 = pnand %p1126_p6, %p1120_p3 }
  0x10   :  { %1130 = shalt.err (!%p1127_p7)
}
  0x11   :  { %34 = dma.hbm_to_vmem [thread:$0]  %s1413_s2, 32, %s32_s16, [#allocation6]  }
  0x12   :  { %s1131_s5 = scalar_lea.hbm %s1412_s1, 20480 }
  0x13   :  { %p1132_p8 = scmp.ne.s32.totalorder %s1412_s1, %s1131_s5  ;;  %p1135_p9 = scmp.lt.u32.totalorder %s1131_s5, %s1412_s1 }
  0x15   :  { %p1137_p10 = pnand %p1135_p9, %p1132_p8 }
  0x17   :  { %1140 = shalt.err (!%p1137_p10)
}
  0x18   :  { %s1141_s10 = scalar_lea.vmem %s1211_s18, 20480  ;;  %p1146_p12 = scmp.lt.s32.totalorder %s1211_s18, %s1211_s18 }
  0x19   :  { %p1142_p11 = scmp.ne.s32.totalorder %s1211_s18, %s1141_s10  ;;  %p1147_p13 = scmp.lt.s32.totalorder %s1141_s10, %s1141_s10 }
  0x1b   :  { %p1148_p0 = por %p1147_p13, %p1146_p12 }
  0x1d   :  { %p1149_p1 = pnand %p1148_p0, %p1142_p11 }
  0x1f   :  { %1152 = shalt.err (!%p1149_p1)
}
  0x20   :  { %s1181_s2 = smov 256   ;;  %s1182_s11 = smov 16  }
  0x21   :  { %24 = dma.hbm_to_vmem [thread:$0]  %s1412_s1, 20480, %s1211_s18, [#allocation4], %s1181_s2, %s1181_s2, %s1182_s11  }
  0x22   :  { %s1183_s14 = smov [#allocation7]   ;;  %s1153_s19 = scalar_lea.hbm %s1414_s3, 32 }
  0x23   :  { %s41_s15 = sshll.u32 %s1183_s14, 4  ;;  %p1154_p2 = scmp.ne.s32.totalorder %s1414_s3, %s1153_s19  ;;  %s42_s15 = int_to_ptr.vmem [resolvable:$true] %s41_s15 }
  0x24   :  { %p1157_p3 = scmp.lt.u32.totalorder %s1153_s19, %s1414_s3 }
  0x26   :  { %p1159_p4 = pnand %p1157_p3, %p1154_p2 }
  0x28   :  { %1162 = shalt.err (!%p1159_p4)
}
  0x29   :  { %s1163_s24 = scalar_lea.vmem %s42_s15, 32  ;;  %p1168_p6 = scmp.lt.s32.totalorder %s42_s15, %s42_s15 }
  0x2a   :  { %p1164_p5 = scmp.ne.s32.totalorder %s42_s15, %s1163_s24  ;;  %p1169_p7 = scmp.lt.s32.totalorder %s1163_s24, %s1163_s24 }
  0x2c   :  { %p1170_p8 = por %p1169_p7, %p1168_p6 }
  0x2e   :  { %p1171_p9 = pnand %p1170_p8, %p1164_p5 }
  0x30   :  { %1174 = shalt.err (!%p1171_p9)
}
  0x31   :  { %44 = dma.hbm_to_vmem [thread:$0]  %s1414_s3, 32, %s42_s15, [#allocation6]  }
  0x32   :  { %1175 = dma.done.wait [#allocation4], 20480  }
  0x33   :  { %1176 = vsyncadd [#allocation4], 4294946816 }
  0x34   :  { %1177 = dma.done.wait [#allocation6], 64  }
  0x35   :  { %1178 = vsyncadd [#allocation6], 4294967232  ;;  %v1184_v0 = vmov 0.0   ;;  %v107_v1 = vld [vmem:[#allocation3 + $0x108] sm:$0xff]  ;;  %v109_v2 = vld [vmem:[#allocation3 + $0x118] sm:$0xff]  ;;  %vm240_vm0 = vcmask 1043456  }
  0x36   :  { %319 = vmatprep.mubr.f32.mxu1 %v1184_v0  ;;  %497 = vmatprep.mubr.f32.mxu0 %v1184_v0  ;;  %v139_v3 = vld [vmem:[#allocation3 + $0x208] sm:$0xff]  ;;  %v890_v4 = vpack.c.bf16 %v109_v2, %v107_v1  ;;  %v141_v5 = vld [vmem:[#allocation3 + $0x218] sm:$0xff]  ;;  %v106_v6 = vld [vmem:[#allocation3 + $0x100] sm:$0xff] }
  0x37   :  { %v108_v7 = vld [vmem:[#allocation3 + $0x110] sm:$0xff]  ;;  %v954_v8 = vpack.c.bf16 %v141_v5, %v139_v3  ;;  %v138_v10 = vld [vmem:[#allocation3 + $0x200] sm:$0xff]  ;;  %v111_v12 = vld [vmem:[#allocation3 + $0x128] sm:$0xff] }
  0x38   :  { %v892_v9 = vpack.c.bf16 %v108_v7, %v106_v6  ;;  %v140_v11 = vld [vmem:[#allocation3 + $0x210] sm:$0xff]  ;;  %891 = vmatprep.subr.bf16.mxu1 %v890_v4  ;;  %v113_v14 = vld [vmem:[#allocation3 + $0x138] sm:$0xff]  ;;  %v143_v15 = vld [vmem:[#allocation3 + $0x228] sm:$0xff] }
  0x39   :  { %v956_v13 = vpack.c.bf16 %v140_v11, %v138_v10  ;;  %v145_v16 = vld [vmem:[#allocation3 + $0x238] sm:$0xff]  ;;  %955 = vmatprep.subr.bf16.mxu0 %v954_v8  ;;  %v894_v17 = vpack.c.bf16 %v113_v14, %v111_v12  ;;  %v110_v19 = vld [vmem:[#allocation3 + $0x120] sm:$0xff]  ;;  %v112_v20 = vld [vmem:[#allocation3 + $0x130] sm:$0xff] }
  0x3a   :  { %893 = vmatpush1.bf16.msra.mxu1 %v892_v9  ;;  %v958_v18 = vpack.c.bf16 %v145_v16, %v143_v15  ;;  %v142_v21 = vld [vmem:[#allocation3 + $0x220] sm:$0xff]  ;;  %v896_v22 = vpack.c.bf16 %v112_v20, %v110_v19  ;;  %v144_v23 = vld [vmem:[#allocation3 + $0x230] sm:$0xff]  ;;  %v115_v24 = vld [vmem:[#allocation3 + $0x148] sm:$0xff] }
  0x3b   :  { %957 = vmatpush1.bf16.msra.mxu0 %v956_v13  ;;  %v117_v25 = vld [vmem:[#allocation3 + $0x158] sm:$0xff]  ;;  %895 = vmatprep.subr.bf16.mxu1 %v894_v17  ;;  %v960_v26 = vpack.c.bf16 %v144_v23, %v142_v21  ;;  %v147_v28 = vld [vmem:[#allocation3 + $0x248] sm:$0xff]  ;;  %v114_v30 = vld [vmem:[#allocation3 + $0x140] sm:$0xff] }
  0x3c   :  { %959 = vmatprep.subr.bf16.mxu0 %v958_v18  ;;  %v898_v27 = vpack.c.bf16 %v117_v25, %v115_v24  ;;  %v149_v29 = vld [vmem:[#allocation3 + $0x258] sm:$0xff]  ;;  %v116_v32 = vld [vmem:[#allocation3 + $0x150] sm:$0xff]  ;;  %v146_v33 = vld [vmem:[#allocation3 + $0x240] sm:$0xff] }
  0x3d   :  { %v962_v31 = vpack.c.bf16 %v149_v29, %v147_v28  ;;  %v148_v34 = vld [vmem:[#allocation3 + $0x250] sm:$0xff]  ;;  %v900_v35 = vpack.c.bf16 %v116_v32, %v114_v30  ;;  %v119_v36 = vld [vmem:[#allocation3 + $0x168] sm:$0xff]  ;;  %v121_v37 = vld [vmem:[#allocation3 + $0x178] sm:$0xff] }
  0x3e   :  { %897 = vmatpush1.bf16.msra.mxu1 %v896_v22  ;;  %v151_v38 = vld [vmem:[#allocation3 + $0x268] sm:$0xff]  ;;  %v964_v39 = vpack.c.bf16 %v148_v34, %v146_v33  ;;  %v902_v40 = vpack.c.bf16 %v121_v37, %v119_v36  ;;  %v153_v41 = vld [vmem:[#allocation3 + $0x278] sm:$0xff]  ;;  %v118_v42 = vld [vmem:[#allocation3 + $0x160] sm:$0xff] }
  0x3f   :  { %961 = vmatpush1.bf16.msra.mxu0 %v960_v26  ;;  %899 = vmatprep.subr.bf16.mxu1 %v898_v27  ;;  %v120_v43 = vld [vmem:[#allocation3 + $0x170] sm:$0xff]  ;;  %v966_v44 = vpack.c.bf16 %v153_v41, %v151_v38  ;;  %v150_v45 = vld [vmem:[#allocation3 + $0x260] sm:$0xff]  ;;  %v123_v47 = vld [vmem:[#allocation3 + $0x188] sm:$0xff]  ;;  %v1262_v38 = vrot.slane %v1184_v0, 4 }
  0x40   :  { %963 = vmatprep.subr.bf16.mxu0 %v962_v31  ;;  %v152_v46 = vld [vmem:[#allocation3 + $0x270] sm:$0xff]  ;;  %v125_v48 = vld [vmem:[#allocation3 + $0x198] sm:$0xff]  ;;  %v155_v49 = vld [vmem:[#allocation3 + $0x288] sm:$0xff]  ;;  %v904_v51 = vpack.c.bf16 %v120_v43, %v118_v42 }
  0x41   :  { %v157_v50 = vld [vmem:[#allocation3 + $0x298] sm:$0xff]  ;;  %v968_v52 = vpack.c.bf16 %v152_v46, %v150_v45  ;;  %v906_v53 = vpack.c.bf16 %v125_v48, %v123_v47  ;;  %v122_v54 = vld [vmem:[#allocation3 + $0x180] sm:$0xff]  ;;  %v124_v55 = vld [vmem:[#allocation3 + $0x190] sm:$0xff] }
  0x42   :  { %901 = vmatpush1.bf16.msra.mxu1 %v900_v35  ;;  %v154_v56 = vld [vmem:[#allocation3 + $0x280] sm:$0xff]  ;;  %v970_v57 = vpack.c.bf16 %v157_v50, %v155_v49  ;;  %v156_v58 = vld [vmem:[#allocation3 + $0x290] sm:$0xff]  ;;  %v127_v59 = vld [vmem:[#allocation3 + $0x1a8] sm:$0xff]  ;;  %v908_v63 = vpack.c.bf16 %v124_v55, %v122_v54 }
  0x43   :  { %965 = vmatpush1.bf16.msra.mxu0 %v964_v39  ;;  %903 = vmatprep.subr.bf16.mxu1 %v902_v40  ;;  %v129_v60 = vld [vmem:[#allocation3 + $0x1b8] sm:$0xff]  ;;  %v159_v61 = vld [vmem:[#allocation3 + $0x2a8] sm:$0xff]  ;;  %v972_v1 = vpack.c.bf16 %v156_v58, %v154_v56  ;;  %v126_v3 = vld [vmem:[#allocation3 + $0x1a0] sm:$0xff] }
  0x44   :  { %967 = vmatprep.subr.bf16.mxu0 %v966_v44  ;;  %v161_v62 = vld [vmem:[#allocation3 + $0x2b8] sm:$0xff]  ;;  %v910_v2 = vpack.c.bf16 %v129_v60, %v127_v59  ;;  %v128_v4 = vld [vmem:[#allocation3 + $0x1b0] sm:$0xff]  ;;  %v158_v5 = vld [vmem:[#allocation3 + $0x2a0] sm:$0xff] }
  0x45   :  { %v974_v6 = vpack.c.bf16 %v161_v62, %v159_v61  ;;  %v160_v7 = vld [vmem:[#allocation3 + $0x2b0] sm:$0xff]  ;;  %v131_v8 = vld [vmem:[#allocation3 + $0x1c8] sm:$0xff]  ;;  %v133_v9 = vld [vmem:[#allocation3 + $0x1d8] sm:$0xff]  ;;  %v912_v12 = vpack.c.bf16 %v128_v4, %v126_v3 }
  0x46   :  { %905 = vmatpush1.bf16.msra.mxu1 %v904_v51  ;;  %v163_v10 = vld [vmem:[#allocation3 + $0x2c8] sm:$0xff]  ;;  %v165_v11 = vld [vmem:[#allocation3 + $0x2d8] sm:$0xff]  ;;  %v976_v13 = vpack.c.bf16 %v160_v7, %v158_v5  ;;  %v914_v14 = vpack.c.bf16 %v133_v9, %v131_v8  ;;  %v130_v15 = vld [vmem:[#allocation3 + $0x1c0] sm:$0xff] }
  0x47   :  { %969 = vmatpush1.bf16.msra.mxu0 %v968_v52  ;;  %907 = vmatprep.subr.bf16.mxu1 %v906_v53  ;;  %v132_v16 = vld [vmem:[#allocation3 + $0x1d0] sm:$0xff]  ;;  %v162_v17 = vld [vmem:[#allocation3 + $0x2c0] sm:$0xff]  ;;  %v978_v18 = vpack.c.bf16 %v165_v11, %v163_v10  ;;  %v135_v20 = vld [vmem:[#allocation3 + $0x1e8] sm:$0xff] }
  0x48   :  { %971 = vmatprep.subr.bf16.mxu0 %v970_v57  ;;  %v164_v19 = vld [vmem:[#allocation3 + $0x2d0] sm:$0xff]  ;;  %v137_v21 = vld [vmem:[#allocation3 + $0x1f8] sm:$0xff]  ;;  %v167_v22 = vld [vmem:[#allocation3 + $0x2e8] sm:$0xff]  ;;  %v916_v24 = vpack.c.bf16 %v132_v16, %v130_v15 }
  0x49   :  { %v169_v23 = vld [vmem:[#allocation3 + $0x2f8] sm:$0xff]  ;;  %v134_v25 = vld [vmem:[#allocation3 + $0x1e0] sm:$0xff]  ;;  %v980_v26 = vpack.c.bf16 %v164_v19, %v162_v17  ;;  %v918_v27 = vpack.c.bf16 %v137_v21, %v135_v20  ;;  %v136_v28 = vld [vmem:[#allocation3 + $0x1f0] sm:$0xff] }
  0x4a   :  { %909 = vmatpush1.bf16.msra.mxu1 %v908_v63  ;;  %v166_v29 = vld [vmem:[#allocation3 + $0x2e0] sm:$0xff]  ;;  %v982_v31 = vpack.c.bf16 %v169_v23, %v167_v22  ;;  %v168_v32 = vld [vmem:[#allocation3 + $0x2f0] sm:$0xff]  ;;  %v75_v33 = vld [vmem:[#allocation3 + $0x8] sm:$0xff]  ;;  %v920_v37 = vpack.c.bf16 %v136_v28, %v134_v25 }
  0x4b   :  { %973 = vmatpush1.bf16.msra.mxu0 %v972_v1  ;;  %911 = vmatprep.subr.bf16.mxu1 %v910_v2  ;;  %v1259_v30 = vld [vmem:[%s1411_s0] sm:$0xff]  ;;  %v77_v34 = vld [vmem:[#allocation3 + $0x18] sm:$0xff]  ;;  %v171_v35 = vld [vmem:[#allocation3 + $0x308] sm:$0xff]  ;;  %v984_v40 = vpack.c.bf16 %v168_v32, %v166_v29 }
  0x4c   :  { %975 = vmatprep.subr.bf16.mxu0 %v974_v6  ;;  %v173_v36 = vld [vmem:[#allocation3 + $0x318] sm:$0xff]  ;;  %v242_v39 = vrot.slane %v1259_v30, 4  ;;  %v922_v41 = vpack.c.bf16 %v77_v34, %v75_v33  ;;  %v74_v42 = vld [vmem:[#allocation3] sm:$0xff]  ;;  %v76_v43 = vld [vmem:[#allocation3 + $0x10] sm:$0xff] }
  0x4d   :  { %v170_v44 = vld [vmem:[#allocation3 + $0x300] sm:$0xff]  ;;  %v986_v45 = vpack.c.bf16 %v173_v36, %v171_v35  ;;  %v172_v46 = vld [vmem:[#allocation3 + $0x310] sm:$0xff]  ;;  %v79_v47 = vld [vmem:[#allocation3 + $0x28] sm:$0xff]  ;;  %v924_v52 = vpack.c.bf16 %v76_v43, %v74_v42 }
  0x4e   :  { %913 = vmatpush1.bf16.msra.mxu1 %v912_v12  ;;  %v81_v48 = vld [vmem:[#allocation3 + $0x38] sm:$0xff]  ;;  %v175_v49 = vld [vmem:[#allocation3 + $0x328] sm:$0xff]  ;;  %v243_v51 = vsel %vm240_vm0, %v1262_v38, %v242_v39  ;;  %v988_v53 = vpack.c.bf16 %v172_v46, %v170_v44  ;;  %v78_v55 = vld [vmem:[#allocation3 + $0x20] sm:$0xff] }
  0x4f   :  { %977 = vmatpush1.bf16.msra.mxu0 %v976_v13  ;;  %915 = vmatprep.subr.bf16.mxu1 %v914_v14  ;;  %v177_v50 = vld [vmem:[#allocation3 + $0x338] sm:$0xff]  ;;  %v926_v54 = vpack.c.bf16 %v81_v48, %v79_v47  ;;  %v80_v56 = vld [vmem:[#allocation3 + $0x30] sm:$0xff]  ;;  %v174_v57 = vld [vmem:[#allocation3 + $0x320] sm:$0xff] }
  0x50   :  { %979 = vmatprep.subr.bf16.mxu0 %v978_v18  ;;  %v990_v58 = vpack.c.bf16 %v177_v50, %v175_v49  ;;  %v176_v59 = vld [vmem:[#allocation3 + $0x330] sm:$0xff]  ;;  %v83_v60 = vld [vmem:[#allocation3 + $0x48] sm:$0xff]  ;;  %v85_v61 = vld [vmem:[#allocation3 + $0x58] sm:$0xff]  ;;  %v928_v2 = vpack.c.bf16 %v80_v56, %v78_v55 }
  0x51   :  { %v179_v62 = vld [vmem:[#allocation3 + $0x348] sm:$0xff]  ;;  %v181_v63 = vld [vmem:[#allocation3 + $0x358] sm:$0xff]  ;;  %v82_v3 = vld [vmem:[#allocation3 + $0x40] sm:$0xff]  ;;  %v992_v5 = vpack.c.bf16 %v176_v59, %v174_v57  ;;  %v930_v6 = vpack.c.bf16 %v85_v61, %v83_v60 }
  0x52   :  { %917 = vmatpush1.bf16.msra.mxu1 %v916_v24  ;;  %v1270_v1 = vld [vmem:[%s1411_s0 + $0x8] sm:$0xff]  ;;  %v84_v7 = vld [vmem:[#allocation3 + $0x50] sm:$0xff]  ;;  %v178_v8 = vld [vmem:[#allocation3 + $0x340] sm:$0xff]  ;;  %v994_v10 = vpack.c.bf16 %v181_v63, %v179_v62 }
  0x53   :  { %981 = vmatpush1.bf16.msra.mxu0 %v980_v26  ;;  %919 = vmatprep.subr.bf16.mxu1 %v918_v27  ;;  %v244_v4 = vrot.slane %v1270_v1, 4  ;;  %v180_v9 = vld [vmem:[#allocation3 + $0x350] sm:$0xff]  ;;  %v87_v11 = vld [vmem:[#allocation3 + $0x68] sm:$0xff]  ;;  %v89_v12 = vld [vmem:[#allocation3 + $0x78] sm:$0xff]  ;;  %v932_v18 = vpack.c.bf16 %v84_v7, %v82_v3 }
  0x54   :  { %983 = vmatprep.subr.bf16.mxu0 %v982_v31  ;;  %v1283_v14 = vld [vmem:[%s1411_s0 + $0x10] sm:$0xff]  ;;  %v183_v15 = vld [vmem:[#allocation3 + $0x368] sm:$0xff]  ;;  %v185_v16 = vld [vmem:[#allocation3 + $0x378] sm:$0xff]  ;;  %v996_v20 = vpack.c.bf16 %v180_v9, %v178_v8  ;;  %v934_v21 = vpack.c.bf16 %v89_v12, %v87_v11 }
  0x55   :  { %v1278_v13 = vsel %vm240_vm0, %v242_v39, %v244_v4  ;;  %v247_v17 = vrot.slane %v1283_v14, 4  ;;  %v86_v19 = vld [vmem:[#allocation3 + $0x60] sm:$0xff]  ;;  %v88_v22 = vld [vmem:[#allocation3 + $0x70] sm:$0xff]  ;;  %v1294_v25 = vld [vmem:[%s1411_s0 + $0x18] sm:$0xff]  ;;  %v998_v26 = vpack.c.bf16 %v185_v16, %v183_v15 }
  0x56   :  { %921 = vmatpush1.bf16.msra.mxu1 %v920_v37  ;;  %v182_v23 = vld [vmem:[#allocation3 + $0x360] sm:$0xff]  ;;  %v184_v27 = vld [vmem:[#allocation3 + $0x370] sm:$0xff]  ;;  %v91_v28 = vld [vmem:[#allocation3 + $0x88] sm:$0xff]  ;;  %v249_v31 = vrot.slane %v1294_v25, 4  ;;  %v936_v34 = vpack.c.bf16 %v88_v22, %v86_v19 }
  0x57   :  { %985 = vmatpush1.bf16.msra.mxu0 %v984_v40  ;;  %923 = vmatprep.subr.bf16.mxu1 %v922_v41  ;;  %v248_v24 = vsel %vm240_vm0, %v1262_v38, %v247_v17  ;;  %v93_v29 = vld [vmem:[#allocation3 + $0x98] sm:$0xff]  ;;  %v187_v32 = vld [vmem:[#allocation3 + $0x388] sm:$0xff]  ;;  %v1000_v36 = vpack.c.bf16 %v184_v27, %v182_v23  ;;  %v90_v39 = vld [vmem:[#allocation3 + $0x80] sm:$0xff] }
  0x58   :  { %987 = vmatprep.subr.bf16.mxu0 %v986_v45  ;;  %v189_v33 = vld [vmem:[#allocation3 + $0x398] sm:$0xff]  ;;  %v1303_v35 = vsel %vm240_vm0, %v247_v17, %v249_v31  ;;  %v938_v37 = vpack.c.bf16 %v93_v29, %v91_v28  ;;  %v92_v40 = vld [vmem:[#allocation3 + $0x90] sm:$0xff]  ;;  %v186_v41 = vld [vmem:[#allocation3 + $0x380] sm:$0xff] }
  0x59   :  { %320 = vmatmul.mubr.f32.vlgmr.msra.gmra.mrb[0].mxu1 %v243_v51  ;;  %v1002_v42 = vpack.c.bf16 %v189_v33, %v187_v32  ;;  %v188_v43 = vld [vmem:[#allocation3 + $0x390] sm:$0xff]  ;;  %v95_v44 = vld [vmem:[#allocation3 + $0xa8] sm:$0xff]  ;;  %v97_v45 = vld [vmem:[#allocation3 + $0xb8] sm:$0xff]  ;;  %v940_v48 = vpack.c.bf16 %v92_v40, %v90_v39 }
  0x5a   :  { %925 = vmatpush1.bf16.msra.mxu1 %v924_v52  ;;  %498 = vmatmul.mubr.f32.vlgmr.msra.gmra.mrb[0].mxu0 %v1259_v30  ;;  %v191_v46 = vld [vmem:[#allocation3 + $0x3a8] sm:$0xff]  ;;  %v193_v47 = vld [vmem:[#allocation3 + $0x3b8] sm:$0xff]  ;;  %v1004_v49 = vpack.c.bf16 %v188_v43, %v186_v41  ;;  %v942_v50 = vpack.c.bf16 %v97_v45, %v95_v44  ;;  %v94_v51 = vld [vmem:[#allocation3 + $0xa0] sm:$0xff] }
  0x5b   :  { %989 = vmatpush1.bf16.msra.mxu0 %v988_v53  ;;  %927 = vmatprep.subr.bf16.mxu1 %v926_v54  ;;  %v96_v52 = vld [vmem:[#allocation3 + $0xb0] sm:$0xff]  ;;  %v190_v53 = vld [vmem:[#allocation3 + $0x3a0] sm:$0xff]  ;;  %v1006_v54 = vpack.c.bf16 %v193_v47, %v191_v46  ;;  %v99_v56 = vld [vmem:[#allocation3 + $0xc8] sm:$0xff] }
  0x5c   :  { %991 = vmatprep.subr.bf16.mxu0 %v990_v58  ;;  %325 = vmatprep.mubr.f32.mxu1 %v1184_v0  ;;  %v192_v55 = vld [vmem:[#allocation3 + $0x3b0] sm:$0xff]  ;;  %v101_v57 = vld [vmem:[#allocation3 + $0xd8] sm:$0xff]  ;;  %v195_v58 = vld [vmem:[#allocation3 + $0x3c8] sm:$0xff]  ;;  %v944_v60 = vpack.c.bf16 %v96_v52, %v94_v51  ;;  %v535_v52 = vsel %vm240_vm0, %v249_v31, %v1262_v38 }
  0x5d   :  { %503 = vmatprep.mubr.f32.mxu0 %v1184_v0  ;;  %326 = vmatmul.mubr.f32.gmra.mrb[2].mxu1 %v1278_v13  ;;  %v197_v59 = vld [vmem:[#allocation3 + $0x3d8] sm:$0xff]  ;;  %v1008_v61 = vpack.c.bf16 %v192_v55, %v190_v53  ;;  %v946_v62 = vpack.c.bf16 %v101_v57, %v99_v56  ;;  %v98_v63 = vld [vmem:[#allocation3 + $0xc0] sm:$0xff]  ;;  %v103_v7 = vld [vmem:[#allocation3 + $0xe8] sm:$0xff] }
  0x5e   :  { %929 = vmatpush1.bf16.msra.mxu1 %v928_v2  ;;  %504 = vmatmul.mubr.f32.gmra.mrb[2].mxu0 %v1270_v1  ;;  %v100_v2 = vld [vmem:[#allocation3 + $0xd0] sm:$0xff]  ;;  %v194_v3 = vld [vmem:[#allocation3 + $0x3c0] sm:$0xff]  ;;  %v105_v8 = vld [vmem:[#allocation3 + $0xf8] sm:$0xff] }
  0x5f   :  { %993 = vmatpush1.bf16.msra.mxu0 %v992_v5  ;;  %931 = vmatprep.subr.bf16.mxu1 %v930_v6  ;;  %v1010_v5 = vpack.c.bf16 %v197_v59, %v195_v58  ;;  %v196_v6 = vld [vmem:[#allocation3 + $0x3d0] sm:$0xff]  ;;  %v199_v9 = vld [vmem:[#allocation3 + $0x3e8] sm:$0xff]  ;;  %v948_v11 = vpack.c.bf16 %v100_v2, %v98_v63  ;;  %v950_v15 = vpack.c.bf16 %v105_v8, %v103_v7  ;;  %v102_v16 = vld [vmem:[#allocation3 + $0xe0] sm:$0xff] }
  0x60   :  { %995 = vmatprep.subr.bf16.mxu0 %v994_v10  ;;  %331 = vmatprep.mubr.f32.mxu1 %v1184_v0  ;;  %v201_v10 = vld [vmem:[#allocation3 + $0x3f8] sm:$0xff]  ;;  %v1012_v12 = vpack.c.bf16 %v196_v6, %v194_v3  ;;  %v104_v17 = vld [vmem:[#allocation3 + $0xf0] sm:$0xff]  ;;  %v202_v27 = vld [vmem:[#allocation3 + $0x400] sm:$0xff] }
  0x61   :  { %509 = vmatprep.mubr.f32.mxu0 %v1184_v0  ;;  %332 = vmatmul.mubr.f32.gmra.mrb[4].mxu1 %v248_v24  ;;  %v1014_v19 = vpack.c.bf16 %v201_v10, %v199_v9  ;;  %v205_v22 = vld [vmem:[#allocation3 + $0x418] sm:$0xff]  ;;  %v952_v23 = vpack.c.bf16 %v104_v17, %v102_v16  ;;  %v204_v28 = vld [vmem:[#allocation3 + $0x410] sm:$0xff]  ;;  %v207_v29 = vld [vmem:[#allocation3 + $0x428] sm:$0xff] }
  0x62   :  { %933 = vmatpush1.bf16.msra.mxu1 %v932_v18  ;;  %510 = vmatmul.mubr.f32.gmra.mrb[4].mxu0 %v1283_v14  ;;  %v198_v18 = vld [vmem:[#allocation3 + $0x3e0] sm:$0xff]  ;;  %v209_v32 = vld [vmem:[#allocation3 + $0x438] sm:$0xff]  ;;  %v1020_v33 = vpack.c.bf16 %v204_v28, %v202_v27  ;;  %v211_v39 = vld [vmem:[#allocation3 + $0x448] sm:$0xff] }
  0x63   :  { %997 = vmatpush1.bf16.msra.mxu0 %v996_v20  ;;  %935 = vmatprep.subr.bf16.mxu1 %v934_v21  ;;  %v200_v20 = vld [vmem:[#allocation3 + $0x3f0] sm:$0xff]  ;;  %v203_v21 = vld [vmem:[#allocation3 + $0x408] sm:$0xff]  ;;  %v213_v40 = vld [vmem:[#allocation3 + $0x458] sm:$0xff] }
  0x64   :  { %999 = vmatprep.subr.bf16.mxu0 %v998_v26  ;;  %337 = vmatprep.mubr.f32.mxu1 %v1184_v0  ;;  %v1016_v24 = vpack.c.bf16 %v200_v20, %v198_v18  ;;  %v1018_v26 = vpack.c.bf16 %v205_v22, %v203_v21  ;;  %v210_v43 = vld [vmem:[#allocation3 + $0x440] sm:$0xff]  ;;  %v212_v44 = vld [vmem:[#allocation3 + $0x450] sm:$0xff]  ;;  %v1026_v45 = vpack.c.bf16 %v213_v40, %v211_v39  ;;  %v217_v46 = vld [vmem:[#allocation3 + $0x478] sm:$0xff] }
  0x65   :  { %515 = vmatprep.mubr.f32.mxu0 %v1184_v0  ;;  %338 = vmatmul.mubr.f32.gmra.mrb[6].mxu1 %v1303_v35  ;;  %v1028_v47 = vpack.c.bf16 %v212_v44, %v210_v43  ;;  %v221_v51 = vld [vmem:[#allocation3 + $0x498] sm:$0xff]  ;;  %v220_v55 = vld [vmem:[#allocation3 + $0x490] sm:$0xff]  ;;  %v223_v56 = vld [vmem:[#allocation3 + $0x4a8] sm:$0xff] }
  0x66   :  { %937 = vmatpush1.bf16.msra.mxu1 %v936_v34  ;;  %516 = vmatmul.mubr.f32.gmra.mrb[6].mxu0 %v1294_v25  ;;  %v206_v34 = vld [vmem:[#allocation3 + $0x420] sm:$0xff]  ;;  %v225_v57 = vld [vmem:[#allocation3 + $0x4b8] sm:$0xff]  ;;  %v228_v63 = vld [vmem:[#allocation3 + $0x4d0] sm:$0xff] }
  0x67   :  { %1001 = vmatpush1.bf16.msra.mxu0 %v1000_v36  ;;  %939 = vmatprep.subr.bf16.mxu1 %v938_v37  ;;  %v208_v36 = vld [vmem:[#allocation3 + $0x430] sm:$0xff]  ;;  %v1022_v37 = vpack.c.bf16 %v209_v32, %v207_v29  ;;  %v1038_v58 = vpack.c.bf16 %v225_v57, %v223_v56  ;;  %v222_v59 = vld [vmem:[#allocation3 + $0x4a0] sm:$0xff]  ;;  %v229_v31 = vld [vmem:[#allocation3 + $0x4d8] sm:$0xff] }
  0x68   :  { %1003 = vmatprep.subr.bf16.mxu0 %v1002_v42  ;;  %408 = vmatprep.mubr.f32.mxu1 %v1184_v0  ;;  %v1024_v41 = vpack.c.bf16 %v208_v36, %v206_v34  ;;  %v533_v42 = vsel %vm240_vm0, %v244_v4, %v1262_v38  ;;  %v227_v38 = vld [vmem:[#allocation3 + $0x4c8] sm:$0xff]  ;;  %v233_v3 = vld [vmem:[#allocation3 + $0x4f8] sm:$0xff]  ;;  %v230_v7 = vld [vmem:[#allocation3 + $0x4e0] sm:$0xff] }
  0x69   :  { %602 = vmatprep.mubr.f32.mxu0 %v1184_v0  ;;  %v231_v2 = vld [vmem:[#allocation3 + $0x4e8] sm:$0xff]  ;;  %v232_v8 = vld [vmem:[#allocation3 + $0x4f0] sm:$0xff] }
  0x6a   :  { %941 = vmatpush1.bf16.msra.mxu1 %v940_v48  ;;  %v214_v48 = vld [vmem:[#allocation3 + $0x460] sm:$0xff]  ;;  %v1046_v6 = vpack.c.bf16 %v233_v3, %v231_v2  ;;  %v1048_v9 = vpack.c.bf16 %v232_v8, %v230_v7 }
  0x6b   :  { %1005 = vmatpush1.bf16.msra.mxu0 %v1004_v49  ;;  %943 = vmatprep.subr.bf16.mxu1 %v942_v50  ;;  %v216_v49 = vld [vmem:[#allocation3 + $0x470] sm:$0xff]  ;;  %v219_v50 = vld [vmem:[#allocation3 + $0x488] sm:$0xff] }
  0x6c   :  { %1007 = vmatprep.subr.bf16.mxu0 %v1006_v54  ;;  %v1034_v53 = vpack.c.bf16 %v221_v51, %v219_v50  ;;  %v218_v54 = vld [vmem:[#allocation3 + $0x480] sm:$0xff] }
  0x6e   :  { %945 = vmatpush1.bf16.msra.mxu1 %v944_v60  ;;  %v224_v60 = vld [vmem:[#allocation3 + $0x4b0] sm:$0xff] }
  0x6f   :  { %1009 = vmatpush1.bf16.msra.mxu0 %v1008_v61  ;;  %947 = vmatprep.subr.bf16.mxu1 %v946_v62  ;;  %v1040_v61 = vpack.c.bf16 %v224_v60, %v222_v59  ;;  %v226_v62 = vld [vmem:[#allocation3 + $0x4c0] sm:$0xff] }
  0x70   :  { %1011 = vmatprep.subr.bf16.mxu0 %v1010_v5  ;;  %v1044_v5 = vpack.c.bf16 %v228_v63, %v226_v62 }
  0x72   :  { %949 = vmatpush1.bf16.msra.mxu1 %v948_v11 }
  0x73   :  { %1013 = vmatpush1.bf16.msra.mxu0 %v1012_v12  ;;  %951 = vmatprep.subr.bf16.mxu1 %v950_v15 }
  0x74   :  { %1015 = vmatprep.subr.bf16.mxu0 %v1014_v19 }
  0x76   :  { %953 = vmatpush1.bf16.msra.mxu1 %v952_v23 }
  0x77   :  { %1017 = vmatpush1.bf16.msra.mxu0 %v1016_v24  ;;  %1050 = vmatprep.subr.bf16.mxu1 %v1018_v26 }
  0x78   :  { %1019 = vmatprep.subr.bf16.mxu0 %v1018_v26 }
  0x79   :  { %409 = vmatmul.mubr.f32.vlgmr.msra.gmra.mrb[0].mxu1 %v1184_v0 }
  0x7a   :  { %603 = vmatmul.mubr.f32.vlgmr.msra.gmra.mrb[0].mxu0 %v1278_v13  ;;  %1058 = vmatpush1.bf16.msra.mxu1 %v1020_v33  ;;  %v215_v13 = vld [vmem:[#allocation3 + $0x468] sm:$0xff] }
  0x7b   :  { %1021 = vmatpush1.bf16.msra.mxu0 %v1020_v33  ;;  %414 = vmatprep.mubr.f32.mxu1 %v1184_v0  ;;  %v1030_v4 = vpack.c.bf16 %v217_v46, %v215_v13 }
  0x7c   :  { %608 = vmatprep.mubr.f32.mxu0 %v1184_v0  ;;  %1023 = vmatprep.subr.bf16.mxu0 %v1022_v37 }
  0x7d   :  { %415 = vmatmul.mubr.f32.gmra.mrb[2].mxu1 %v1259_v30  ;;  %1051 = vmatprep.subr.bf16.mxu1 %v1022_v37  ;;  %v1032_v30 = vpack.c.bf16 %v216_v49, %v214_v48 }
  0x7e   :  { %609 = vmatmul.mubr.f32.gmra.mrb[2].mxu0 %v533_v42  ;;  %1059 = vmatpush1.bf16.msra.mxu1 %v1024_v41 }
  0x7f   :  { %1025 = vmatpush1.bf16.msra.mxu0 %v1024_v41  ;;  %420 = vmatprep.mubr.f32.mxu1 %v1184_v0 }
  0x80   :  { %614 = vmatprep.mubr.f32.mxu0 %v1184_v0  ;;  %1027 = vmatprep.subr.bf16.mxu0 %v1026_v45 }
  0x81   :  { %421 = vmatmul.mubr.f32.gmra.mrb[4].mxu1 %v1184_v0  ;;  %1052 = vmatprep.subr.bf16.mxu1 %v1026_v45 }
  0x82   :  { %615 = vmatmul.mubr.f32.gmra.mrb[4].mxu0 %v1303_v35  ;;  %1060 = vmatpush1.bf16.msra.mxu1 %v1028_v47  ;;  %v1036_v35 = vpack.c.bf16 %v220_v55, %v218_v54 }
  0x83   :  { %1029 = vmatpush1.bf16.msra.mxu0 %v1028_v47  ;;  %426 = vmatprep.mubr.f32.mxu1 %v1184_v0 }
  0x84   :  { %620 = vmatprep.mubr.f32.mxu0 %v1184_v0  ;;  %1031 = vmatprep.subr.bf16.mxu0 %v1030_v4 }
  0x85   :  { %427 = vmatmul.mubr.f32.gmra.mrb[6].mxu1 %v1283_v14  ;;  %1053 = vmatprep.subr.bf16.mxu1 %v1030_v4  ;;  %v1042_v14 = vpack.c.bf16 %v229_v31, %v227_v38 }
  0x86   :  { %621 = vmatmul.mubr.f32.gmra.mrb[6].mxu0 %v535_v52  ;;  %1061 = vmatpush1.bf16.msra.mxu1 %v1032_v30 }
  0x87   :  { %1033 = vmatpush1.bf16.msra.mxu0 %v1032_v30  ;;  %1054 = vmatprep.subr.bf16.mxu1 %v1034_v53 }
  0x88   :  { %1035 = vmatprep.subr.bf16.mxu0 %v1034_v53  ;;  %699 = vmatprep.mubr.f32.mxu0 %v1184_v0 }
  0x89   :  { %711 = vmatprep.mubr.f32.mxu1 %v1184_v0 }
  0x8a   :  { %1062 = vmatpush1.bf16.msra.mxu1 %v1036_v35 }
  0x8b   :  { %1037 = vmatpush1.bf16.msra.mxu0 %v1036_v35  ;;  %1055 = vmatprep.subr.bf16.mxu1 %v1038_v58 }
  0x8c   :  { %1039 = vmatprep.subr.bf16.mxu0 %v1038_v58 }
  0x8e   :  { %1063 = vmatpush1.bf16.msra.mxu1 %v1040_v61 }
  0x8f   :  { %1041 = vmatpush1.bf16.msra.mxu0 %v1040_v61  ;;  %1056 = vmatprep.subr.bf16.mxu1 %v1042_v14 }
  0x90   :  { %1043 = vmatprep.subr.bf16.mxu0 %v1042_v14 }
  0x92   :  { %1064 = vmatpush1.bf16.msra.mxu1 %v1044_v5 }
  0x93   :  { %1045 = vmatpush1.bf16.msra.mxu0 %v1044_v5  ;;  %1057 = vmatprep.subr.bf16.mxu1 %v1046_v6 }
  0x94   :  { %1047 = vmatprep.subr.bf16.mxu0 %v1046_v6 }
  0x96   :  { %1065 = vmatpush1.bf16.msra.mxu1 %v1048_v9 }
  0x97   :  { %1049 = vmatpush1.bf16.msra.mxu0 %v1048_v9 }
  0x99   :  { %712 = vmatmul.mubr.f32.vlgmr.msra.gmra.mrb[8].mxu1 %v1294_v25 }
  0x9a   :  { %700 = vmatmul.mubr.f32.vlgmr.msra.gmra.mrb[0].mxu0 %v1270_v1  ;;  %717 = vmatprep.mubr.f32.mxu1 %v1184_v0 }
  0x9b   :  { %705 = vmatprep.mubr.f32.mxu0 %v1184_v0 }
  0x9d   :  { %718 = vmatmul.mubr.f32.gmra.mrb[10].mxu1 %v1184_v0 }
  0x9e   :  { %706 = vmatmul.mubr.f32.gmra.mrb[2].mxu0 %v1184_v0 }
 0x14c   :  { %v410_v10 = vpop.f32.mrb[0].mxu1 }
 0x14d   :  { %v412_v11 = vpop.f32.mrb[1].mxu1 }
 0x150   :  { %v416_v12 = vpop.f32.mrb[2].mxu1 }
 0x151   :  { %v418_v15 = vpop.f32.mrb[3].mxu1 }
 0x154   :  { %v422_v16 = vpop.f32.mrb[4].mxu1 }
 0x155   :  { %v616_v17 = vpop.f32.mrb[4].mxu0  ;;  %v424_v18 = vpop.f32.mrb[5].mxu1 }
 0x156   :  { %v1070_v19 = vadd.f32 %v616_v17, %v422_v16  ;;  %v618_v20 = vpop.f32.mrb[5].mxu0 }
 0x157   :  { %v1072_v25 = vadd.f32 %v618_v20, %v424_v18 }
 0x158   :  { %v428_v21 = vpop.f32.mrb[6].mxu1 }
 0x159   :  { %v622_v1 = vpop.f32.mrb[6].mxu0  ;;  %v430_v22 = vpop.f32.mrb[7].mxu1 }
 0x15a   :  { %v1074_v23 = vadd.f32 %v622_v1, %v428_v21  ;;  %v624_v24 = vpop.f32.mrb[7].mxu0 }
 0x15b   :  { %v1076_v26 = vadd.f32 %v624_v24, %v430_v22 }
 0x16c   :  { %v713_v27 = vpop.f32.mrb[8].mxu1 }
 0x16d   :  { %v701_v28 = vpop.f32.mrb[0].mxu0  ;;  %v1339_v29 = vadd.f32 %v1070_v19, %v713_v27  ;;  %v715_v0 = vpop.f32.mrb[9].mxu1 }
 0x16e   :  { %v1341_v32 = vadd.f32 %v701_v28, %v410_v10  ;;  %v703_v33 = vpop.f32.mrb[1].mxu0  ;;  %v1343_v34 = vadd.f32 %v1072_v25, %v715_v0 }
 0x16f   :  { %v1345_v36 = vadd.f32 %v703_v33, %v412_v11  ;;  %v756_v50 = vmul.f32 %v1339_v29, %v1339_v29 }
 0x170   :  { %v719_v37 = vpop.f32.mrb[10].mxu1  ;;  %v752_v13 = vmul.f32 %v1341_v32, %v1341_v32  ;;  %v757_v52 = vmul.f32 %v1343_v34, %v1343_v34 }
 0x171   :  { %v707_v39 = vpop.f32.mrb[2].mxu0  ;;  %v1347_v40 = vadd.f32 %v1074_v23, %v719_v37  ;;  %v721_v41 = vpop.f32.mrb[11].mxu1  ;;  %v753_v48 = vmul.f32 %v1345_v36, %v1345_v36 }
 0x172   :  { %v1349_v42 = vadd.f32 %v707_v39, %v416_v12  ;;  %v709_v43 = vpop.f32.mrb[3].mxu0  ;;  %v1351_v44 = vadd.f32 %v1076_v26, %v721_v41  ;;  %v1185_v41 = vmov 1966171168  }
 0x173   :  { %v1353_v45 = vadd.f32 %v709_v43, %v418_v15  ;;  %v758_v56 = vmul.f32 %v1347_v40, %v1347_v40  ;;  %v794_v43 = vunpack.c.l.s4 %v1185_v41 }
 0x174   :  { %v734_v46 = vadd.f32 %v1349_v42, %v1341_v32  ;;  %v754_v47 = vmul.f32 %v1349_v42, %v1349_v42  ;;  %v759_v58 = vmul.f32 %v1351_v44, %v1351_v44 }
 0x175   :  { %v743_v49 = vadd.f32 %v1353_v45, %v1345_v36  ;;  %v755_v4 = vmul.f32 %v1353_v45, %v1353_v45 }
 0x176   :  { %v760_v51 = vadd.f32 %v754_v47, %v752_v13  ;;  %v735_v30 = vadd.f32 %v1339_v29, %v734_v46  ;;  %v796_v13 = vlaneseq  ;;  %v795_v46 = vunpack.c.0.s8 %v794_v43 }
 0x177   :  { %v769_v53 = vadd.f32 %v755_v4, %v753_v48  ;;  %v744_v54 = vadd.f32 %v1343_v34, %v743_v49 }
 0x178   :  { %v736_v55 = vadd.f32 %v1347_v40, %v735_v30  ;;  %v761_v57 = vadd.f32 %v760_v51, %v756_v50  ;;  %v797_v47 = vshrl.u32 %v796_v13, 7  ;;  %v732_v30 = vld [vmem:[#allocation5] sm:$0x3] }
 0x179   :  { %v745_v35 = vadd.f32 %v1351_v44, %v744_v54  ;;  %v770_v59 = vadd.f32 %v769_v53, %v757_v52 }
 0x17a   :  { %v737_v60 = vrot.slane %v736_v55, 4  ;;  %v762_v38 = vadd.f32 %v761_v57, %v758_v56  ;;  %v798_v49 = vsub.s32 %v795_v46, %v797_v47  ;;  %v812_v53 = vsub.s32 0, %v797_v47 }
 0x17b   :  { %v746_v31 = vrot.slane %v745_v35, 4  ;;  %v771_v61 = vadd.f32 %v770_v59, %v759_v58  ;;  %v816_v54 = vsub.s32 1, %v797_v47 }
 0x17c   :  { %v738_v14 = vadd.f32 %v737_v60, %v736_v55  ;;  %v763_v62 = vrot.slane %v762_v38, 4 }
 0x17d   :  { %v747_v63 = vadd.f32 %v746_v31, %v745_v35  ;;  %v772_v2 = vrot.slane %v771_v61, 4 }
 0x17e   :  { %v739_v3 = vrot.slane %v738_v14, 2  ;;  %v764_v5 = vadd.f32 %v763_v62, %v762_v38 }
 0x17f   :  { %v748_v6 = vrot.slane %v747_v63, 2  ;;  %v773_v7 = vadd.f32 %v772_v2, %v771_v61 }
 0x180   :  { %v740_v8 = vadd.f32 %v739_v3, %v738_v14  ;;  %v765_v9 = vrot.slane %v764_v5, 2 }
 0x181   :  { %v749_v10 = vadd.f32 %v748_v6, %v747_v63  ;;  %v774_v11 = vrot.slane %v773_v7, 2 }
 0x182   :  { %v741_v12 = vrot.slane %v740_v8, 1  ;;  %v766_v15 = vadd.f32 %v765_v9, %v764_v5  ;;  %v733_v5 = vld [vmem:[#allocation7] sm:$0x3] }
 0x183   :  { %v750_v16 = vrot.slane %v749_v10, 1  ;;  %v775_v17 = vadd.f32 %v774_v11, %v773_v7 }
 0x184   :  { %v742_v18 = vadd.f32 %v741_v12, %v740_v8  ;;  %v767_v19 = vrot.slane %v766_v15, 1 }
 0x185   :  { %v751_v20 = vadd.f32 %v750_v16, %v749_v10  ;;  %v776_v25 = vrot.slane %v775_v17, 1 }
 0x186   :  { %v768_v21 = vadd.f32 %v767_v19, %v766_v15  ;;  %v778_v1 = vmul.f32 0.03125, %v742_v18 }
 0x187   :  { %v777_v22 = vadd.f32 %v776_v25, %v775_v17  ;;  %v779_v23 = vmul.f32 0.03125, %v751_v20 }
 0x188   :  { %v780_v24 = vmul.f32 0.03125, %v768_v21  ;;  %v782_v26 = vmul.f32 %v778_v1, %v778_v1 }
 0x189   :  { %v781_v27 = vmul.f32 0.03125, %v777_v22  ;;  %v783_v28 = vmul.f32 %v779_v23, %v779_v23 }
 0x18a   :  { %v784_v0 = vsub.f32 %v780_v24, %v782_v26 }
 0x18b   :  { %v785_v33 = vsub.f32 %v781_v27, %v783_v28 }
 0x18c   :  { %v786_v37 = vadd.f32 1e-05, %v784_v0 }
 0x18d   :  { %v787_v39 = vadd.f32 1e-05, %v785_v33 }
 0x18e   :  { %1105 = vrsqrt.f32 %v786_v37 }
 0x18f   :  { %1107 = vrsqrt.f32 %v787_v39 }
 0x198   :  { %v1106_v48 = vpop.eup %1105 }
 0x199   :  { %v1108_v4 = vpop.eup %1107 }
 0x19a   :  { %v792_v50 = vcombine.low %v1106_v48, %v1108_v4 }
 0x19c   :  { %v799_v51 = vrot.slane %v792_v50, %v798_v49 }
 0x19e   :  { %v806_v52 = vrot.slane %v799_v51, %v798_v49 }
 0x1a0   :  { %v808_v55 = vmul.f32 %v806_v52, %v732_v30 }
 0x1a2   :  { %v813_v56 = vrot.slane %v808_v55, %v812_v53  ;;  %v817_v57 = vrot.slane %v808_v55, %v816_v54 }
 0x1a4   :  { %v820_v35 = vmul.f32 %v813_v56, %v778_v1  ;;  %v821_v58 = vmul.f32 %v817_v57, %v779_v23  ;;  %v841_v59 = vmul.f32 %v1341_v32, %v813_v56  ;;  %v842_v60 = vmul.f32 %v1345_v36, %v817_v57 }
 0x1a5   :  { %v843_v38 = vmul.f32 %v1349_v42, %v813_v56  ;;  %v844_v31 = vmul.f32 %v1353_v45, %v817_v57  ;;  %v845_v61 = vmul.f32 %v1339_v29, %v813_v56  ;;  %v846_v14 = vmul.f32 %v1343_v34, %v817_v57 }
 0x1a6   :  { %v824_v62 = vcombine.low %v820_v35, %v821_v58  ;;  %v847_v63 = vmul.f32 %v1347_v40, %v813_v56  ;;  %v848_v2 = vmul.f32 %v1351_v44, %v817_v57 }
 0x1a8   :  { %v831_v3 = vrot.slane %v824_v62, %v798_v49 }
 0x1aa   :  { %v838_v6 = vrot.slane %v831_v3, %v798_v49 }
 0x1ac   :  { %v840_v7 = vsub.f32 %v733_v5, %v838_v6 }
 0x1ae   :  { %v853_v32 = vrot.slane %v840_v7, %v812_v53  ;;  %v857_v8 = vrot.slane %v840_v7, %v816_v54 }
 0x1b0   :  { %v860_v36 = vadd.f32 %v853_v32, %v841_v59  ;;  %v861_v9 = vadd.f32 %v857_v8, %v842_v60  ;;  %v862_v42 = vadd.f32 %v853_v32, %v843_v38  ;;  %v863_v10 = vadd.f32 %v857_v8, %v844_v31 }
 0x1b1   :  { %v864_v45 = vadd.f32 %v853_v32, %v845_v61  ;;  %v865_v11 = vadd.f32 %v857_v8, %v846_v14  ;;  %v866_v29 = vadd.f32 %v853_v32, %v847_v63  ;;  %v867_v12 = vadd.f32 %v857_v8, %v848_v2 }
 0x1b2   :  { %v868_v34 = vmax.f32 %v860_v36, 0.0  ;;  %v869_v15 = vmax.f32 %v861_v9, 0.0  ;;  %v870_v16 = vmax.f32 %v862_v42, 0.0  ;;  %v871_v40 = vmax.f32 %v863_v10, 0.0 }
 0x1b3   :  { %v872_v17 = vmax.f32 %v864_v45, 0.0  ;;  %v873_v44 = vmax.f32 %v865_v11, 0.0  ;;  %v874_v18 = vmax.f32 %v866_v29, 0.0  ;;  %v875_v19 = vmax.f32 %v867_v12, 0.0 }
 0x1b4   :  { %876 = vst [vmem:[%s1415_s4] sm:$0xff] %v868_v34  ;;  %877 = vst [vmem:[%s1415_s4 + $0x8] sm:$0xff] %v869_v15 }
 0x1b5   :  { %878 = vst [vmem:[%s1415_s4 + $0x10] sm:$0xff] %v870_v16  ;;  %879 = vst [vmem:[%s1415_s4 + $0x18] sm:$0xff] %v871_v40 }
 0x1b6   :  { %880 = vst [vmem:[%s1415_s4 + $0x20] sm:$0xff] %v872_v17  ;;  %881 = vst [vmem:[%s1415_s4 + $0x28] sm:$0xff] %v873_v44 }
 0x1b7   :  { %882 = vst [vmem:[%s1415_s4 + $0x30] sm:$0xff] %v874_v18  ;;  %883 = vst [vmem:[%s1415_s4 + $0x38] sm:$0xff] %v875_v19 }
 0x1b8   :  { %888 = vsyncpa [#allocation4], 1 }
 0x1b9   :  { %889 = vsyncpa [#allocation6], 1 }

// kernel: fcn_forward.5
= control target key start
LH: loop header
LB: loop body
LE: loop exit
PB: predicated region body
PF: predicated region fallthrough
CT: control target
= control target key end

     0   :  { %16 = vsyncpa [#allocation4], 0  ;;  %s5299_s0 = inlined_call_operand.vmem [shape: f32[2,16,256], index: 0, kind: input, shape index: {}]   ;;  %s5300_s1 = inlined_call_operand.hbm [shape: f32[3,256,512], index: 1, kind: input, shape index: {}]   ;;  %s5301_s2 = inlined_call_operand.hbm [shape: f32[1,512], index: 2, kind: input, shape index: {}]   ;;  %s5302_s3 = inlined_call_operand.hbm [shape: f32[1,512], index: 3, kind: input, shape index: {}]   ;;  %s5303_s4 = inlined_call_operand.vmem [shape: f32[512,512], index: 4, kind: input, shape index: {}]   ;;  %s5304_s5 = inlined_call_operand.hbm [shape: f32[1,512], index: 5, kind: input, shape index: {}]   ;;  %s5305_s6 = inlined_call_operand.hbm [shape: f32[1,512], index: 6, kind: input, shape index: {}]   ;;  %s5306_s7 = inlined_call_operand.hbm [shape: f32[512,512], index: 7, kind: input, shape index: {}]   ;;  %s5307_s8 = inlined_call_operand.hbm [shape: f32[1,512], index: 8, kind: input, shape index: {}]   ;;  %s5308_s9 = inlined_call_operand.hbm [shape: f32[2,512], index: 9, kind: output, shape index: {0}]   ;;  %s5309_s10 = inlined_call_operand.hbm [shape: f32[2,512], index: 10, kind: output, shape index: {1}]  }
   0x1   :  { %17 = vsyncpa [#allocation7], 0 }
   0x2   :  { %18 = vsyncpa [#allocation10], 0 }
   0x3   :  { %19 = vsyncpa [#allocation13], 0 }
   0x4   :  { %20 = vsyncpa [#allocation5], 0 }
   0x5   :  { %21 = vsyncpa [#allocation17], 0  ;;  %s4035_s13 = smov [#allocation6]   ;;  %s4036_s15 = smov [#allocation9]  }
   0x6   :  { %s42_s14 = sshll.u32 %s4035_s13, 4  ;;  %s64_s16 = sshll.u32 %s4036_s15, 4  ;;  %s43_s14 = int_to_ptr.vmem [resolvable:$true] %s42_s14  ;;  %s65_s16 = int_to_ptr.vmem [resolvable:$true] %s64_s16 }
   0x7   :  { %s3825_s19 = scalar_lea.hbm %s5301_s2, 64 }
   0x8   :  { %p3826_p0 = scmp.ne.s32.totalorder %s5301_s2, %s3825_s19  ;;  %p3829_p1 = scmp.lt.u32.totalorder %s3825_s19, %s5301_s2 }
   0xa   :  { %p3831_p2 = pnand %p3829_p1, %p3826_p0 }
   0xc   :  { %3834 = shalt.err (!%p3831_p2)
}
   0xd   :  { %s3835_s24 = scalar_lea.vmem %s43_s14, 64  ;;  %p3840_p4 = scmp.lt.s32.totalorder %s43_s14, %s43_s14 }
   0xe   :  { %p3836_p3 = scmp.ne.s32.totalorder %s43_s14, %s3835_s24  ;;  %p3841_p5 = scmp.lt.s32.totalorder %s3835_s24, %s3835_s24 }
  0x10   :  { %p3842_p6 = por %p3841_p5, %p3840_p4 }
  0x12   :  { %p3843_p7 = pnand %p3842_p6, %p3836_p3 }
  0x14   :  { %3846 = shalt.err (!%p3843_p7)
}
  0x15   :  { %45 = dma.hbm_to_vmem [thread:$0]  %s5301_s2, 64, %s43_s14, [#allocation7]  }
  0x16   :  { %s3847_s29 = scalar_lea.hbm %s5304_s5, 64 }
  0x17   :  { %p3848_p8 = scmp.ne.s32.totalorder %s5304_s5, %s3847_s29  ;;  %p3851_p9 = scmp.lt.u32.totalorder %s3847_s29, %s5304_s5 }
  0x19   :  { %p3853_p10 = pnand %p3851_p9, %p3848_p8 }
  0x1b   :  { %3856 = shalt.err (!%p3853_p10)
}
  0x1c   :  { %s3857_s15 = scalar_lea.vmem %s65_s16, 64  ;;  %p3862_p12 = scmp.lt.s32.totalorder %s65_s16, %s65_s16 }
  0x1d   :  { %p3858_p11 = scmp.ne.s32.totalorder %s65_s16, %s3857_s15  ;;  %p3863_p13 = scmp.lt.s32.totalorder %s3857_s15, %s3857_s15 }
  0x1f   :  { %p3864_p0 = por %p3863_p13, %p3862_p12 }
  0x21   :  { %p3865_p1 = pnand %p3864_p0, %p3858_p11 }
  0x23   :  { %3868 = shalt.err (!%p3865_p1)
}
  0x24   :  { %67 = dma.hbm_to_vmem [thread:$0]  %s5304_s5, 64, %s65_s16, [#allocation10]  }
  0x25   :  { %s4037_s17 = smov [#allocation12]   ;;  %s4038_s19 = smov [#allocation3]  }
  0x26   :  { %s83_s18 = sshll.u32 %s4037_s17, 4  ;;  %s29_s20 = sshll.u32 %s4038_s19, 4  ;;  %s84_s18 = int_to_ptr.vmem [resolvable:$true] %s83_s18  ;;  %s4128_s20 = int_to_ptr.vmem [resolvable:$true] %s29_s20 }
  0x27   :  { %s3869_s23 = scalar_lea.hbm %s5306_s7, 32768 }
  0x28   :  { %p3870_p2 = scmp.ne.s32.totalorder %s5306_s7, %s3869_s23  ;;  %p3873_p3 = scmp.lt.u32.totalorder %s3869_s23, %s5306_s7 }
  0x2a   :  { %p3875_p4 = pnand %p3873_p3, %p3870_p2 }
  0x2c   :  { %3878 = shalt.err (!%p3875_p4)
}
  0x2d   :  { %s3879_s5 = scalar_lea.vmem %s84_s18, 32768  ;;  %p3884_p6 = scmp.lt.s32.totalorder %s84_s18, %s84_s18 }
  0x2e   :  { %p3880_p5 = scmp.ne.s32.totalorder %s84_s18, %s3879_s5  ;;  %p3885_p7 = scmp.lt.s32.totalorder %s3879_s5, %s3879_s5 }
  0x30   :  { %p3886_p8 = por %p3885_p7, %p3884_p6 }
  0x32   :  { %p3887_p9 = pnand %p3886_p8, %p3880_p5 }
  0x34   :  { %3890 = shalt.err (!%p3887_p9)
}
  0x35   :  { %s4039_s16 = smov 512   ;;  %s4040_s28 = smov 32  }
  0x36   :  { %89 = dma.hbm_to_vmem [thread:$0]  %s5306_s7, 32768, %s84_s18, [#allocation13], %s4039_s16, %s4039_s16, %s4040_s28  }
  0x37   :  { %s3891_s13 = scalar_lea.hbm %s5300_s1, 49152 }
  0x38   :  { %p3892_p10 = scmp.ne.s32.totalorder %s5300_s1, %s3891_s13  ;;  %p3895_p11 = scmp.lt.u32.totalorder %s3891_s13, %s5300_s1 }
  0x3a   :  { %p3897_p12 = pnand %p3895_p11, %p3892_p10 }
  0x3c   :  { %3900 = shalt.err (!%p3897_p12)
}
  0x3d   :  { %s3901_s19 = scalar_lea.vmem %s4128_s20, 49152  ;;  %p3906_p0 = scmp.lt.s32.totalorder %s4128_s20, %s4128_s20 }
  0x3e   :  { %p3902_p13 = scmp.ne.s32.totalorder %s4128_s20, %s3901_s19  ;;  %p3907_p1 = scmp.lt.s32.totalorder %s3901_s19, %s3901_s19 }
  0x40   :  { %p3908_p2 = por %p3907_p1, %p3906_p0 }
  0x42   :  { %p3909_p3 = pnand %p3908_p2, %p3902_p13 }
  0x44   :  { %3912 = shalt.err (!%p3909_p3)
}
  0x45   :  { %35 = dma.hbm_to_vmem [thread:$0]  %s5300_s1, 49152, %s4128_s20, [#allocation4], %s4039_s16, %s4039_s16, %s4040_s28  }
  0x46   :  { %s4041_s21 = smov [#allocation8]   ;;  %s4042_s23 = smov [#allocation11]  }
  0x47   :  { %s52_s22 = sshll.u32 %s4041_s21, 4  ;;  %s74_s24 = sshll.u32 %s4042_s23, 4  ;;  %s53_s22 = int_to_ptr.vmem [resolvable:$true] %s52_s22  ;;  %s75_s24 = int_to_ptr.vmem [resolvable:$true] %s74_s24 }
  0x48   :  { %s3913_s27 = scalar_lea.hbm %s5302_s3, 64 }
  0x49   :  { %p3914_p4 = scmp.ne.s32.totalorder %s5302_s3, %s3913_s27  ;;  %p3917_p5 = scmp.lt.u32.totalorder %s3913_s27, %s5302_s3 }
  0x4b   :  { %p3919_p6 = pnand %p3917_p5, %p3914_p4 }
  0x4d   :  { %3922 = shalt.err (!%p3919_p6)
}
  0x4e   :  { %s3923_s1 = scalar_lea.vmem %s53_s22, 64  ;;  %p3928_p8 = scmp.lt.s32.totalorder %s53_s22, %s53_s22 }
  0x4f   :  { %p3924_p7 = scmp.ne.s32.totalorder %s53_s22, %s3923_s1  ;;  %p3929_p9 = scmp.lt.s32.totalorder %s3923_s1, %s3923_s1 }
  0x51   :  { %p3930_p10 = por %p3929_p9, %p3928_p8 }
  0x53   :  { %p3931_p11 = pnand %p3930_p10, %p3924_p7 }
  0x55   :  { %3934 = shalt.err (!%p3931_p11)
}
  0x56   :  { %55 = dma.hbm_to_vmem [thread:$0]  %s5302_s3, 64, %s53_s22, [#allocation7]  }
  0x57   :  { %s3935_s13 = scalar_lea.hbm %s5305_s6, 64 }
  0x58   :  { %p3936_p12 = scmp.ne.s32.totalorder %s5305_s6, %s3935_s13  ;;  %p3939_p13 = scmp.lt.u32.totalorder %s3935_s13, %s5305_s6 }
  0x5a   :  { %p3941_p0 = pnand %p3939_p13, %p3936_p12 }
  0x5c   :  { %3944 = shalt.err (!%p3941_p0)
}
  0x5d   :  { %s3945_s19 = scalar_lea.vmem %s75_s24, 64  ;;  %p3950_p2 = scmp.lt.s32.totalorder %s75_s24, %s75_s24 }
  0x5e   :  { %p3946_p1 = scmp.ne.s32.totalorder %s75_s24, %s3945_s19  ;;  %p3951_p3 = scmp.lt.s32.totalorder %s3945_s19, %s3945_s19 }
  0x60   :  { %p3952_p4 = por %p3951_p3, %p3950_p2 }
  0x62   :  { %p3953_p5 = pnand %p3952_p4, %p3946_p1 }
  0x64   :  { %3956 = shalt.err (!%p3953_p5)
}
  0x65   :  { %77 = dma.hbm_to_vmem [thread:$0]  %s5305_s6, 64, %s75_s24, [#allocation10]  }
  0x66   :  { %s4043_s18 = smov [#allocation14]   ;;  %s3957_s25 = scalar_lea.hbm %s5307_s8, 64 }
  0x67   :  { %s96_s21 = sshll.u32 %s4043_s18, 4  ;;  %p3958_p6 = scmp.ne.s32.totalorder %s5307_s8, %s3957_s25  ;;  %s97_s21 = int_to_ptr.vmem [resolvable:$true] %s96_s21 }
  0x68   :  { %p3961_p7 = scmp.lt.u32.totalorder %s3957_s25, %s5307_s8 }
  0x6a   :  { %p3963_p8 = pnand %p3961_p7, %p3958_p6 }
  0x6c   :  { %3966 = shalt.err (!%p3963_p8)
}
  0x6d   :  { %s3967_s30 = scalar_lea.vmem %s97_s21, 64  ;;  %p3972_p10 = scmp.lt.s32.totalorder %s97_s21, %s97_s21 }
  0x6e   :  { %p3968_p9 = scmp.ne.s32.totalorder %s97_s21, %s3967_s30  ;;  %p3973_p11 = scmp.lt.s32.totalorder %s3967_s30, %s3967_s30 }
  0x70   :  { %p3974_p12 = por %p3973_p11, %p3972_p10 }
  0x72   :  { %p3975_p13 = pnand %p3974_p12, %p3968_p9 }
  0x74   :  { %3978 = shalt.err (!%p3975_p13)
}
  0x75   :  { %99 = dma.hbm_to_vmem [thread:$0]  %s5307_s8, 64, %s97_s21, [#allocation13]  }
  0x76   :  { %4023 = dma.done.wait [#allocation4], 49152  }
  0x77   :  { %4024 = vsyncadd [#allocation4], 4294918144 }
  0x78   :  { %4025 = dma.done.wait [#allocation7], 128  }
  0x79   :  { %4026 = vsyncadd [#allocation7], 4294967168 }
  0x7a   :  { %4027 = dma.done.wait [#allocation10], 128  }
  0x7b   :  { %4028 = vsyncadd [#allocation10], 4294967168 }
  0x7c   :  { %4029 = dma.done.wait [#allocation13], 32832  }
  0x7d   :  { %4030 = vsyncadd [#allocation13], 4294934464  ;;  %v290_v0 = vld [vmem:[#allocation3 + $0x408] sm:$0xff]  ;;  %v292_v2 = vld [vmem:[#allocation3 + $0x418] sm:$0xff]  ;;  %vm1475_vm0 = vcmask 1041409   ;;  %vm1477_vm1 = vcmask 1043459  }
  0x7e   :  { %v294_v1 = vld [vmem:[#allocation3 + $0x428] sm:$0xff]  ;;  %v296_v4 = vld [vmem:[#allocation3 + $0x438] sm:$0xff]  ;;  %v289_v5 = vld [vmem:[#allocation3 + $0x400] sm:$0xff]  ;;  %vm1479_vm2 = vcmask 1045509   ;;  %vm1481_vm3 = vcmask 1047559   ;;  %vm2035_vm4 = vcmask 1041408  }
  0x7f   :  { %v2855_v3 = vpack.c.bf16 %v294_v1, %v290_v0  ;;  %v293_v6 = vld [vmem:[#allocation3 + $0x420] sm:$0xff]  ;;  %v2919_v7 = vpack.c.bf16 %v296_v4, %v292_v2  ;;  %v291_v9 = vld [vmem:[#allocation3 + $0x410] sm:$0xff]  ;;  %v298_v11 = vld [vmem:[#allocation3 + $0x448] sm:$0xff] }
  0x80   :  { %v2857_v8 = vpack.c.bf16 %v293_v6, %v289_v5  ;;  %v295_v10 = vld [vmem:[#allocation3 + $0x430] sm:$0xff]  ;;  %v302_v13 = vld [vmem:[#allocation3 + $0x468] sm:$0xff]  ;;  %v300_v14 = vld [vmem:[#allocation3 + $0x458] sm:$0xff] }
  0x81   :  { %2856 = vmatprep.subr.bf16.mxu0 %v2855_v3  ;;  %v2921_v12 = vpack.c.bf16 %v295_v10, %v291_v9  ;;  %v304_v15 = vld [vmem:[#allocation3 + $0x478] sm:$0xff]  ;;  %2920 = vmatprep.subr.bf16.mxu1 %v2919_v7  ;;  %v2859_v16 = vpack.c.bf16 %v302_v13, %v298_v11  ;;  %v297_v18 = vld [vmem:[#allocation3 + $0x440] sm:$0xff]  ;;  %v299_v20 = vld [vmem:[#allocation3 + $0x450] sm:$0xff] }
  0x82   :  { %2858 = vmatpush1.bf16.msra.mxu0 %v2857_v8  ;;  %v2923_v17 = vpack.c.bf16 %v304_v15, %v300_v14  ;;  %v301_v19 = vld [vmem:[#allocation3 + $0x460] sm:$0xff]  ;;  %v303_v22 = vld [vmem:[#allocation3 + $0x470] sm:$0xff]  ;;  %v306_v23 = vld [vmem:[#allocation3 + $0x488] sm:$0xff] }
  0x83   :  { %2922 = vmatpush1.bf16.msra.mxu1 %v2921_v12  ;;  %v2861_v21 = vpack.c.bf16 %v301_v19, %v297_v18  ;;  %v310_v24 = vld [vmem:[#allocation3 + $0x4a8] sm:$0xff]  ;;  %2860 = vmatprep.subr.bf16.mxu0 %v2859_v16  ;;  %v2925_v25 = vpack.c.bf16 %v303_v22, %v299_v20  ;;  %v308_v27 = vld [vmem:[#allocation3 + $0x498] sm:$0xff]  ;;  %v305_v29 = vld [vmem:[#allocation3 + $0x480] sm:$0xff] }
  0x84   :  { %2924 = vmatprep.subr.bf16.mxu1 %v2923_v17  ;;  %v2863_v26 = vpack.c.bf16 %v310_v24, %v306_v23  ;;  %v312_v28 = vld [vmem:[#allocation3 + $0x4b8] sm:$0xff]  ;;  %v309_v31 = vld [vmem:[#allocation3 + $0x4a0] sm:$0xff]  ;;  %v307_v32 = vld [vmem:[#allocation3 + $0x490] sm:$0xff] }
  0x85   :  { %v2927_v30 = vpack.c.bf16 %v312_v28, %v308_v27  ;;  %v311_v33 = vld [vmem:[#allocation3 + $0x4b0] sm:$0xff]  ;;  %v2865_v34 = vpack.c.bf16 %v309_v31, %v305_v29  ;;  %v314_v35 = vld [vmem:[#allocation3 + $0x4c8] sm:$0xff]  ;;  %v316_v37 = vld [vmem:[#allocation3 + $0x4d8] sm:$0xff] }
  0x86   :  { %2862 = vmatpush1.bf16.msra.mxu0 %v2861_v21  ;;  %v318_v36 = vld [vmem:[#allocation3 + $0x4e8] sm:$0xff]  ;;  %v2929_v38 = vpack.c.bf16 %v311_v33, %v307_v32  ;;  %v320_v40 = vld [vmem:[#allocation3 + $0x4f8] sm:$0xff]  ;;  %v313_v41 = vld [vmem:[#allocation3 + $0x4c0] sm:$0xff] }
  0x87   :  { %2926 = vmatpush1.bf16.msra.mxu1 %v2925_v25  ;;  %2864 = vmatprep.subr.bf16.mxu0 %v2863_v26  ;;  %v2867_v39 = vpack.c.bf16 %v318_v36, %v314_v35  ;;  %v317_v42 = vld [vmem:[#allocation3 + $0x4e0] sm:$0xff]  ;;  %v2931_v43 = vpack.c.bf16 %v320_v40, %v316_v37  ;;  %v315_v44 = vld [vmem:[#allocation3 + $0x4d0] sm:$0xff]  ;;  %v322_v46 = vld [vmem:[#allocation3 + $0x508] sm:$0xff] }
  0x88   :  { %2928 = vmatprep.subr.bf16.mxu1 %v2927_v30  ;;  %v319_v45 = vld [vmem:[#allocation3 + $0x4f0] sm:$0xff]  ;;  %v326_v47 = vld [vmem:[#allocation3 + $0x528] sm:$0xff]  ;;  %v324_v48 = vld [vmem:[#allocation3 + $0x518] sm:$0xff]  ;;  %v2869_v50 = vpack.c.bf16 %v317_v42, %v313_v41 }
  0x89   :  { %v328_v49 = vld [vmem:[#allocation3 + $0x538] sm:$0xff]  ;;  %v2933_v51 = vpack.c.bf16 %v319_v45, %v315_v44  ;;  %v2871_v52 = vpack.c.bf16 %v326_v47, %v322_v46  ;;  %v321_v53 = vld [vmem:[#allocation3 + $0x500] sm:$0xff]  ;;  %v323_v55 = vld [vmem:[#allocation3 + $0x510] sm:$0xff] }
  0x8a   :  { %2866 = vmatpush1.bf16.msra.mxu0 %v2865_v34  ;;  %v325_v54 = vld [vmem:[#allocation3 + $0x520] sm:$0xff]  ;;  %v2935_v56 = vpack.c.bf16 %v328_v49, %v324_v48  ;;  %v327_v57 = vld [vmem:[#allocation3 + $0x530] sm:$0xff]  ;;  %v330_v58 = vld [vmem:[#allocation3 + $0x548] sm:$0xff] }
  0x8b   :  { %2930 = vmatpush1.bf16.msra.mxu1 %v2929_v38  ;;  %2868 = vmatprep.subr.bf16.mxu0 %v2867_v39  ;;  %v334_v59 = vld [vmem:[#allocation3 + $0x568] sm:$0xff]  ;;  %v332_v60 = vld [vmem:[#allocation3 + $0x558] sm:$0xff]  ;;  %v2873_v62 = vpack.c.bf16 %v325_v54, %v321_v53  ;;  %v2937_v63 = vpack.c.bf16 %v327_v57, %v323_v55  ;;  %v329_v1 = vld [vmem:[#allocation3 + $0x540] sm:$0xff] }
  0x8c   :  { %2932 = vmatprep.subr.bf16.mxu1 %v2931_v43  ;;  %v336_v61 = vld [vmem:[#allocation3 + $0x578] sm:$0xff]  ;;  %v2875_v0 = vpack.c.bf16 %v334_v59, %v330_v58  ;;  %v333_v2 = vld [vmem:[#allocation3 + $0x560] sm:$0xff]  ;;  %v331_v3 = vld [vmem:[#allocation3 + $0x550] sm:$0xff] }
  0x8d   :  { %v2939_v4 = vpack.c.bf16 %v336_v61, %v332_v60  ;;  %v335_v5 = vld [vmem:[#allocation3 + $0x570] sm:$0xff]  ;;  %v338_v6 = vld [vmem:[#allocation3 + $0x588] sm:$0xff]  ;;  %v340_v8 = vld [vmem:[#allocation3 + $0x598] sm:$0xff]  ;;  %v2877_v10 = vpack.c.bf16 %v333_v2, %v329_v1 }
  0x8e   :  { %2870 = vmatpush1.bf16.msra.mxu0 %v2869_v50  ;;  %v342_v7 = vld [vmem:[#allocation3 + $0x5a8] sm:$0xff]  ;;  %v344_v9 = vld [vmem:[#allocation3 + $0x5b8] sm:$0xff]  ;;  %v2941_v11 = vpack.c.bf16 %v335_v5, %v331_v3  ;;  %v337_v13 = vld [vmem:[#allocation3 + $0x580] sm:$0xff] }
  0x8f   :  { %2934 = vmatpush1.bf16.msra.mxu1 %v2933_v51  ;;  %2872 = vmatprep.subr.bf16.mxu0 %v2871_v52  ;;  %v2879_v12 = vpack.c.bf16 %v342_v7, %v338_v6  ;;  %v341_v14 = vld [vmem:[#allocation3 + $0x5a0] sm:$0xff]  ;;  %v339_v15 = vld [vmem:[#allocation3 + $0x590] sm:$0xff]  ;;  %v2943_v16 = vpack.c.bf16 %v344_v9, %v340_v8  ;;  %v346_v18 = vld [vmem:[#allocation3 + $0x5c8] sm:$0xff] }
  0x90   :  { %2936 = vmatprep.subr.bf16.mxu1 %v2935_v56  ;;  %v343_v17 = vld [vmem:[#allocation3 + $0x5b0] sm:$0xff]  ;;  %v350_v19 = vld [vmem:[#allocation3 + $0x5e8] sm:$0xff]  ;;  %v348_v20 = vld [vmem:[#allocation3 + $0x5d8] sm:$0xff]  ;;  %v2881_v22 = vpack.c.bf16 %v341_v14, %v337_v13 }
  0x91   :  { %v352_v21 = vld [vmem:[#allocation3 + $0x5f8] sm:$0xff]  ;;  %v2945_v23 = vpack.c.bf16 %v343_v17, %v339_v15  ;;  %v2883_v24 = vpack.c.bf16 %v350_v19, %v346_v18  ;;  %v345_v25 = vld [vmem:[#allocation3 + $0x5c0] sm:$0xff]  ;;  %v347_v27 = vld [vmem:[#allocation3 + $0x5d0] sm:$0xff] }
  0x92   :  { %2874 = vmatpush1.bf16.msra.mxu0 %v2873_v62  ;;  %v349_v26 = vld [vmem:[#allocation3 + $0x5e0] sm:$0xff]  ;;  %v2947_v28 = vpack.c.bf16 %v352_v21, %v348_v20  ;;  %v351_v29 = vld [vmem:[#allocation3 + $0x5f0] sm:$0xff]  ;;  %v354_v30 = vld [vmem:[#allocation3 + $0x608] sm:$0xff] }
  0x93   :  { %2938 = vmatpush1.bf16.msra.mxu1 %v2937_v63  ;;  %2876 = vmatprep.subr.bf16.mxu0 %v2875_v0  ;;  %v358_v31 = vld [vmem:[#allocation3 + $0x628] sm:$0xff]  ;;  %v356_v32 = vld [vmem:[#allocation3 + $0x618] sm:$0xff]  ;;  %v2885_v34 = vpack.c.bf16 %v349_v26, %v345_v25  ;;  %v2949_v35 = vpack.c.bf16 %v351_v29, %v347_v27  ;;  %v353_v37 = vld [vmem:[#allocation3 + $0x600] sm:$0xff] }
  0x94   :  { %2940 = vmatprep.subr.bf16.mxu1 %v2939_v4  ;;  %v360_v33 = vld [vmem:[#allocation3 + $0x638] sm:$0xff]  ;;  %v2887_v36 = vpack.c.bf16 %v358_v31, %v354_v30  ;;  %v357_v38 = vld [vmem:[#allocation3 + $0x620] sm:$0xff]  ;;  %v355_v39 = vld [vmem:[#allocation3 + $0x610] sm:$0xff] }
  0x95   :  { %v2951_v40 = vpack.c.bf16 %v360_v33, %v356_v32  ;;  %v359_v41 = vld [vmem:[#allocation3 + $0x630] sm:$0xff]  ;;  %v362_v42 = vld [vmem:[#allocation3 + $0x648] sm:$0xff]  ;;  %v364_v44 = vld [vmem:[#allocation3 + $0x658] sm:$0xff]  ;;  %v2889_v46 = vpack.c.bf16 %v357_v38, %v353_v37 }
  0x96   :  { %2878 = vmatpush1.bf16.msra.mxu0 %v2877_v10  ;;  %v366_v43 = vld [vmem:[#allocation3 + $0x668] sm:$0xff]  ;;  %v368_v45 = vld [vmem:[#allocation3 + $0x678] sm:$0xff]  ;;  %v2953_v47 = vpack.c.bf16 %v359_v41, %v355_v39  ;;  %v361_v49 = vld [vmem:[#allocation3 + $0x640] sm:$0xff] }
  0x97   :  { %2942 = vmatpush1.bf16.msra.mxu1 %v2941_v11  ;;  %2880 = vmatprep.subr.bf16.mxu0 %v2879_v12  ;;  %v2891_v48 = vpack.c.bf16 %v366_v43, %v362_v42  ;;  %v365_v50 = vld [vmem:[#allocation3 + $0x660] sm:$0xff]  ;;  %v363_v51 = vld [vmem:[#allocation3 + $0x650] sm:$0xff]  ;;  %v2955_v52 = vpack.c.bf16 %v368_v45, %v364_v44  ;;  %v370_v54 = vld [vmem:[#allocation3 + $0x688] sm:$0xff] }
  0x98   :  { %2944 = vmatprep.subr.bf16.mxu1 %v2943_v16  ;;  %v367_v53 = vld [vmem:[#allocation3 + $0x670] sm:$0xff]  ;;  %v374_v55 = vld [vmem:[#allocation3 + $0x6a8] sm:$0xff]  ;;  %v372_v56 = vld [vmem:[#allocation3 + $0x698] sm:$0xff]  ;;  %v2893_v58 = vpack.c.bf16 %v365_v50, %v361_v49 }
  0x99   :  { %v376_v57 = vld [vmem:[#allocation3 + $0x6b8] sm:$0xff]  ;;  %v2957_v59 = vpack.c.bf16 %v367_v53, %v363_v51  ;;  %v2895_v60 = vpack.c.bf16 %v374_v55, %v370_v54  ;;  %v369_v61 = vld [vmem:[#allocation3 + $0x680] sm:$0xff]  ;;  %v371_v63 = vld [vmem:[#allocation3 + $0x690] sm:$0xff] }
  0x9a   :  { %2882 = vmatpush1.bf16.msra.mxu0 %v2881_v22  ;;  %v373_v62 = vld [vmem:[#allocation3 + $0x6a0] sm:$0xff]  ;;  %v2959_v0 = vpack.c.bf16 %v376_v57, %v372_v56  ;;  %v375_v1 = vld [vmem:[#allocation3 + $0x6b0] sm:$0xff]  ;;  %v378_v2 = vld [vmem:[#allocation3 + $0x6c8] sm:$0xff] }
  0x9b   :  { %2946 = vmatpush1.bf16.msra.mxu1 %v2945_v23  ;;  %2884 = vmatprep.subr.bf16.mxu0 %v2883_v24  ;;  %v382_v3 = vld [vmem:[#allocation3 + $0x6e8] sm:$0xff]  ;;  %v380_v4 = vld [vmem:[#allocation3 + $0x6d8] sm:$0xff]  ;;  %v2897_v6 = vpack.c.bf16 %v373_v62, %v369_v61  ;;  %v377_v7 = vld [vmem:[#allocation3 + $0x6c0] sm:$0xff]  ;;  %v2961_v8 = vpack.c.bf16 %v375_v1, %v371_v63 }
  0x9c   :  { %2948 = vmatprep.subr.bf16.mxu1 %v2947_v28  ;;  %v384_v5 = vld [vmem:[#allocation3 + $0x6f8] sm:$0xff]  ;;  %v2899_v9 = vpack.c.bf16 %v382_v3, %v378_v2  ;;  %v381_v10 = vld [vmem:[#allocation3 + $0x6e0] sm:$0xff]  ;;  %v379_v11 = vld [vmem:[#allocation3 + $0x6d0] sm:$0xff] }
  0x9d   :  { %v383_v12 = vld [vmem:[#allocation3 + $0x6f0] sm:$0xff]  ;;  %v2963_v13 = vpack.c.bf16 %v384_v5, %v380_v4  ;;  %v386_v14 = vld [vmem:[#allocation3 + $0x708] sm:$0xff]  ;;  %v388_v17 = vld [vmem:[#allocation3 + $0x718] sm:$0xff]  ;;  %v2901_v19 = vpack.c.bf16 %v381_v10, %v377_v7 }
  0x9e   :  { %2886 = vmatpush1.bf16.msra.mxu0 %v2885_v34  ;;  %v390_v15 = vld [vmem:[#allocation3 + $0x728] sm:$0xff]  ;;  %v392_v18 = vld [vmem:[#allocation3 + $0x738] sm:$0xff]  ;;  %v2965_v20 = vpack.c.bf16 %v383_v12, %v379_v11  ;;  %v385_v22 = vld [vmem:[#allocation3 + $0x700] sm:$0xff] }
  0x9f   :  { %2950 = vmatpush1.bf16.msra.mxu1 %v2949_v35  ;;  %2888 = vmatprep.subr.bf16.mxu0 %v2887_v36  ;;  %v4198_v16 = vld [vmem:[%s5299_s0 + $0x8] sm:$0xff]  ;;  %v2903_v21 = vpack.c.bf16 %v390_v15, %v386_v14  ;;  %v389_v23 = vld [vmem:[#allocation3 + $0x720] sm:$0xff]  ;;  %v387_v24 = vld [vmem:[#allocation3 + $0x710] sm:$0xff]  ;;  %v2967_v25 = vpack.c.bf16 %v392_v18, %v388_v17 }
  0xa0   :  { %2952 = vmatprep.subr.bf16.mxu1 %v2951_v40  ;;  %609 = vmatprep.mubr.f32.mxu0 %v4198_v16  ;;  %v391_v26 = vld [vmem:[#allocation3 + $0x730] sm:$0xff]  ;;  %v394_v27 = vld [vmem:[#allocation3 + $0x748] sm:$0xff]  ;;  %v396_v29 = vld [vmem:[#allocation3 + $0x758] sm:$0xff]  ;;  %v2905_v31 = vpack.c.bf16 %v389_v23, %v385_v22 }
  0xa1   :  { %698 = vmatprep.mubr.f32.mxu1 %v4198_v16  ;;  %v398_v28 = vld [vmem:[#allocation3 + $0x768] sm:$0xff]  ;;  %v400_v30 = vld [vmem:[#allocation3 + $0x778] sm:$0xff]  ;;  %v2969_v32 = vpack.c.bf16 %v391_v26, %v387_v24  ;;  %v393_v34 = vld [vmem:[#allocation3 + $0x740] sm:$0xff] }
  0xa2   :  { %2890 = vmatpush1.bf16.msra.mxu0 %v2889_v46  ;;  %v2907_v33 = vpack.c.bf16 %v398_v28, %v394_v27  ;;  %v397_v35 = vld [vmem:[#allocation3 + $0x760] sm:$0xff]  ;;  %v395_v36 = vld [vmem:[#allocation3 + $0x750] sm:$0xff]  ;;  %v2971_v37 = vpack.c.bf16 %v400_v30, %v396_v29  ;;  %v402_v39 = vld [vmem:[#allocation3 + $0x788] sm:$0xff] }
  0xa3   :  { %2954 = vmatpush1.bf16.msra.mxu1 %v2953_v47  ;;  %2892 = vmatprep.subr.bf16.mxu0 %v2891_v48  ;;  %v399_v38 = vld [vmem:[#allocation3 + $0x770] sm:$0xff]  ;;  %v406_v40 = vld [vmem:[#allocation3 + $0x7a8] sm:$0xff]  ;;  %v404_v41 = vld [vmem:[#allocation3 + $0x798] sm:$0xff]  ;;  %v2909_v43 = vpack.c.bf16 %v397_v35, %v393_v34 }
  0xa4   :  { %2956 = vmatprep.subr.bf16.mxu1 %v2955_v52  ;;  %v408_v42 = vld [vmem:[#allocation3 + $0x7b8] sm:$0xff]  ;;  %v2973_v44 = vpack.c.bf16 %v399_v38, %v395_v36  ;;  %v2911_v45 = vpack.c.bf16 %v406_v40, %v402_v39  ;;  %v401_v46 = vld [vmem:[#allocation3 + $0x780] sm:$0xff]  ;;  %v403_v48 = vld [vmem:[#allocation3 + $0x790] sm:$0xff] }
  0xa5   :  { %v405_v47 = vld [vmem:[#allocation3 + $0x7a0] sm:$0xff]  ;;  %v2975_v49 = vpack.c.bf16 %v408_v42, %v404_v41  ;;  %v407_v50 = vld [vmem:[#allocation3 + $0x7b0] sm:$0xff]  ;;  %v410_v51 = vld [vmem:[#allocation3 + $0x7c8] sm:$0xff] }
  0xa6   :  { %2894 = vmatpush1.bf16.msra.mxu0 %v2893_v58  ;;  %v414_v52 = vld [vmem:[#allocation3 + $0x7e8] sm:$0xff]  ;;  %v412_v53 = vld [vmem:[#allocation3 + $0x7d8] sm:$0xff]  ;;  %v2913_v55 = vpack.c.bf16 %v405_v47, %v401_v46  ;;  %v2977_v56 = vpack.c.bf16 %v407_v50, %v403_v48  ;;  %v409_v58 = vld [vmem:[#allocation3 + $0x7c0] sm:$0xff] }
  0xa7   :  { %2958 = vmatpush1.bf16.msra.mxu1 %v2957_v59  ;;  %2896 = vmatprep.subr.bf16.mxu0 %v2895_v60  ;;  %v416_v54 = vld [vmem:[#allocation3 + $0x7f8] sm:$0xff]  ;;  %v2915_v57 = vpack.c.bf16 %v414_v52, %v410_v51  ;;  %v413_v59 = vld [vmem:[#allocation3 + $0x7e0] sm:$0xff]  ;;  %v411_v60 = vld [vmem:[#allocation3 + $0x7d0] sm:$0xff] }
  0xa8   :  { %2960 = vmatprep.subr.bf16.mxu1 %v2959_v0  ;;  %v2979_v61 = vpack.c.bf16 %v416_v54, %v412_v53  ;;  %v415_v62 = vld [vmem:[#allocation3 + $0x7f0] sm:$0xff]  ;;  %v162_v63 = vld [vmem:[#allocation3 + $0x8] sm:$0xff]  ;;  %v164_v1 = vld [vmem:[#allocation3 + $0x18] sm:$0xff]  ;;  %v2917_v3 = vpack.c.bf16 %v413_v59, %v409_v58 }
  0xa9   :  { %v166_v0 = vld [vmem:[#allocation3 + $0x28] sm:$0xff]  ;;  %v168_v2 = vld [vmem:[#allocation3 + $0x38] sm:$0xff]  ;;  %v2981_v4 = vpack.c.bf16 %v415_v62, %v411_v60  ;;  %v165_v7 = vld [vmem:[#allocation3 + $0x20] sm:$0xff] }
  0xaa   :  { %2898 = vmatpush1.bf16.msra.mxu0 %v2897_v6  ;;  %v2983_v5 = vpack.c.bf16 %v166_v0, %v162_v63  ;;  %v161_v6 = vld [vmem:[#allocation3] sm:$0xff]  ;;  %v167_v10 = vld [vmem:[#allocation3 + $0x30] sm:$0xff]  ;;  %v170_v11 = vld [vmem:[#allocation3 + $0x48] sm:$0xff] }
  0xab   :  { %2962 = vmatpush1.bf16.msra.mxu1 %v2961_v8  ;;  %2900 = vmatprep.subr.bf16.mxu0 %v2899_v9  ;;  %v163_v8 = vld [vmem:[#allocation3 + $0x10] sm:$0xff]  ;;  %v3047_v9 = vpack.c.bf16 %v168_v2, %v164_v1  ;;  %v174_v12 = vld [vmem:[#allocation3 + $0x68] sm:$0xff]  ;;  %v176_v14 = vld [vmem:[#allocation3 + $0x78] sm:$0xff]  ;;  %v2985_v17 = vpack.c.bf16 %v165_v7, %v161_v6 }
  0xac   :  { %2964 = vmatprep.subr.bf16.mxu1 %v2963_v13  ;;  %v172_v13 = vld [vmem:[#allocation3 + $0x58] sm:$0xff]  ;;  %v4205_v15 = vld [vmem:[%s5299_s0] sm:$0xff]  ;;  %v3049_v18 = vpack.c.bf16 %v167_v10, %v163_v8  ;;  %v171_v22 = vld [vmem:[#allocation3 + $0x50] sm:$0xff] }
  0xad   :  { %v3051_v23 = vpack.c.bf16 %v176_v14, %v172_v13  ;;  %v175_v24 = vld [vmem:[#allocation3 + $0x70] sm:$0xff]  ;;  %v182_v26 = vld [vmem:[#allocation3 + $0xa8] sm:$0xff]  ;;  %v180_v27 = vld [vmem:[#allocation3 + $0x98] sm:$0xff] }
  0xae   :  { %2902 = vmatpush1.bf16.msra.mxu0 %v2901_v19  ;;  %v2987_v19 = vpack.c.bf16 %v174_v12, %v170_v11  ;;  %v184_v28 = vld [vmem:[#allocation3 + $0xb8] sm:$0xff]  ;;  %v3053_v30 = vpack.c.bf16 %v175_v24, %v171_v22  ;;  %v179_v34 = vld [vmem:[#allocation3 + $0x90] sm:$0xff]  ;;  %v190_v38 = vld [vmem:[#allocation3 + $0xe8] sm:$0xff] }
  0xaf   :  { %2966 = vmatpush1.bf16.msra.mxu1 %v2965_v20  ;;  %2904 = vmatprep.subr.bf16.mxu0 %v2903_v21  ;;  %v169_v20 = vld [vmem:[#allocation3 + $0x40] sm:$0xff]  ;;  %v3055_v35 = vpack.c.bf16 %v184_v28, %v180_v27  ;;  %v183_v36 = vld [vmem:[#allocation3 + $0xb0] sm:$0xff]  ;;  %v188_v39 = vld [vmem:[#allocation3 + $0xd8] sm:$0xff] }
  0xb0   :  { %2968 = vmatprep.subr.bf16.mxu1 %v2967_v25  ;;  %v173_v21 = vld [vmem:[#allocation3 + $0x60] sm:$0xff]  ;;  %v178_v25 = vld [vmem:[#allocation3 + $0x88] sm:$0xff]  ;;  %v192_v40 = vld [vmem:[#allocation3 + $0xf8] sm:$0xff]  ;;  %v3057_v42 = vpack.c.bf16 %v183_v36, %v179_v34 }
  0xb1   :  { %v2989_v29 = vpack.c.bf16 %v173_v21, %v169_v20  ;;  %v187_v46 = vld [vmem:[#allocation3 + $0xd0] sm:$0xff]  ;;  %v3059_v47 = vpack.c.bf16 %v192_v40, %v188_v39  ;;  %v198_v50 = vld [vmem:[#allocation3 + $0x128] sm:$0xff]  ;;  %v196_v51 = vld [vmem:[#allocation3 + $0x118] sm:$0xff] }
  0xb2   :  { %2906 = vmatpush1.bf16.msra.mxu0 %v2905_v31  ;;  %v2991_v31 = vpack.c.bf16 %v182_v26, %v178_v25  ;;  %v191_v48 = vld [vmem:[#allocation3 + $0xf0] sm:$0xff]  ;;  %v200_v52 = vld [vmem:[#allocation3 + $0x138] sm:$0xff]  ;;  %v193_v54 = vld [vmem:[#allocation3 + $0x100] sm:$0xff] }
  0xb3   :  { %2970 = vmatpush1.bf16.msra.mxu1 %v2969_v32  ;;  %2908 = vmatprep.subr.bf16.mxu0 %v2907_v33  ;;  %v177_v32 = vld [vmem:[#allocation3 + $0x80] sm:$0xff]  ;;  %v195_v58 = vld [vmem:[#allocation3 + $0x110] sm:$0xff]  ;;  %v3063_v60 = vpack.c.bf16 %v200_v52, %v196_v51  ;;  %v206_v62 = vld [vmem:[#allocation3 + $0x168] sm:$0xff] }
  0xb4   :  { %2972 = vmatprep.subr.bf16.mxu1 %v2971_v37  ;;  %v181_v33 = vld [vmem:[#allocation3 + $0xa0] sm:$0xff]  ;;  %v186_v37 = vld [vmem:[#allocation3 + $0xc8] sm:$0xff]  ;;  %v199_v59 = vld [vmem:[#allocation3 + $0x130] sm:$0xff] }
  0xb5   :  { %v2993_v41 = vpack.c.bf16 %v181_v33, %v177_v32  ;;  %v4212_v63 = vld [vmem:[%s5299_s0 + $0x18] sm:$0xff]  ;;  %v4219_v2 = vld [vmem:[%s5299_s0 + $0x10] sm:$0xff]  ;;  %v205_v7 = vld [vmem:[#allocation3 + $0x160] sm:$0xff] }
  0xb6   :  { %2910 = vmatpush1.bf16.msra.mxu0 %v2909_v43  ;;  %v2995_v43 = vpack.c.bf16 %v190_v38, %v186_v37  ;;  %v204_v0 = vld [vmem:[#allocation3 + $0x158] sm:$0xff]  ;;  %v203_v8 = vld [vmem:[#allocation3 + $0x150] sm:$0xff]  ;;  %v210_v12 = vld [vmem:[#allocation3 + $0x188] sm:$0xff] }
  0xb7   :  { %2974 = vmatpush1.bf16.msra.mxu1 %v2973_v44  ;;  %2912 = vmatprep.subr.bf16.mxu0 %v2911_v45  ;;  %v185_v44 = vld [vmem:[#allocation3 + $0xc0] sm:$0xff]  ;;  %v208_v1 = vld [vmem:[#allocation3 + $0x178] sm:$0xff]  ;;  %v207_v11 = vld [vmem:[#allocation3 + $0x170] sm:$0xff] }
  0xb8   :  { %2976 = vmatprep.subr.bf16.mxu1 %v2975_v49  ;;  %v189_v45 = vld [vmem:[#allocation3 + $0xe0] sm:$0xff]  ;;  %v194_v49 = vld [vmem:[#allocation3 + $0x108] sm:$0xff]  ;;  %v3067_v10 = vpack.c.bf16 %v208_v1, %v204_v0  ;;  %v212_v14 = vld [vmem:[#allocation3 + $0x198] sm:$0xff]  ;;  %v3069_v22 = vpack.c.bf16 %v207_v11, %v203_v8 }
  0xb9   :  { %v2997_v53 = vpack.c.bf16 %v189_v45, %v185_v44  ;;  %v214_v13 = vld [vmem:[#allocation3 + $0x1a8] sm:$0xff]  ;;  %v209_v20 = vld [vmem:[#allocation3 + $0x180] sm:$0xff]  ;;  %v4239_v21 = vld [vmem:[%s5299_s0 + $0x38] sm:$0xff]  ;;  %v4044_v45 = vmov 0.0  }
  0xba   :  { %2914 = vmatpush1.bf16.msra.mxu0 %v2913_v55  ;;  %v3061_v55 = vpack.c.bf16 %v191_v48, %v187_v46  ;;  %v213_v24 = vld [vmem:[#allocation3 + $0x1a0] sm:$0xff]  ;;  %v211_v25 = vld [vmem:[#allocation3 + $0x190] sm:$0xff]  ;;  %v218_v28 = vld [vmem:[#allocation3 + $0x1c8] sm:$0xff] }
  0xbb   :  { %2978 = vmatpush1.bf16.msra.mxu1 %v2977_v56  ;;  %2916 = vmatprep.subr.bf16.mxu0 %v2915_v57  ;;  %v2999_v56 = vpack.c.bf16 %v198_v50, %v194_v49  ;;  %v197_v57 = vld [vmem:[#allocation3 + $0x120] sm:$0xff]  ;;  %v215_v26 = vld [vmem:[#allocation3 + $0x1b0] sm:$0xff]  ;;  %v224_v32 = vld [vmem:[#allocation3 + $0x1f8] sm:$0xff]  ;;  %v3009_v33 = vpack.c.bf16 %v213_v24, %v209_v20 }
  0xbc   :  { %2980 = vmatprep.subr.bf16.mxu1 %v2979_v61  ;;  %v202_v61 = vld [vmem:[#allocation3 + $0x148] sm:$0xff]  ;;  %v3073_v34 = vpack.c.bf16 %v215_v26, %v211_v25  ;;  %v217_v36 = vld [vmem:[#allocation3 + $0x1c0] sm:$0xff]  ;;  %v219_v38 = vld [vmem:[#allocation3 + $0x1d0] sm:$0xff] }
  0xbd   :  { %v3003_v6 = vpack.c.bf16 %v206_v62, %v202_v61  ;;  %v221_v37 = vld [vmem:[#allocation3 + $0x1e0] sm:$0xff]  ;;  %v223_v40 = vld [vmem:[#allocation3 + $0x1f0] sm:$0xff]  ;;  %v232_v44 = vld [vmem:[#allocation3 + $0x238] sm:$0xff] }
  0xbe   :  { %2918 = vmatpush1.bf16.msra.mxu0 %v2917_v3  ;;  %v3001_v3 = vpack.c.bf16 %v197_v57, %v193_v54  ;;  %v3013_v46 = vpack.c.bf16 %v221_v37, %v217_v36  ;;  %v225_v49 = vld [vmem:[#allocation3 + $0x200] sm:$0xff]  ;;  %v227_v51 = vld [vmem:[#allocation3 + $0x210] sm:$0xff]  ;;  %v234_v54 = vld [vmem:[#allocation3 + $0x248] sm:$0xff] }
  0xbf   :  { %2982 = vmatpush1.bf16.msra.mxu1 %v2981_v4  ;;  %2984 = vmatprep.subr.bf16.mxu0 %v2983_v5  ;;  %v201_v4 = vld [vmem:[#allocation3 + $0x140] sm:$0xff]  ;;  %v3065_v5 = vpack.c.bf16 %v199_v59, %v195_v58  ;;  %v240_v57 = vld [vmem:[#allocation3 + $0x278] sm:$0xff]  ;;  %v235_v0 = vld [vmem:[#allocation3 + $0x250] sm:$0xff] }
  0xc0   :  { %3048 = vmatprep.subr.bf16.mxu1 %v3047_v9  ;;  %v4225_v9 = vld [vmem:[%s5299_s0 + $0x28] sm:$0xff]  ;;  %v229_v50 = vld [vmem:[#allocation3 + $0x220] sm:$0xff]  ;;  %v256_v24 = vld [vmem:[#allocation3 + $0x2f8] sm:$0xff] }
  0xc1   :  { %610 = vmatmul.mubr.f32.vlgmr.msra.gmra.mrb[0].mxu0 %v4205_v15  ;;  %v3017_v58 = vpack.c.bf16 %v229_v50, %v225_v49  ;;  %v233_v61 = vld [vmem:[#allocation3 + $0x240] sm:$0xff]  ;;  %v250_v20 = vld [vmem:[#allocation3 + $0x2c8] sm:$0xff]  ;;  %v260_v36 = vld [vmem:[#allocation3 + $0x318] sm:$0xff] }
  0xc2   :  { %699 = vmatmul.mubr.f32.vlgmr.msra.gmra.mrb[0].mxu1 %v4205_v15  ;;  %2986 = vmatpush1.bf16.msra.mxu0 %v2985_v17  ;;  %v216_v17 = vld [vmem:[#allocation3 + $0x1b8] sm:$0xff]  ;;  %v237_v62 = vld [vmem:[#allocation3 + $0x260] sm:$0xff] }
  0xc3   :  { %3050 = vmatpush1.bf16.msra.mxu1 %v3049_v18  ;;  %2988 = vmatprep.subr.bf16.mxu0 %v2987_v19  ;;  %v4233_v18 = vld [vmem:[%s5299_s0 + $0x20] sm:$0xff]  ;;  %v3005_v19 = vpack.c.bf16 %v205_v7, %v201_v4  ;;  %v3071_v27 = vpack.c.bf16 %v216_v17, %v212_v14  ;;  %v242_v4 = vld [vmem:[#allocation3 + $0x288] sm:$0xff]  ;;  %v248_v7 = vld [vmem:[#allocation3 + $0x2b8] sm:$0xff]  ;;  %v3021_v8 = vpack.c.bf16 %v237_v62, %v233_v61 }
  0xc4   :  { %3052 = vmatprep.subr.bf16.mxu1 %v3051_v23  ;;  %615 = vmatprep.mubr.f32.mxu0 %v4212_v63  ;;  %v3007_v23 = vpack.c.bf16 %v214_v13, %v210_v12  ;;  %v241_v12 = vld [vmem:[#allocation3 + $0x280] sm:$0xff]  ;;  %v243_v14 = vld [vmem:[#allocation3 + $0x290] sm:$0xff]  ;;  %v264_v37 = vld [vmem:[#allocation3 + $0x338] sm:$0xff] }
  0xc5   :  { %704 = vmatprep.mubr.f32.mxu1 %v4212_v63  ;;  %616 = vmatmul.mubr.f32.gmra.mrb[2].mxu0 %v4219_v2  ;;  %v245_v13 = vld [vmem:[#allocation3 + $0x2a0] sm:$0xff]  ;;  %v268_v49 = vld [vmem:[#allocation3 + $0x358] sm:$0xff] }
  0xc6   :  { %2990 = vmatpush1.bf16.msra.mxu0 %v2989_v29  ;;  %705 = vmatmul.mubr.f32.gmra.mrb[2].mxu1 %v4219_v2  ;;  %v222_v29 = vld [vmem:[#allocation3 + $0x1e8] sm:$0xff]  ;;  %v3025_v25 = vpack.c.bf16 %v245_v13, %v241_v12  ;;  %v272_v50 = vld [vmem:[#allocation3 + $0x378] sm:$0xff] }
  0xc7   :  { %3054 = vmatpush1.bf16.msra.mxu1 %v3053_v30  ;;  %2992 = vmatprep.subr.bf16.mxu0 %v2991_v31  ;;  %v4245_v30 = vld [vmem:[%s5299_s0 + $0x30] sm:$0xff]  ;;  %v220_v31 = vld [vmem:[#allocation3 + $0x1d8] sm:$0xff] }
  0xc8   :  { %3056 = vmatprep.subr.bf16.mxu1 %v3055_v35  ;;  %621 = vmatprep.mubr.f32.mxu0 %v4225_v9  ;;  %v3011_v35 = vpack.c.bf16 %v222_v29, %v218_v28  ;;  %v3075_v39 = vpack.c.bf16 %v224_v32, %v220_v31  ;;  %v249_v28 = vld [vmem:[#allocation3 + $0x2c0] sm:$0xff]  ;;  %v251_v31 = vld [vmem:[#allocation3 + $0x2d0] sm:$0xff]  ;;  %v276_v61 = vld [vmem:[#allocation3 + $0x398] sm:$0xff] }
  0xc9   :  { %710 = vmatprep.mubr.f32.mxu1 %v4225_v9  ;;  %622 = vmatmul.mubr.f32.gmra.mrb[4].mxu0 %v4233_v18  ;;  %v253_v29 = vld [vmem:[#allocation3 + $0x2e0] sm:$0xff]  ;;  %v280_v62 = vld [vmem:[#allocation3 + $0x3b8] sm:$0xff] }
  0xca   :  { %2994 = vmatpush1.bf16.msra.mxu0 %v2993_v41  ;;  %711 = vmatmul.mubr.f32.gmra.mrb[4].mxu1 %v4233_v18  ;;  %v226_v41 = vld [vmem:[#allocation3 + $0x208] sm:$0xff]  ;;  %v284_v12 = vld [vmem:[#allocation3 + $0x3d8] sm:$0xff] }
  0xcb   :  { %3058 = vmatpush1.bf16.msra.mxu1 %v3057_v42  ;;  %2996 = vmatprep.subr.bf16.mxu0 %v2995_v43  ;;  %v230_v42 = vld [vmem:[#allocation3 + $0x228] sm:$0xff]  ;;  %v228_v43 = vld [vmem:[#allocation3 + $0x218] sm:$0xff] }
  0xcc   :  { %3060 = vmatprep.subr.bf16.mxu1 %v3059_v47  ;;  %627 = vmatprep.mubr.f32.mxu0 %v4239_v21  ;;  %v3077_v47 = vpack.c.bf16 %v223_v40, %v219_v38  ;;  %v3015_v48 = vpack.c.bf16 %v230_v42, %v226_v41  ;;  %v3079_v52 = vpack.c.bf16 %v232_v44, %v228_v43  ;;  %v257_v41 = vld [vmem:[#allocation3 + $0x300] sm:$0xff]  ;;  %v259_v43 = vld [vmem:[#allocation3 + $0x310] sm:$0xff]  ;;  %v288_v13 = vld [vmem:[#allocation3 + $0x3f8] sm:$0xff] }
  0xcd   :  { %716 = vmatprep.mubr.f32.mxu1 %v4239_v21  ;;  %628 = vmatmul.mubr.f32.gmra.mrb[6].mxu0 %v4245_v30  ;;  %v3029_v38 = vpack.c.bf16 %v253_v29, %v249_v28  ;;  %v261_v42 = vld [vmem:[#allocation3 + $0x320] sm:$0xff]  ;;  %v3095_v44 = vpack.c.bf16 %v264_v37, %v260_v36  ;;  %v420_v28 = vld [vmem:[#allocation3 + $0x818] sm:$0xff]  ;;  %v419_v36 = vld [vmem:[#allocation3 + $0x810] sm:$0xff] }
  0xce   :  { %2998 = vmatpush1.bf16.msra.mxu0 %v2997_v53  ;;  %717 = vmatmul.mubr.f32.gmra.mrb[6].mxu1 %v4245_v30  ;;  %v231_v53 = vld [vmem:[#allocation3 + $0x230] sm:$0xff]  ;;  %v424_v29 = vld [vmem:[#allocation3 + $0x838] sm:$0xff] }
  0xcf   :  { %3062 = vmatpush1.bf16.msra.mxu1 %v3061_v55  ;;  %3000 = vmatprep.subr.bf16.mxu0 %v2999_v56  ;;  %v238_v55 = vld [vmem:[#allocation3 + $0x268] sm:$0xff]  ;;  %v236_v56 = vld [vmem:[#allocation3 + $0x258] sm:$0xff]  ;;  %v3081_v59 = vpack.c.bf16 %v231_v53, %v227_v51  ;;  %v3033_v51 = vpack.c.bf16 %v261_v42, %v257_v41  ;;  %v3175_v37 = vpack.c.bf16 %v424_v29, %v420_v28  ;;  %v455_v28 = vld [vmem:[#allocation3 + $0x930] sm:$0xff] }
  0xd0   :  { %3064 = vmatprep.subr.bf16.mxu1 %v3063_v60  ;;  %787 = vmatprep.mubr.f32.mxu0 %v4044_v45  ;;  %v3019_v60 = vpack.c.bf16 %v238_v55, %v234_v54  ;;  %v3083_v1 = vpack.c.bf16 %v240_v57, %v236_v56  ;;  %v265_v54 = vld [vmem:[#allocation3 + $0x340] sm:$0xff]  ;;  %v267_v56 = vld [vmem:[#allocation3 + $0x350] sm:$0xff]  ;;  %v3099_v57 = vpack.c.bf16 %v272_v50, %v268_v49  ;;  %v428_v41 = vld [vmem:[#allocation3 + $0x858] sm:$0xff] }
  0xd1   :  { %876 = vmatprep.mubr.f32.mxu1 %v4044_v45  ;;  %v269_v55 = vld [vmem:[#allocation3 + $0x360] sm:$0xff]  ;;  %v432_v42 = vld [vmem:[#allocation3 + $0x878] sm:$0xff]  ;;  %v427_v49 = vld [vmem:[#allocation3 + $0x850] sm:$0xff] }
  0xd2   :  { %3002 = vmatpush1.bf16.msra.mxu0 %v3001_v3  ;;  %v239_v3 = vld [vmem:[#allocation3 + $0x270] sm:$0xff]  ;;  %v3179_v50 = vpack.c.bf16 %v432_v42, %v428_v41  ;;  %v458_v29 = vld [vmem:[#allocation3 + $0x948] sm:$0xff] }
  0xd3   :  { %3066 = vmatpush1.bf16.msra.mxu1 %v3065_v5  ;;  %3004 = vmatprep.subr.bf16.mxu0 %v3003_v6  ;;  %v246_v5 = vld [vmem:[#allocation3 + $0x2a8] sm:$0xff]  ;;  %v244_v6 = vld [vmem:[#allocation3 + $0x298] sm:$0xff]  ;;  %v463_v41 = vld [vmem:[#allocation3 + $0x970] sm:$0xff] }
  0xd4   :  { %3068 = vmatprep.subr.bf16.mxu1 %v3067_v10  ;;  %v3085_v10 = vpack.c.bf16 %v239_v3, %v235_v0  ;;  %v3023_v11 = vpack.c.bf16 %v246_v5, %v242_v4  ;;  %v3087_v17 = vpack.c.bf16 %v248_v7, %v244_v6  ;;  %v3037_v0 = vpack.c.bf16 %v269_v55, %v265_v54  ;;  %v273_v4 = vld [vmem:[#allocation3 + $0x380] sm:$0xff]  ;;  %v275_v6 = vld [vmem:[#allocation3 + $0x390] sm:$0xff]  ;;  %v436_v54 = vld [vmem:[#allocation3 + $0x898] sm:$0xff] }
  0xd5   :  { %v277_v5 = vld [vmem:[#allocation3 + $0x3a0] sm:$0xff]  ;;  %v3103_v7 = vpack.c.bf16 %v280_v62, %v276_v61  ;;  %v440_v55 = vld [vmem:[#allocation3 + $0x8b8] sm:$0xff]  ;;  %v435_v61 = vld [vmem:[#allocation3 + $0x890] sm:$0xff] }
  0xd6   :  { %3006 = vmatpush1.bf16.msra.mxu0 %v3005_v19  ;;  %v247_v19 = vld [vmem:[#allocation3 + $0x2b0] sm:$0xff]  ;;  %v3183_v62 = vpack.c.bf16 %v440_v55, %v436_v54  ;;  %v466_v42 = vld [vmem:[#allocation3 + $0x988] sm:$0xff]  ;;  %v476_v55 = vld [vmem:[#allocation3 + $0x9d8] sm:$0xff] }
  0xd7   :  { %3070 = vmatpush1.bf16.msra.mxu1 %v3069_v22  ;;  %3008 = vmatprep.subr.bf16.mxu0 %v3007_v23  ;;  %v254_v22 = vld [vmem:[#allocation3 + $0x2e8] sm:$0xff]  ;;  %v252_v23 = vld [vmem:[#allocation3 + $0x2d8] sm:$0xff]  ;;  %v3089_v26 = vpack.c.bf16 %v247_v19, %v243_v14  ;;  %v3041_v14 = vpack.c.bf16 %v277_v5, %v273_v4 }
  0xd8   :  { %3072 = vmatprep.subr.bf16.mxu1 %v3071_v27  ;;  %v3027_v27 = vpack.c.bf16 %v254_v22, %v250_v20  ;;  %v3091_v32 = vpack.c.bf16 %v256_v24, %v252_v23  ;;  %v281_v20 = vld [vmem:[#allocation3 + $0x3c0] sm:$0xff]  ;;  %v283_v23 = vld [vmem:[#allocation3 + $0x3d0] sm:$0xff]  ;;  %v3107_v24 = vpack.c.bf16 %v288_v13, %v284_v12  ;;  %v444_v4 = vld [vmem:[#allocation3 + $0x8d8] sm:$0xff] }
  0xd9   :  { %v285_v22 = vld [vmem:[#allocation3 + $0x3e0] sm:$0xff]  ;;  %v448_v5 = vld [vmem:[#allocation3 + $0x8f8] sm:$0xff]  ;;  %v443_v12 = vld [vmem:[#allocation3 + $0x8d0] sm:$0xff] }
  0xda   :  { %3010 = vmatpush1.bf16.msra.mxu0 %v3009_v33  ;;  %v255_v33 = vld [vmem:[#allocation3 + $0x2f0] sm:$0xff]  ;;  %v3187_v13 = vpack.c.bf16 %v448_v5, %v444_v4  ;;  %v478_v54 = vld [vmem:[#allocation3 + $0x9e8] sm:$0xff]  ;;  %v484_v4 = vld [vmem:[#allocation3 + $0xa18] sm:$0xff] }
  0xdb   :  { %3074 = vmatpush1.bf16.msra.mxu1 %v3073_v34  ;;  %3012 = vmatprep.subr.bf16.mxu0 %v3011_v35  ;;  %v258_v34 = vld [vmem:[#allocation3 + $0x308] sm:$0xff]  ;;  %v488_v5 = vld [vmem:[#allocation3 + $0xa38] sm:$0xff] }
  0xdc   :  { %3076 = vmatprep.subr.bf16.mxu1 %v3075_v39  ;;  %v262_v35 = vld [vmem:[#allocation3 + $0x328] sm:$0xff]  ;;  %v3093_v39 = vpack.c.bf16 %v255_v33, %v251_v31  ;;  %v3045_v31 = vpack.c.bf16 %v285_v22, %v281_v20  ;;  %v456_v20 = vld [vmem:[#allocation3 + $0x938] sm:$0xff] }
  0xdd   :  { %v3031_v40 = vpack.c.bf16 %v262_v35, %v258_v34  ;;  %v417_v34 = vld [vmem:[#allocation3 + $0x800] sm:$0xff] }
  0xde   :  { %3014 = vmatpush1.bf16.msra.mxu0 %v3013_v46  ;;  %v263_v46 = vld [vmem:[#allocation3 + $0x330] sm:$0xff]  ;;  %v421_v35 = vld [vmem:[#allocation3 + $0x820] sm:$0xff] }
  0xdf   :  { %3078 = vmatpush1.bf16.msra.mxu1 %v3077_v47  ;;  %3016 = vmatprep.subr.bf16.mxu0 %v3015_v48  ;;  %v266_v47 = vld [vmem:[#allocation3 + $0x348] sm:$0xff] }
  0xe0   :  { %3080 = vmatprep.subr.bf16.mxu1 %v3079_v52  ;;  %v270_v48 = vld [vmem:[#allocation3 + $0x368] sm:$0xff]  ;;  %v3097_v52 = vpack.c.bf16 %v263_v46, %v259_v43  ;;  %v3113_v43 = vpack.c.bf16 %v421_v35, %v417_v34 }
  0xe1   :  { %v3035_v53 = vpack.c.bf16 %v270_v48, %v266_v47  ;;  %v425_v47 = vld [vmem:[#allocation3 + $0x840] sm:$0xff] }
  0xe2   :  { %3018 = vmatpush1.bf16.msra.mxu0 %v3017_v58  ;;  %v271_v58 = vld [vmem:[#allocation3 + $0x370] sm:$0xff]  ;;  %v429_v48 = vld [vmem:[#allocation3 + $0x860] sm:$0xff] }
  0xe3   :  { %3082 = vmatpush1.bf16.msra.mxu1 %v3081_v59  ;;  %3020 = vmatprep.subr.bf16.mxu0 %v3019_v60  ;;  %v274_v59 = vld [vmem:[#allocation3 + $0x388] sm:$0xff] }
  0xe4   :  { %3084 = vmatprep.subr.bf16.mxu1 %v3083_v1  ;;  %v278_v60 = vld [vmem:[#allocation3 + $0x3a8] sm:$0xff]  ;;  %v3101_v1 = vpack.c.bf16 %v271_v58, %v267_v56  ;;  %v3117_v56 = vpack.c.bf16 %v429_v48, %v425_v47  ;;  %v465_v48 = vld [vmem:[#allocation3 + $0x980] sm:$0xff] }
  0xe5   :  { %v3039_v3 = vpack.c.bf16 %v278_v60, %v274_v59  ;;  %v433_v59 = vld [vmem:[#allocation3 + $0x880] sm:$0xff] }
  0xe6   :  { %3022 = vmatpush1.bf16.msra.mxu0 %v3021_v8  ;;  %v279_v8 = vld [vmem:[#allocation3 + $0x3b0] sm:$0xff]  ;;  %v437_v60 = vld [vmem:[#allocation3 + $0x8a0] sm:$0xff] }
  0xe7   :  { %3086 = vmatpush1.bf16.msra.mxu1 %v3085_v10  ;;  %3024 = vmatprep.subr.bf16.mxu0 %v3023_v11  ;;  %v282_v10 = vld [vmem:[#allocation3 + $0x3c8] sm:$0xff] }
  0xe8   :  { %3088 = vmatprep.subr.bf16.mxu1 %v3087_v17  ;;  %v286_v11 = vld [vmem:[#allocation3 + $0x3e8] sm:$0xff]  ;;  %v3105_v17 = vpack.c.bf16 %v279_v8, %v275_v6  ;;  %v3121_v6 = vpack.c.bf16 %v437_v60, %v433_v59  ;;  %v473_v59 = vld [vmem:[#allocation3 + $0x9c0] sm:$0xff] }
  0xe9   :  { %v3043_v19 = vpack.c.bf16 %v286_v11, %v282_v10  ;;  %v441_v10 = vld [vmem:[#allocation3 + $0x8c0] sm:$0xff] }
  0xea   :  { %3026 = vmatpush1.bf16.msra.mxu0 %v3025_v25  ;;  %v287_v25 = vld [vmem:[#allocation3 + $0x3f0] sm:$0xff]  ;;  %v445_v11 = vld [vmem:[#allocation3 + $0x8e0] sm:$0xff] }
  0xeb   :  { %3090 = vmatpush1.bf16.msra.mxu1 %v3089_v26  ;;  %3028 = vmatprep.subr.bf16.mxu0 %v3027_v27  ;;  %v418_v26 = vld [vmem:[#allocation3 + $0x808] sm:$0xff]  ;;  %v477_v60 = vld [vmem:[#allocation3 + $0x9e0] sm:$0xff] }
  0xec   :  { %3092 = vmatprep.subr.bf16.mxu1 %v3091_v32  ;;  %v422_v27 = vld [vmem:[#allocation3 + $0x828] sm:$0xff]  ;;  %v3109_v32 = vpack.c.bf16 %v287_v25, %v283_v23  ;;  %v453_v25 = vld [vmem:[#allocation3 + $0x920] sm:$0xff] }
  0xed   :  { %v3111_v33 = vpack.c.bf16 %v422_v27, %v418_v26  ;;  %v451_v26 = vld [vmem:[#allocation3 + $0x910] sm:$0xff] }
  0xee   :  { %3030 = vmatpush1.bf16.msra.mxu0 %v3029_v38  ;;  %v423_v38 = vld [vmem:[#allocation3 + $0x830] sm:$0xff]  ;;  %v3193_v35 = vpack.c.bf16 %v455_v28, %v451_v26 }
  0xef   :  { %3094 = vmatpush1.bf16.msra.mxu1 %v3093_v39  ;;  %3032 = vmatprep.subr.bf16.mxu0 %v3031_v40  ;;  %v426_v39 = vld [vmem:[#allocation3 + $0x848] sm:$0xff]  ;;  %v491_v26 = vld [vmem:[#allocation3 + $0xa50] sm:$0xff] }
  0xf0   :  { %3096 = vmatprep.subr.bf16.mxu1 %v3095_v44  ;;  %v430_v40 = vld [vmem:[#allocation3 + $0x868] sm:$0xff]  ;;  %v3177_v44 = vpack.c.bf16 %v423_v38, %v419_v36  ;;  %v461_v38 = vld [vmem:[#allocation3 + $0x960] sm:$0xff]  ;;  %v495_v28 = vld [vmem:[#allocation3 + $0xa70] sm:$0xff] }
  0xf1   :  { %v3115_v46 = vpack.c.bf16 %v430_v40, %v426_v39  ;;  %v459_v39 = vld [vmem:[#allocation3 + $0x950] sm:$0xff] }
  0xf2   :  { %3034 = vmatpush1.bf16.msra.mxu0 %v3033_v51  ;;  %v431_v51 = vld [vmem:[#allocation3 + $0x870] sm:$0xff] }
  0xf3   :  { %3098 = vmatpush1.bf16.msra.mxu1 %v3097_v52  ;;  %3036 = vmatprep.subr.bf16.mxu0 %v3035_v53  ;;  %v434_v52 = vld [vmem:[#allocation3 + $0x888] sm:$0xff] }
  0xf4   :  { %3100 = vmatprep.subr.bf16.mxu1 %v3099_v57  ;;  %v438_v53 = vld [vmem:[#allocation3 + $0x8a8] sm:$0xff]  ;;  %v3181_v57 = vpack.c.bf16 %v431_v51, %v427_v49  ;;  %v469_v49 = vld [vmem:[#allocation3 + $0x9a0] sm:$0xff] }
  0xf5   :  { %v3119_v58 = vpack.c.bf16 %v438_v53, %v434_v52  ;;  %v471_v52 = vld [vmem:[#allocation3 + $0x9b0] sm:$0xff]  ;;  %v474_v53 = vld [vmem:[#allocation3 + $0x9c8] sm:$0xff] }
  0xf6   :  { %3038 = vmatpush1.bf16.msra.mxu0 %v3037_v0  ;;  %v439_v0 = vld [vmem:[#allocation3 + $0x8b0] sm:$0xff] }
  0xf7   :  { %3102 = vmatpush1.bf16.msra.mxu1 %v3101_v1  ;;  %3040 = vmatprep.subr.bf16.mxu0 %v3039_v3  ;;  %v442_v1 = vld [vmem:[#allocation3 + $0x8c8] sm:$0xff] }
  0xf8   :  { %3104 = vmatprep.subr.bf16.mxu1 %v3103_v7  ;;  %v446_v3 = vld [vmem:[#allocation3 + $0x8e8] sm:$0xff]  ;;  %v3185_v7 = vpack.c.bf16 %v439_v0, %v435_v61  ;;  %v475_v61 = vld [vmem:[#allocation3 + $0x9d0] sm:$0xff] }
  0xf9   :  { %v3123_v8 = vpack.c.bf16 %v446_v3, %v442_v1  ;;  %v479_v0 = vld [vmem:[#allocation3 + $0x9f0] sm:$0xff]  ;;  %v482_v1 = vld [vmem:[#allocation3 + $0xa08] sm:$0xff] }
  0xfa   :  { %3042 = vmatpush1.bf16.msra.mxu0 %v3041_v14  ;;  %v447_v14 = vld [vmem:[#allocation3 + $0x8f0] sm:$0xff]  ;;  %v486_v3 = vld [vmem:[#allocation3 + $0xa28] sm:$0xff] }
  0xfb   :  { %3106 = vmatpush1.bf16.msra.mxu1 %v3105_v17  ;;  %3044 = vmatprep.subr.bf16.mxu0 %v3043_v19  ;;  %v450_v17 = vld [vmem:[#allocation3 + $0x908] sm:$0xff]  ;;  %v3189_v22 = vpack.c.bf16 %v447_v14, %v443_v12  ;;  %v483_v12 = vld [vmem:[#allocation3 + $0xa10] sm:$0xff] }
  0xfc   :  { %3108 = vmatprep.subr.bf16.mxu1 %v3107_v24  ;;  %v454_v19 = vld [vmem:[#allocation3 + $0x928] sm:$0xff]  ;;  %v449_v24 = vld [vmem:[#allocation3 + $0x900] sm:$0xff]  ;;  %v487_v14 = vld [vmem:[#allocation3 + $0xa30] sm:$0xff] }
  0xfd   :  { %v3127_v23 = vpack.c.bf16 %v454_v19, %v450_v17  ;;  %v3129_v34 = vpack.c.bf16 %v453_v25, %v449_v24  ;;  %v490_v17 = vld [vmem:[#allocation3 + $0xa48] sm:$0xff]  ;;  %v489_v24 = vld [vmem:[#allocation3 + $0xa40] sm:$0xff] }
  0xfe   :  { %3046 = vmatpush1.bf16.msra.mxu0 %v3045_v31  ;;  %v462_v31 = vld [vmem:[#allocation3 + $0x968] sm:$0xff]  ;;  %v493_v25 = vld [vmem:[#allocation3 + $0xa60] sm:$0xff] }
  0xff   :  { %3110 = vmatpush1.bf16.msra.mxu1 %v3109_v32  ;;  %3112 = vmatprep.subr.bf16.mxu0 %v3111_v33  ;;  %v460_v32 = vld [vmem:[#allocation3 + $0x958] sm:$0xff]  ;;  %v3131_v36 = vpack.c.bf16 %v462_v31, %v458_v29  ;;  %v494_v19 = vld [vmem:[#allocation3 + $0xa68] sm:$0xff] }
 0x100   :  { %3176 = vmatprep.subr.bf16.mxu1 %v3175_v37  ;;  %v464_v33 = vld [vmem:[#allocation3 + $0x978] sm:$0xff]  ;;  %v457_v37 = vld [vmem:[#allocation3 + $0x940] sm:$0xff]  ;;  %v498_v29 = vld [vmem:[#allocation3 + $0xa88] sm:$0xff] }
 0x101   :  { %788 = vmatmul.mubr.f32.vlgmr.msra.gmra.mrb[0].mxu0 %v4044_v45  ;;  %v3195_v40 = vpack.c.bf16 %v464_v33, %v460_v32  ;;  %v502_v31 = vld [vmem:[#allocation3 + $0xaa8] sm:$0xff]  ;;  %v500_v32 = vld [vmem:[#allocation3 + $0xa98] sm:$0xff] }
 0x102   :  { %877 = vmatmul.mubr.f32.vlgmr.msra.gmra.mrb[0].mxu1 %v4044_v45  ;;  %3114 = vmatpush1.bf16.msra.mxu0 %v3113_v43  ;;  %v470_v43 = vld [vmem:[#allocation3 + $0x9a8] sm:$0xff]  ;;  %v504_v33 = vld [vmem:[#allocation3 + $0xab8] sm:$0xff] }
 0x103   :  { %3178 = vmatpush1.bf16.msra.mxu1 %v3177_v44  ;;  %3116 = vmatprep.subr.bf16.mxu0 %v3115_v46  ;;  %v472_v44 = vld [vmem:[#allocation3 + $0x9b8] sm:$0xff]  ;;  %v3197_v46 = vpack.c.bf16 %v463_v41, %v459_v39  ;;  %v3135_v47 = vpack.c.bf16 %v470_v43, %v466_v42  ;;  %v499_v39 = vld [vmem:[#allocation3 + $0xa90] sm:$0xff]  ;;  %v506_v42 = vld [vmem:[#allocation3 + $0xac8] sm:$0xff] }
 0x104   :  { %3180 = vmatprep.subr.bf16.mxu1 %v3179_v50  ;;  %793 = vmatprep.mubr.f32.mxu0 %v4198_v16  ;;  %v467_v50 = vld [vmem:[#allocation3 + $0x990] sm:$0xff]  ;;  %v510_v43 = vld [vmem:[#allocation3 + $0xae8] sm:$0xff] }
 0x105   :  { %882 = vmatprep.mubr.f32.mxu1 %v4198_v16  ;;  %794 = vmatmul.mubr.f32.gmra.mrb[2].mxu0 %v4205_v15  ;;  %v452_v16 = vld [vmem:[#allocation3 + $0x918] sm:$0xff]  ;;  %v503_v41 = vld [vmem:[#allocation3 + $0xab0] sm:$0xff] }
 0x106   :  { %3118 = vmatpush1.bf16.msra.mxu0 %v3117_v56  ;;  %883 = vmatmul.mubr.f32.gmra.mrb[2].mxu1 %v4205_v15  ;;  %v3125_v15 = vpack.c.bf16 %v445_v11, %v441_v10  ;;  %v3191_v27 = vpack.c.bf16 %v456_v20, %v452_v16  ;;  %v480_v56 = vld [vmem:[#allocation3 + $0x9f8] sm:$0xff]  ;;  %v481_v10 = vld [vmem:[#allocation3 + $0xa00] sm:$0xff] }
 0x107   :  { %3182 = vmatpush1.bf16.msra.mxu1 %v3181_v57  ;;  %3120 = vmatprep.subr.bf16.mxu0 %v3119_v58  ;;  %v3137_v57 = vpack.c.bf16 %v469_v49, %v465_v48  ;;  %v3139_v58 = vpack.c.bf16 %v478_v54, %v474_v53  ;;  %v485_v11 = vld [vmem:[#allocation3 + $0xa20] sm:$0xff]  ;;  %v492_v16 = vld [vmem:[#allocation3 + $0xa58] sm:$0xff]  ;;  %v514_v53 = vld [vmem:[#allocation3 + $0xb08] sm:$0xff] }
 0x108   :  { %3184 = vmatprep.subr.bf16.mxu1 %v3183_v62  ;;  %799 = vmatprep.mubr.f32.mxu0 %v4044_v45  ;;  %v3203_v62 = vpack.c.bf16 %v480_v56, %v476_v55  ;;  %v496_v20 = vld [vmem:[#allocation3 + $0xa78] sm:$0xff]  ;;  %v505_v48 = vld [vmem:[#allocation3 + $0xac0] sm:$0xff]  ;;  %v518_v54 = vld [vmem:[#allocation3 + $0xb28] sm:$0xff] }
 0x109   :  { %888 = vmatprep.mubr.f32.mxu1 %v4044_v45  ;;  %800 = vmatmul.mubr.f32.gmra.mrb[4].mxu0 %v4044_v45  ;;  %v509_v49 = vld [vmem:[#allocation3 + $0xae0] sm:$0xff]  ;;  %v516_v55 = vld [vmem:[#allocation3 + $0xb18] sm:$0xff] }
 0x10a   :  { %3122 = vmatpush1.bf16.msra.mxu0 %v3121_v6  ;;  %889 = vmatmul.mubr.f32.gmra.mrb[4].mxu1 %v4044_v45  ;;  %v3141_v6 = vpack.c.bf16 %v477_v60, %v473_v59  ;;  %v520_v56 = vld [vmem:[#allocation3 + $0xb38] sm:$0xff]  ;;  %v513_v59 = vld [vmem:[#allocation3 + $0xb00] sm:$0xff] }
 0x10b   :  { %3186 = vmatpush1.bf16.msra.mxu1 %v3185_v7  ;;  %3124 = vmatprep.subr.bf16.mxu0 %v3123_v8  ;;  %v3205_v7 = vpack.c.bf16 %v479_v0, %v475_v61  ;;  %v3143_v8 = vpack.c.bf16 %v486_v3, %v482_v1  ;;  %v517_v60 = vld [vmem:[#allocation3 + $0xb20] sm:$0xff]  ;;  %v515_v61 = vld [vmem:[#allocation3 + $0xb10] sm:$0xff]  ;;  %v522_v1 = vld [vmem:[#allocation3 + $0xb48] sm:$0xff] }
 0x10c   :  { %3188 = vmatprep.subr.bf16.mxu1 %v3187_v13  ;;  %805 = vmatprep.mubr.f32.mxu0 %v4225_v9  ;;  %v3207_v13 = vpack.c.bf16 %v488_v5, %v484_v4  ;;  %v519_v0 = vld [vmem:[#allocation3 + $0xb30] sm:$0xff]  ;;  %v526_v3 = vld [vmem:[#allocation3 + $0xb68] sm:$0xff]  ;;  %v524_v4 = vld [vmem:[#allocation3 + $0xb58] sm:$0xff] }
 0x10d   :  { %894 = vmatprep.mubr.f32.mxu1 %v4225_v9  ;;  %806 = vmatmul.mubr.f32.gmra.mrb[6].mxu0 %v4233_v18  ;;  %v468_v9 = vld [vmem:[#allocation3 + $0x998] sm:$0xff] }
 0x10e   :  { %3126 = vmatpush1.bf16.msra.mxu0 %v3125_v15  ;;  %895 = vmatmul.mubr.f32.gmra.mrb[6].mxu1 %v4233_v18  ;;  %v3133_v18 = vpack.c.bf16 %v461_v38, %v457_v37  ;;  %v3199_v51 = vpack.c.bf16 %v472_v44, %v468_v9  ;;  %v3145_v15 = vpack.c.bf16 %v485_v11, %v481_v10  ;;  %v497_v37 = vld [vmem:[#allocation3 + $0xa80] sm:$0xff]  ;;  %v508_v9 = vld [vmem:[#allocation3 + $0xad8] sm:$0xff] }
 0x10f   :  { %3190 = vmatpush1.bf16.msra.mxu1 %v3189_v22  ;;  %3128 = vmatprep.subr.bf16.mxu0 %v3127_v23  ;;  %v3209_v22 = vpack.c.bf16 %v487_v14, %v483_v12  ;;  %v3147_v23 = vpack.c.bf16 %v494_v19, %v490_v17  ;;  %v501_v38 = vld [vmem:[#allocation3 + $0xaa0] sm:$0xff]  ;;  %v512_v44 = vld [vmem:[#allocation3 + $0xaf8] sm:$0xff]  ;;  %v523_v12 = vld [vmem:[#allocation3 + $0xb50] sm:$0xff] }
 0x110   :  { %3192 = vmatprep.subr.bf16.mxu1 %v3191_v27  ;;  %965 = vmatprep.mubr.f32.mxu0 %v4212_v63  ;;  %v3211_v27 = vpack.c.bf16 %v496_v20, %v492_v16  ;;  %v528_v5 = vld [vmem:[#allocation3 + $0xb78] sm:$0xff]  ;;  %v521_v10 = vld [vmem:[#allocation3 + $0xb40] sm:$0xff]  ;;  %v527_v14 = vld [vmem:[#allocation3 + $0xb70] sm:$0xff] }
 0x111   :  { %1054 = vmatprep.mubr.f32.mxu1 %v4212_v63  ;;  %v3201_v63 = vpack.c.bf16 %v471_v52, %v467_v50  ;;  %v507_v50 = vld [vmem:[#allocation3 + $0xad0] sm:$0xff]  ;;  %v525_v11 = vld [vmem:[#allocation3 + $0xb60] sm:$0xff]  ;;  %v530_v17 = vld [vmem:[#allocation3 + $0xb88] sm:$0xff] }
 0x112   :  { %3130 = vmatpush1.bf16.msra.mxu0 %v3129_v34  ;;  %v3149_v34 = vpack.c.bf16 %v493_v25, %v489_v24  ;;  %v511_v52 = vld [vmem:[#allocation3 + $0xaf0] sm:$0xff]  ;;  %v534_v19 = vld [vmem:[#allocation3 + $0xba8] sm:$0xff]  ;;  %v532_v16 = vld [vmem:[#allocation3 + $0xb98] sm:$0xff] }
 0x113   :  { %3194 = vmatpush1.bf16.msra.mxu1 %v3193_v35  ;;  %3132 = vmatprep.subr.bf16.mxu0 %v3131_v36  ;;  %v3213_v35 = vpack.c.bf16 %v495_v28, %v491_v26  ;;  %v3151_v36 = vpack.c.bf16 %v502_v31, %v498_v29  ;;  %v536_v20 = vld [vmem:[#allocation3 + $0xbb8] sm:$0xff]  ;;  %v529_v24 = vld [vmem:[#allocation3 + $0xb80] sm:$0xff]  ;;  %v531_v26 = vld [vmem:[#allocation3 + $0xb90] sm:$0xff] }
 0x114   :  { %3196 = vmatprep.subr.bf16.mxu1 %v3195_v40  ;;  %v3215_v40 = vpack.c.bf16 %v504_v33, %v500_v32  ;;  %v533_v25 = vld [vmem:[#allocation3 + $0xba0] sm:$0xff]  ;;  %v535_v28 = vld [vmem:[#allocation3 + $0xbb0] sm:$0xff]  ;;  %v538_v29 = vld [vmem:[#allocation3 + $0xbc8] sm:$0xff] }
 0x115   :  { %v542_v31 = vld [vmem:[#allocation3 + $0xbe8] sm:$0xff]  ;;  %v540_v32 = vld [vmem:[#allocation3 + $0xbd8] sm:$0xff] }
 0x116   :  { %3134 = vmatpush1.bf16.msra.mxu0 %v3133_v18  ;;  %v3153_v18 = vpack.c.bf16 %v501_v38, %v497_v37  ;;  %v544_v33 = vld [vmem:[#allocation3 + $0xbf8] sm:$0xff]  ;;  %v537_v37 = vld [vmem:[#allocation3 + $0xbc0] sm:$0xff] }
 0x117   :  { %3198 = vmatpush1.bf16.msra.mxu1 %v3197_v46  ;;  %3136 = vmatprep.subr.bf16.mxu0 %v3135_v47  ;;  %v3217_v46 = vpack.c.bf16 %v503_v41, %v499_v39  ;;  %v3155_v47 = vpack.c.bf16 %v510_v43, %v506_v42  ;;  %v541_v38 = vld [vmem:[#allocation3 + $0xbe0] sm:$0xff]  ;;  %v3235_v39 = vpack.c.bf16 %v544_v33, %v540_v32  ;;  %v543_v41 = vld [vmem:[#allocation3 + $0xbf0] sm:$0xff]  ;;  %v1524_v32 = vld [vmem:[%s5303_s4 + $0x138] sm:$0xff] }
 0x118   :  { %3200 = vmatprep.subr.bf16.mxu1 %v3199_v51  ;;  %v3219_v51 = vpack.c.bf16 %v512_v44, %v508_v9  ;;  %v3173_v42 = vpack.c.bf16 %v541_v38, %v537_v37  ;;  %v1492_v44 = vld [vmem:[%s5303_s4 + $0x38] sm:$0xff]  ;;  %v1517_v33 = vld [vmem:[%s5303_s4 + $0x100] sm:$0xff]  ;;  %v1519_v37 = vld [vmem:[%s5303_s4 + $0x110] sm:$0xff] }
 0x119   :  { %v1523_v38 = vld [vmem:[%s5303_s4 + $0x130] sm:$0xff] }
 0x11a   :  { %3138 = vmatpush1.bf16.msra.mxu0 %v3137_v57  ;;  %v3157_v57 = vpack.c.bf16 %v509_v49, %v505_v48  ;;  %v1487_v48 = vld [vmem:[%s5303_s4 + $0x10] sm:$0xff] }
 0x11b   :  { %3202 = vmatpush1.bf16.msra.mxu1 %v3201_v63  ;;  %3140 = vmatprep.subr.bf16.mxu0 %v3139_v58  ;;  %v3221_v63 = vpack.c.bf16 %v511_v52, %v507_v50  ;;  %v3159_v58 = vpack.c.bf16 %v518_v54, %v514_v53  ;;  %v1491_v49 = vld [vmem:[%s5303_s4 + $0x30] sm:$0xff]  ;;  %v1498_v52 = vld [vmem:[%s5303_s4 + $0x68] sm:$0xff]  ;;  %v1496_v53 = vld [vmem:[%s5303_s4 + $0x58] sm:$0xff] }
 0x11c   :  { %3204 = vmatprep.subr.bf16.mxu1 %v3203_v62  ;;  %v3223_v62 = vpack.c.bf16 %v520_v56, %v516_v55  ;;  %v3369_v50 = vpack.c.bf16 %v1491_v49, %v1487_v48  ;;  %v1500_v55 = vld [vmem:[%s5303_s4 + $0x78] sm:$0xff]  ;;  %v1493_v56 = vld [vmem:[%s5303_s4 + $0x40] sm:$0xff]  ;;  %v1538_v48 = vld [vmem:[%s5303_s4 + $0x1a8] sm:$0xff] }
 0x11d   :  { %v1536_v49 = vld [vmem:[%s5303_s4 + $0x198] sm:$0xff] }
 0x11e   :  { %3142 = vmatpush1.bf16.msra.mxu0 %v3141_v6  ;;  %v3161_v6 = vpack.c.bf16 %v517_v60, %v513_v59  ;;  %v1495_v59 = vld [vmem:[%s5303_s4 + $0x50] sm:$0xff] }
 0x11f   :  { %3206 = vmatpush1.bf16.msra.mxu1 %v3205_v7  ;;  %3144 = vmatprep.subr.bf16.mxu0 %v3143_v8  ;;  %v3225_v7 = vpack.c.bf16 %v519_v0, %v515_v61  ;;  %v3163_v8 = vpack.c.bf16 %v526_v3, %v522_v1  ;;  %v1499_v60 = vld [vmem:[%s5303_s4 + $0x70] sm:$0xff]  ;;  %v1506_v0 = vld [vmem:[%s5303_s4 + $0xa8] sm:$0xff]  ;;  %v1504_v1 = vld [vmem:[%s5303_s4 + $0x98] sm:$0xff] }
 0x120   :  { %3208 = vmatprep.subr.bf16.mxu1 %v3207_v13  ;;  %v3227_v13 = vpack.c.bf16 %v528_v5, %v524_v4  ;;  %v3373_v61 = vpack.c.bf16 %v1499_v60, %v1495_v59  ;;  %v1508_v4 = vld [vmem:[%s5303_s4 + $0xb8] sm:$0xff]  ;;  %v1501_v5 = vld [vmem:[%s5303_s4 + $0x80] sm:$0xff]  ;;  %v1546_v59 = vld [vmem:[%s5303_s4 + $0x1e8] sm:$0xff] }
 0x121   :  { %v1544_v60 = vld [vmem:[%s5303_s4 + $0x1d8] sm:$0xff] }
 0x122   :  { %3146 = vmatpush1.bf16.msra.mxu0 %v3145_v15  ;;  %v3165_v15 = vpack.c.bf16 %v525_v11, %v521_v10  ;;  %v1503_v10 = vld [vmem:[%s5303_s4 + $0x90] sm:$0xff] }
 0x123   :  { %3210 = vmatpush1.bf16.msra.mxu1 %v3209_v22  ;;  %3148 = vmatprep.subr.bf16.mxu0 %v3147_v23  ;;  %v3229_v22 = vpack.c.bf16 %v527_v14, %v523_v12  ;;  %v3167_v23 = vpack.c.bf16 %v534_v19, %v530_v17  ;;  %v1507_v11 = vld [vmem:[%s5303_s4 + $0xb0] sm:$0xff]  ;;  %v1514_v14 = vld [vmem:[%s5303_s4 + $0xe8] sm:$0xff]  ;;  %v1512_v17 = vld [vmem:[%s5303_s4 + $0xd8] sm:$0xff] }
 0x124   :  { %3212 = vmatprep.subr.bf16.mxu1 %v3211_v27  ;;  %v3231_v27 = vpack.c.bf16 %v536_v20, %v532_v16  ;;  %v3377_v12 = vpack.c.bf16 %v1507_v11, %v1503_v10  ;;  %v1516_v16 = vld [vmem:[%s5303_s4 + $0xf8] sm:$0xff]  ;;  %v1509_v20 = vld [vmem:[%s5303_s4 + $0xc0] sm:$0xff]  ;;  %v1554_v10 = vld [vmem:[%s5303_s4 + $0x228] sm:$0xff] }
 0x125   :  { %v1552_v11 = vld [vmem:[%s5303_s4 + $0x218] sm:$0xff] }
 0x126   :  { %3150 = vmatpush1.bf16.msra.mxu0 %v3149_v34  ;;  %v3169_v34 = vpack.c.bf16 %v533_v25, %v529_v24  ;;  %v1511_v24 = vld [vmem:[%s5303_s4 + $0xd0] sm:$0xff] }
 0x127   :  { %3214 = vmatpush1.bf16.msra.mxu1 %v3213_v35  ;;  %3152 = vmatprep.subr.bf16.mxu0 %v3151_v36  ;;  %v3233_v35 = vpack.c.bf16 %v535_v28, %v531_v26  ;;  %v3171_v36 = vpack.c.bf16 %v542_v31, %v538_v29  ;;  %v1515_v25 = vld [vmem:[%s5303_s4 + $0xf0] sm:$0xff]  ;;  %v1522_v28 = vld [vmem:[%s5303_s4 + $0x128] sm:$0xff]  ;;  %v1520_v29 = vld [vmem:[%s5303_s4 + $0x118] sm:$0xff] }
 0x128   :  { %3216 = vmatprep.subr.bf16.mxu1 %v3215_v40  ;;  %v539_v40 = vld [vmem:[#allocation3 + $0xbd0] sm:$0xff]  ;;  %v3381_v26 = vpack.c.bf16 %v1515_v25, %v1511_v24  ;;  %v1562_v24 = vld [vmem:[%s5303_s4 + $0x268] sm:$0xff]  ;;  %v1560_v25 = vld [vmem:[%s5303_s4 + $0x258] sm:$0xff] }
 0x129   :  { %v3237_v43 = vpack.c.bf16 %v543_v41, %v539_v40  ;;  %v1526_v40 = vld [vmem:[%s5303_s4 + $0x148] sm:$0xff] }
 0x12a   :  { %3154 = vmatpush1.bf16.msra.mxu0 %v3153_v18  ;;  %v1489_v18 = vld [vmem:[%s5303_s4 + $0x20] sm:$0xff]  ;;  %v1530_v41 = vld [vmem:[%s5303_s4 + $0x168] sm:$0xff] }
 0x12b   :  { %3218 = vmatpush1.bf16.msra.mxu1 %v3217_v46  ;;  %3156 = vmatprep.subr.bf16.mxu0 %v3155_v47 }
 0x12c   :  { %3220 = vmatprep.subr.bf16.mxu1 %v3219_v51  ;;  %v1494_v51 = vld [vmem:[%s5303_s4 + $0x48] sm:$0xff] }
 0x12d   :  { %v3243_v54 = vpack.c.bf16 %v1498_v52, %v1494_v51  ;;  %v1540_v51 = vld [vmem:[%s5303_s4 + $0x1b8] sm:$0xff]  ;;  %v1533_v52 = vld [vmem:[%s5303_s4 + $0x180] sm:$0xff] }
 0x12e   :  { %3158 = vmatpush1.bf16.msra.mxu0 %v3157_v57  ;;  %v1497_v57 = vld [vmem:[%s5303_s4 + $0x60] sm:$0xff] }
 0x12f   :  { %3222 = vmatpush1.bf16.msra.mxu1 %v3221_v63  ;;  %3160 = vmatprep.subr.bf16.mxu0 %v3159_v58  ;;  %v3371_v63 = vpack.c.bf16 %v1500_v55, %v1496_v53  ;;  %v3245_v58 = vpack.c.bf16 %v1497_v57, %v1493_v56  ;;  %v1537_v53 = vld [vmem:[%s5303_s4 + $0x1a0] sm:$0xff]  ;;  %v1535_v56 = vld [vmem:[%s5303_s4 + $0x190] sm:$0xff] }
 0x130   :  { %3224 = vmatprep.subr.bf16.mxu1 %v3223_v62  ;;  %v1502_v62 = vld [vmem:[%s5303_s4 + $0x88] sm:$0xff]  ;;  %v3265_v55 = vpack.c.bf16 %v1537_v53, %v1533_v52  ;;  %v1539_v57 = vld [vmem:[%s5303_s4 + $0x1b0] sm:$0xff] }
 0x131   :  { %v3247_v3 = vpack.c.bf16 %v1506_v0, %v1502_v62  ;;  %v1548_v62 = vld [vmem:[%s5303_s4 + $0x1f8] sm:$0xff]  ;;  %v1541_v0 = vld [vmem:[%s5303_s4 + $0x1c0] sm:$0xff]  ;;  %v1575_v52 = vld [vmem:[%s5303_s4 + $0x2d0] sm:$0xff] }
 0x132   :  { %3162 = vmatpush1.bf16.msra.mxu0 %v3161_v6  ;;  %v1505_v6 = vld [vmem:[%s5303_s4 + $0xa0] sm:$0xff]  ;;  %v1579_v53 = vld [vmem:[%s5303_s4 + $0x2f0] sm:$0xff] }
 0x133   :  { %3226 = vmatpush1.bf16.msra.mxu1 %v3225_v7  ;;  %3164 = vmatprep.subr.bf16.mxu0 %v3163_v8  ;;  %v3375_v7 = vpack.c.bf16 %v1508_v4, %v1504_v1  ;;  %v3249_v8 = vpack.c.bf16 %v1505_v6, %v1501_v5  ;;  %v1545_v1 = vld [vmem:[%s5303_s4 + $0x1e0] sm:$0xff]  ;;  %v1543_v5 = vld [vmem:[%s5303_s4 + $0x1d0] sm:$0xff] }
 0x134   :  { %3228 = vmatprep.subr.bf16.mxu1 %v3227_v13  ;;  %v1510_v13 = vld [vmem:[%s5303_s4 + $0xc8] sm:$0xff]  ;;  %v3269_v4 = vpack.c.bf16 %v1545_v1, %v1541_v0  ;;  %v1547_v6 = vld [vmem:[%s5303_s4 + $0x1f0] sm:$0xff] }
 0x135   :  { %v3251_v19 = vpack.c.bf16 %v1514_v14, %v1510_v13  ;;  %v1556_v13 = vld [vmem:[%s5303_s4 + $0x238] sm:$0xff]  ;;  %v1549_v14 = vld [vmem:[%s5303_s4 + $0x200] sm:$0xff]  ;;  %v1583_v0 = vld [vmem:[%s5303_s4 + $0x310] sm:$0xff] }
 0x136   :  { %3166 = vmatpush1.bf16.msra.mxu0 %v3165_v15  ;;  %v1513_v15 = vld [vmem:[%s5303_s4 + $0xe0] sm:$0xff]  ;;  %v1587_v1 = vld [vmem:[%s5303_s4 + $0x330] sm:$0xff] }
 0x137   :  { %3230 = vmatpush1.bf16.msra.mxu1 %v3229_v22  ;;  %3168 = vmatprep.subr.bf16.mxu0 %v3167_v23  ;;  %v3379_v22 = vpack.c.bf16 %v1516_v16, %v1512_v17  ;;  %v3253_v23 = vpack.c.bf16 %v1513_v15, %v1509_v20  ;;  %v1553_v17 = vld [vmem:[%s5303_s4 + $0x220] sm:$0xff]  ;;  %v1551_v20 = vld [vmem:[%s5303_s4 + $0x210] sm:$0xff] }
 0x138   :  { %3232 = vmatprep.subr.bf16.mxu1 %v3231_v27  ;;  %v1518_v27 = vld [vmem:[%s5303_s4 + $0x108] sm:$0xff]  ;;  %v3273_v16 = vpack.c.bf16 %v1553_v17, %v1549_v14  ;;  %v1555_v15 = vld [vmem:[%s5303_s4 + $0x230] sm:$0xff] }
 0x139   :  { %v3255_v31 = vpack.c.bf16 %v1522_v28, %v1518_v27  ;;  %v1564_v27 = vld [vmem:[%s5303_s4 + $0x278] sm:$0xff]  ;;  %v1557_v28 = vld [vmem:[%s5303_s4 + $0x240] sm:$0xff]  ;;  %v1591_v14 = vld [vmem:[%s5303_s4 + $0x350] sm:$0xff] }
 0x13a   :  { %3170 = vmatpush1.bf16.msra.mxu0 %v3169_v34  ;;  %v1521_v34 = vld [vmem:[%s5303_s4 + $0x120] sm:$0xff]  ;;  %v1595_v17 = vld [vmem:[%s5303_s4 + $0x370] sm:$0xff] }
 0x13b   :  { %3234 = vmatpush1.bf16.msra.mxu1 %v3233_v35  ;;  %3172 = vmatprep.subr.bf16.mxu0 %v3171_v36  ;;  %v3383_v35 = vpack.c.bf16 %v1524_v32, %v1520_v29  ;;  %v3257_v36 = vpack.c.bf16 %v1521_v34, %v1517_v33  ;;  %v1561_v29 = vld [vmem:[%s5303_s4 + $0x260] sm:$0xff]  ;;  %v1559_v33 = vld [vmem:[%s5303_s4 + $0x250] sm:$0xff] }
 0x13c   :  { %3236 = vmatprep.subr.bf16.mxu1 %v3235_v39  ;;  %v3385_v39 = vpack.c.bf16 %v1523_v38, %v1519_v37  ;;  %v3277_v32 = vpack.c.bf16 %v1561_v29, %v1557_v28  ;;  %v1563_v34 = vld [vmem:[%s5303_s4 + $0x270] sm:$0xff]  ;;  %v1570_v37 = vld [vmem:[%s5303_s4 + $0x2a8] sm:$0xff]  ;;  %v1568_v38 = vld [vmem:[%s5303_s4 + $0x298] sm:$0xff] }
 0x13d   :  { %v1603_v29 = vld [vmem:[%s5303_s4 + $0x3b0] sm:$0xff] }
 0x13e   :  { %3174 = vmatpush1.bf16.msra.mxu0 %v3173_v42  ;;  %v1528_v42 = vld [vmem:[%s5303_s4 + $0x158] sm:$0xff] }
 0x13f   :  { %3238 = vmatpush1.bf16.msra.mxu1 %v3237_v43  ;;  %v1532_v43 = vld [vmem:[%s5303_s4 + $0x178] sm:$0xff] }
 0x141   :  { %966 = vmatmul.mubr.f32.vlgmr.msra.gmra.mrb[0].mxu0 %v4219_v2 }
 0x142   :  { %1055 = vmatmul.mubr.f32.vlgmr.msra.gmra.mrb[0].mxu1 %v4219_v2  ;;  %971 = vmatprep.mubr.f32.mxu0 %v4044_v45  ;;  %v1486_v2 = vld [vmem:[%s5303_s4 + $0x8] sm:$0xff] }
 0x143   :  { %1060 = vmatprep.mubr.f32.mxu1 %v4044_v45 }
 0x145   :  { %972 = vmatmul.mubr.f32.gmra.mrb[2].mxu0 %v4044_v45 }
 0x146   :  { %1061 = vmatmul.mubr.f32.gmra.mrb[2].mxu1 %v4044_v45  ;;  %977 = vmatprep.mubr.f32.mxu0 %v4239_v21 }
 0x147   :  { %1066 = vmatprep.mubr.f32.mxu1 %v4239_v21  ;;  %v1490_v21 = vld [vmem:[%s5303_s4 + $0x28] sm:$0xff] }
 0x148   :  { %v3239_v9 = vpack.c.bf16 %v1490_v21, %v1486_v2  ;;  %v3259_v2 = vpack.c.bf16 %v1530_v41, %v1526_v40  ;;  %v3387_v21 = vpack.c.bf16 %v1532_v43, %v1528_v42  ;;  %v1572_v40 = vld [vmem:[%s5303_s4 + $0x2b8] sm:$0xff]  ;;  %v1565_v41 = vld [vmem:[%s5303_s4 + $0x280] sm:$0xff] }
 0x149   :  { %978 = vmatmul.mubr.f32.gmra.mrb[4].mxu0 %v4245_v30  ;;  %v1569_v42 = vld [vmem:[%s5303_s4 + $0x2a0] sm:$0xff]  ;;  %v3407_v43 = vpack.c.bf16 %v1572_v40, %v1568_v38  ;;  %v1607_v40 = vld [vmem:[%s5303_s4 + $0x3d0] sm:$0xff] }
 0x14a   :  { %1067 = vmatmul.mubr.f32.gmra.mrb[4].mxu1 %v4245_v30  ;;  %983 = vmatprep.mubr.f32.mxu0 %v4044_v45  ;;  %v1488_v30 = vld [vmem:[%s5303_s4 + $0x18] sm:$0xff] }
 0x14b   :  { %1072 = vmatprep.mubr.f32.mxu1 %v4044_v45  ;;  %v3367_v46 = vpack.c.bf16 %v1492_v44, %v1488_v30  ;;  %3240 = vmatprep.subr.bf16.mxu0 %v3239_v9  ;;  %v1525_v30 = vld [vmem:[%s5303_s4 + $0x140] sm:$0xff]  ;;  %v1527_v44 = vld [vmem:[%s5303_s4 + $0x150] sm:$0xff] }
 0x14c   :  { %v1529_v9 = vld [vmem:[%s5303_s4 + $0x160] sm:$0xff] }
 0x14d   :  { %984 = vmatmul.mubr.f32.gmra.mrb[6].mxu0 %v4044_v45  ;;  %3368 = vmatprep.subr.bf16.mxu1 %v3367_v46 }
 0x14e   :  { %1073 = vmatmul.mubr.f32.gmra.mrb[6].mxu1 %v4044_v45  ;;  %v1485_v45 = vld [vmem:[%s5303_s4] sm:$0xff] }
 0x14f   :  { %v3241_v47 = vpack.c.bf16 %v1489_v18, %v1485_v45  ;;  %3370 = vmatpush1.bf16.msra.mxu1 %v3369_v50  ;;  %v3261_v45 = vpack.c.bf16 %v1529_v9, %v1525_v30  ;;  %v1531_v18 = vld [vmem:[%s5303_s4 + $0x170] sm:$0xff] }
 0x150   :  { %3372 = vmatprep.subr.bf16.mxu1 %v3371_v63  ;;  %v3389_v46 = vpack.c.bf16 %v1531_v18, %v1527_v44  ;;  %v3393_v63 = vpack.c.bf16 %v1539_v57, %v1535_v56  ;;  %v1571_v30 = vld [vmem:[%s5303_s4 + $0x2b0] sm:$0xff]  ;;  %v1574_v44 = vld [vmem:[%s5303_s4 + $0x2c8] sm:$0xff]  ;;  %v1576_v18 = vld [vmem:[%s5303_s4 + $0x2d8] sm:$0xff] }
 0x151   :  { %3242 = vmatpush1.bf16.msra.mxu0 %v3241_v47  ;;  %v1534_v47 = vld [vmem:[%s5303_s4 + $0x188] sm:$0xff]  ;;  %v1584_v57 = vld [vmem:[%s5303_s4 + $0x318] sm:$0xff] }
 0x152   :  { %3244 = vmatprep.subr.bf16.mxu0 %v3243_v54  ;;  %v3263_v50 = vpack.c.bf16 %v1538_v48, %v1534_v47  ;;  %v3391_v54 = vpack.c.bf16 %v1540_v51, %v1536_v49  ;;  %v1580_v47 = vld [vmem:[%s5303_s4 + $0x2f8] sm:$0xff]  ;;  %v1573_v48 = vld [vmem:[%s5303_s4 + $0x2c0] sm:$0xff]  ;;  %v1586_v56 = vld [vmem:[%s5303_s4 + $0x328] sm:$0xff] }
 0x153   :  { %3374 = vmatpush1.bf16.msra.mxu1 %v3373_v61  ;;  %v1577_v49 = vld [vmem:[%s5303_s4 + $0x2e0] sm:$0xff] }
 0x154   :  { %3376 = vmatprep.subr.bf16.mxu1 %v3375_v7  ;;  %v3397_v7 = vpack.c.bf16 %v1547_v6, %v1543_v5  ;;  %v3285_v51 = vpack.c.bf16 %v1577_v49, %v1573_v48  ;;  %v1594_v5 = vld [vmem:[%s5303_s4 + $0x368] sm:$0xff]  ;;  %v1592_v6 = vld [vmem:[%s5303_s4 + $0x358] sm:$0xff] }
 0x155   :  { %3246 = vmatpush1.bf16.msra.mxu0 %v3245_v58  ;;  %v1542_v58 = vld [vmem:[%s5303_s4 + $0x1c8] sm:$0xff] }
 0x156   :  { %3248 = vmatprep.subr.bf16.mxu0 %v3247_v3  ;;  %v3267_v61 = vpack.c.bf16 %v1546_v59, %v1542_v58  ;;  %v3395_v3 = vpack.c.bf16 %v1548_v62, %v1544_v60  ;;  %v1588_v58 = vld [vmem:[%s5303_s4 + $0x338] sm:$0xff]  ;;  %v1581_v59 = vld [vmem:[%s5303_s4 + $0x300] sm:$0xff] }
 0x157   :  { %3378 = vmatpush1.bf16.msra.mxu1 %v3377_v12  ;;  %v1585_v60 = vld [vmem:[%s5303_s4 + $0x320] sm:$0xff] }
 0x158   :  { %3380 = vmatprep.subr.bf16.mxu1 %v3379_v22  ;;  %v3401_v22 = vpack.c.bf16 %v1555_v15, %v1551_v20  ;;  %v3289_v62 = vpack.c.bf16 %v1585_v60, %v1581_v59  ;;  %v1602_v20 = vld [vmem:[%s5303_s4 + $0x3a8] sm:$0xff]  ;;  %v1600_v15 = vld [vmem:[%s5303_s4 + $0x398] sm:$0xff] }
 0x159   :  { %3250 = vmatpush1.bf16.msra.mxu0 %v3249_v8  ;;  %v1550_v8 = vld [vmem:[%s5303_s4 + $0x208] sm:$0xff] }
 0x15a   :  { %3252 = vmatprep.subr.bf16.mxu0 %v3251_v19  ;;  %v3271_v12 = vpack.c.bf16 %v1554_v10, %v1550_v8  ;;  %v3399_v19 = vpack.c.bf16 %v1556_v13, %v1552_v11  ;;  %v1596_v8 = vld [vmem:[%s5303_s4 + $0x378] sm:$0xff]  ;;  %v1589_v10 = vld [vmem:[%s5303_s4 + $0x340] sm:$0xff] }
 0x15b   :  { %3382 = vmatpush1.bf16.msra.mxu1 %v3381_v26  ;;  %v1593_v11 = vld [vmem:[%s5303_s4 + $0x360] sm:$0xff] }
 0x15c   :  { %3384 = vmatprep.subr.bf16.mxu1 %v3383_v35  ;;  %v3405_v35 = vpack.c.bf16 %v1563_v34, %v1559_v33  ;;  %v3293_v13 = vpack.c.bf16 %v1593_v11, %v1589_v10 }
 0x15d   :  { %3254 = vmatpush1.bf16.msra.mxu0 %v3253_v23  ;;  %v1558_v23 = vld [vmem:[%s5303_s4 + $0x248] sm:$0xff] }
 0x15e   :  { %3256 = vmatprep.subr.bf16.mxu0 %v3255_v31  ;;  %v3275_v26 = vpack.c.bf16 %v1562_v24, %v1558_v23  ;;  %v3403_v31 = vpack.c.bf16 %v1564_v27, %v1560_v25  ;;  %v1597_v25 = vld [vmem:[%s5303_s4 + $0x380] sm:$0xff]  ;;  %v1599_v27 = vld [vmem:[%s5303_s4 + $0x390] sm:$0xff] }
 0x15f   :  { %3386 = vmatpush1.bf16.msra.mxu1 %v3385_v39  ;;  %v3425_v33 = vpack.c.bf16 %v1603_v29, %v1599_v27 }
 0x160   :  { %3388 = vmatprep.subr.bf16.mxu1 %v3387_v21  ;;  %v1567_v21 = vld [vmem:[%s5303_s4 + $0x290] sm:$0xff] }
 0x161   :  { %3258 = vmatpush1.bf16.msra.mxu0 %v3257_v36  ;;  %v1566_v36 = vld [vmem:[%s5303_s4 + $0x288] sm:$0xff]  ;;  %v3409_v9 = vpack.c.bf16 %v1571_v30, %v1567_v21  ;;  %v1616_v30 = vld [vmem:[%s5303_s4 + $0x418] sm:$0xff] }
 0x162   :  { %3260 = vmatprep.subr.bf16.mxu0 %v3259_v2  ;;  %v3279_v39 = vpack.c.bf16 %v1570_v37, %v1566_v36  ;;  %v3281_v2 = vpack.c.bf16 %v1569_v42, %v1565_v41  ;;  %v1612_v36 = vld [vmem:[%s5303_s4 + $0x3f8] sm:$0xff]  ;;  %v1605_v37 = vld [vmem:[%s5303_s4 + $0x3c0] sm:$0xff]  ;;  %v1611_v41 = vld [vmem:[%s5303_s4 + $0x3f0] sm:$0xff] }
 0x163   :  { %3390 = vmatpush1.bf16.msra.mxu1 %v3389_v46  ;;  %v1618_v21 = vld [vmem:[%s5303_s4 + $0x428] sm:$0xff] }
 0x164   :  { %3392 = vmatprep.subr.bf16.mxu1 %v3391_v54  ;;  %v3413_v54 = vpack.c.bf16 %v1579_v53, %v1575_v52 }
 0x165   :  { %3262 = vmatpush1.bf16.msra.mxu0 %v3261_v45  ;;  %v1578_v45 = vld [vmem:[%s5303_s4 + $0x2e8] sm:$0xff] }
 0x166   :  { %3264 = vmatprep.subr.bf16.mxu0 %v3263_v50  ;;  %v3283_v46 = vpack.c.bf16 %v1578_v45, %v1574_v44  ;;  %v3411_v50 = vpack.c.bf16 %v1580_v47, %v1576_v18  ;;  %v1620_v44 = vld [vmem:[%s5303_s4 + $0x438] sm:$0xff] }
 0x167   :  { %3394 = vmatpush1.bf16.msra.mxu1 %v3393_v63  ;;  %v3431_v45 = vpack.c.bf16 %v1620_v44, %v1616_v30 }
 0x168   :  { %3396 = vmatprep.subr.bf16.mxu1 %v3395_v3  ;;  %v3417_v3 = vpack.c.bf16 %v1587_v1, %v1583_v0 }
 0x169   :  { %3266 = vmatpush1.bf16.msra.mxu0 %v3265_v55  ;;  %v1582_v55 = vld [vmem:[%s5303_s4 + $0x308] sm:$0xff] }
 0x16a   :  { %3268 = vmatprep.subr.bf16.mxu0 %v3267_v61  ;;  %v3287_v63 = vpack.c.bf16 %v1586_v56, %v1582_v55  ;;  %v3415_v61 = vpack.c.bf16 %v1588_v58, %v1584_v57 }
 0x16b   :  { %3398 = vmatpush1.bf16.msra.mxu1 %v3397_v7 }
 0x16c   :  { %3400 = vmatprep.subr.bf16.mxu1 %v3399_v19  ;;  %v1598_v19 = vld [vmem:[%s5303_s4 + $0x388] sm:$0xff] }
 0x16d   :  { %3270 = vmatpush1.bf16.msra.mxu0 %v3269_v4  ;;  %v1590_v4 = vld [vmem:[%s5303_s4 + $0x348] sm:$0xff]  ;;  %v3295_v23 = vpack.c.bf16 %v1602_v20, %v1598_v19 }
 0x16e   :  { %3272 = vmatprep.subr.bf16.mxu0 %v3271_v12  ;;  %v3291_v7 = vpack.c.bf16 %v1594_v5, %v1590_v4  ;;  %v3419_v12 = vpack.c.bf16 %v1596_v8, %v1592_v6 }
 0x16f   :  { %3402 = vmatpush1.bf16.msra.mxu1 %v3401_v22  ;;  %v1604_v22 = vld [vmem:[%s5303_s4 + $0x3b8] sm:$0xff] }
 0x170   :  { %3404 = vmatprep.subr.bf16.mxu1 %v3403_v31  ;;  %v3423_v24 = vpack.c.bf16 %v1604_v22, %v1600_v15  ;;  %v1606_v31 = vld [vmem:[%s5303_s4 + $0x3c8] sm:$0xff] }
 0x171   :  { %3274 = vmatpush1.bf16.msra.mxu0 %v3273_v16  ;;  %v3421_v16 = vpack.c.bf16 %v1595_v17, %v1591_v14 }
 0x172   :  { %3276 = vmatprep.subr.bf16.mxu0 %v3275_v26  ;;  %v1601_v26 = vld [vmem:[%s5303_s4 + $0x3a0] sm:$0xff] }
 0x173   :  { %3406 = vmatpush1.bf16.msra.mxu1 %v3405_v35  ;;  %v3297_v28 = vpack.c.bf16 %v1601_v26, %v1597_v25  ;;  %v1608_v35 = vld [vmem:[%s5303_s4 + $0x3d8] sm:$0xff] }
 0x174   :  { %3408 = vmatprep.subr.bf16.mxu1 %v3407_v43  ;;  %v3427_v38 = vpack.c.bf16 %v1612_v36, %v1608_v35  ;;  %v3429_v43 = vpack.c.bf16 %v1611_v41, %v1607_v40 }
 0x175   :  { %3278 = vmatpush1.bf16.msra.mxu0 %v3277_v32  ;;  %v1610_v32 = vld [vmem:[%s5303_s4 + $0x3e8] sm:$0xff] }
 0x176   :  { %3280 = vmatprep.subr.bf16.mxu0 %v3279_v39  ;;  %v3299_v34 = vpack.c.bf16 %v1610_v32, %v1606_v31  ;;  %v1609_v39 = vld [vmem:[%s5303_s4 + $0x3e0] sm:$0xff] }
 0x177   :  { %3410 = vmatpush1.bf16.msra.mxu1 %v3409_v9  ;;  %v3301_v42 = vpack.c.bf16 %v1609_v39, %v1605_v37 }
 0x178   :  { %3412 = vmatprep.subr.bf16.mxu1 %v3411_v50 }
 0x179   :  { %3282 = vmatpush1.bf16.msra.mxu0 %v3281_v2  ;;  %v1614_v2 = vld [vmem:[%s5303_s4 + $0x408] sm:$0xff] }
 0x17a   :  { %3284 = vmatprep.subr.bf16.mxu0 %v3283_v46  ;;  %v3303_v9 = vpack.c.bf16 %v1618_v21, %v1614_v2 }
 0x17b   :  { %3414 = vmatpush1.bf16.msra.mxu1 %v3413_v54 }
 0x17c   :  { %3416 = vmatprep.subr.bf16.mxu1 %v3415_v61 }
 0x17d   :  { %3286 = vmatpush1.bf16.msra.mxu0 %v3285_v51 }
 0x17e   :  { %3288 = vmatprep.subr.bf16.mxu0 %v3287_v63 }
 0x17f   :  { %3418 = vmatpush1.bf16.msra.mxu1 %v3417_v3 }
 0x180   :  { %3420 = vmatprep.subr.bf16.mxu1 %v3419_v12 }
 0x181   :  { %3290 = vmatpush1.bf16.msra.mxu0 %v3289_v62 }
 0x182   :  { %3292 = vmatprep.subr.bf16.mxu0 %v3291_v7 }
 0x183   :  { %3422 = vmatpush1.bf16.msra.mxu1 %v3421_v16 }
 0x184   :  { %3424 = vmatprep.subr.bf16.mxu1 %v3423_v24 }
 0x185   :  { %3294 = vmatpush1.bf16.msra.mxu0 %v3293_v13 }
 0x186   :  { %3296 = vmatprep.subr.bf16.mxu0 %v3295_v23 }
 0x187   :  { %3426 = vmatpush1.bf16.msra.mxu1 %v3425_v33 }
 0x188   :  { %3428 = vmatprep.subr.bf16.mxu1 %v3427_v38 }
 0x189   :  { %3298 = vmatpush1.bf16.msra.mxu0 %v3297_v28 }
 0x18a   :  { %3300 = vmatprep.subr.bf16.mxu0 %v3299_v34 }
 0x18b   :  { %3430 = vmatpush1.bf16.msra.mxu1 %v3429_v43 }
 0x18c   :  { %3432 = vmatprep.subr.bf16.mxu1 %v3431_v45 }
 0x18d   :  { %3302 = vmatpush1.bf16.msra.mxu0 %v3301_v42 }
 0x18e   :  { %3304 = vmatprep.subr.bf16.mxu0 %v3303_v9 }
 0x214   :  { %v4679_v18 = vpop.f32.mrb[0].mxu0 }
 0x215   :  { %v4681_v46 = vpop.f32.mrb[0].mxu1  ;;  %v4683_v47 = vpop.f32.mrb[1].mxu0  ;;  %v1133_v49 = vmul.f32 %v4679_v18, %v4679_v18 }
 0x216   :  { %v4685_v48 = vpop.f32.mrb[1].mxu1  ;;  %v1135_v51 = vmul.f32 %v4681_v46, %v4681_v46  ;;  %v1134_v52 = vmul.f32 %v4683_v47, %v4683_v47 }
 0x217   :  { %v1136_v61 = vmul.f32 %v4685_v48, %v4685_v48 }
 0x218   :  { %v4689_v50 = vpop.f32.mrb[2].mxu0 }
 0x219   :  { %v1097_v53 = vadd.f32 %v4689_v50, %v4679_v18  ;;  %v1137_v54 = vmul.f32 %v4689_v50, %v4689_v50  ;;  %v4699_v55 = vpop.f32.mrb[2].mxu1  ;;  %v4701_v56 = vpop.f32.mrb[3].mxu0 }
 0x21a   :  { %v1115_v57 = vadd.f32 %v4699_v55, %v4681_v46  ;;  %v1139_v63 = vmul.f32 %v4699_v55, %v4699_v55  ;;  %v1106_v58 = vadd.f32 %v4701_v56, %v4683_v47  ;;  %v1138_v59 = vmul.f32 %v4701_v56, %v4701_v56  ;;  %v4711_v60 = vpop.f32.mrb[3].mxu1 }
 0x21b   :  { %v1149_v62 = vadd.f32 %v1137_v54, %v1133_v49  ;;  %v1124_v0 = vadd.f32 %v4711_v60, %v4685_v48  ;;  %v1140_v1 = vmul.f32 %v4711_v60, %v4711_v60 }
 0x21c   :  { %v1167_v3 = vadd.f32 %v1139_v63, %v1135_v51  ;;  %v1158_v4 = vadd.f32 %v1138_v59, %v1134_v52  ;;  %v4719_v5 = vpop.f32.mrb[4].mxu0 }
 0x21d   :  { %v1176_v6 = vadd.f32 %v1140_v1, %v1136_v61  ;;  %v1098_v7 = vadd.f32 %v1097_v53, %v4719_v5  ;;  %v1141_v8 = vmul.f32 %v4719_v5, %v4719_v5  ;;  %v4724_v10 = vpop.f32.mrb[4].mxu1  ;;  %v4726_v11 = vpop.f32.mrb[5].mxu0 }
 0x21e   :  { %v1116_v12 = vadd.f32 %v1115_v57, %v4724_v10  ;;  %v1143_v13 = vmul.f32 %v4724_v10, %v4724_v10  ;;  %v1107_v14 = vadd.f32 %v1106_v58, %v4726_v11  ;;  %v1142_v17 = vmul.f32 %v4726_v11, %v4726_v11  ;;  %v4734_v19 = vpop.f32.mrb[5].mxu1 }
 0x21f   :  { %v1150_v16 = vadd.f32 %v1149_v62, %v1141_v8  ;;  %v1125_v20 = vadd.f32 %v1124_v0, %v4734_v19  ;;  %v1144_v15 = vmul.f32 %v4734_v19, %v4734_v19 }
 0x220   :  { %v1168_v22 = vadd.f32 %v1167_v3, %v1143_v13  ;;  %v1159_v23 = vadd.f32 %v1158_v4, %v1142_v17  ;;  %v4739_v24 = vpop.f32.mrb[6].mxu0 }
 0x221   :  { %v1177_v25 = vadd.f32 %v1176_v6, %v1144_v15  ;;  %v1099_v26 = vadd.f32 %v1098_v7, %v4739_v24  ;;  %v1145_v27 = vmul.f32 %v4739_v24, %v4739_v24  ;;  %v4744_v28 = vpop.f32.mrb[6].mxu1  ;;  %v4746_v29 = vpop.f32.mrb[7].mxu0 }
 0x222   :  { %v1117_v31 = vadd.f32 %v1116_v12, %v4744_v28  ;;  %v1147_v32 = vmul.f32 %v4744_v28, %v4744_v28  ;;  %v1108_v33 = vadd.f32 %v1107_v14, %v4746_v29  ;;  %v1146_v34 = vmul.f32 %v4746_v29, %v4746_v29  ;;  %v4754_v35 = vpop.f32.mrb[7].mxu1 }
 0x223   :  { %v1100_v36 = vrot.slane %v1099_v26, 4  ;;  %v1151_v37 = vadd.f32 %v1150_v16, %v1145_v27  ;;  %v1126_v38 = vadd.f32 %v1125_v20, %v4754_v35  ;;  %v1148_v39 = vmul.f32 %v4754_v35, %v4754_v35 }
 0x224   :  { %v1118_v40 = vrot.slane %v1117_v31, 4  ;;  %v1169_v41 = vadd.f32 %v1168_v22, %v1147_v32  ;;  %v1109_v42 = vrot.slane %v1108_v33, 4  ;;  %v1160_v43 = vadd.f32 %v1159_v23, %v1146_v34 }
 0x225   :  { %v1101_v2 = vadd.f32 %v1100_v36, %v1099_v26  ;;  %v1152_v21 = vrot.slane %v1151_v37, 4  ;;  %v1127_v30 = vrot.slane %v1126_v38, 4  ;;  %v1178_v9 = vadd.f32 %v1177_v25, %v1148_v39 }
 0x226   :  { %v1119_v44 = vadd.f32 %v1118_v40, %v1117_v31  ;;  %v1170_v45 = vrot.slane %v1169_v41, 4  ;;  %v1110_v49 = vadd.f32 %v1109_v42, %v1108_v33  ;;  %v1161_v51 = vrot.slane %v1160_v43, 4 }
 0x227   :  { %v1102_v52 = vrot.slane %v1101_v2, 2  ;;  %v1153_v53 = vadd.f32 %v1152_v21, %v1151_v37  ;;  %v1128_v54 = vadd.f32 %v1127_v30, %v1126_v38  ;;  %v1179_v57 = vrot.slane %v1178_v9, 4 }
 0x228   :  { %v1120_v63 = vrot.slane %v1119_v44, 2  ;;  %v1171_v58 = vadd.f32 %v1170_v45, %v1169_v41  ;;  %v1111_v59 = vrot.slane %v1110_v49, 2  ;;  %v1162_v61 = vadd.f32 %v1161_v51, %v1160_v43 }
 0x229   :  { %v1103_v62 = vadd.f32 %v1102_v52, %v1101_v2  ;;  %v1154_v0 = vrot.slane %v1153_v53, 2  ;;  %v1129_v1 = vrot.slane %v1128_v54, 2  ;;  %v1180_v3 = vadd.f32 %v1179_v57, %v1178_v9 }
 0x22a   :  { %v1121_v4 = vadd.f32 %v1120_v63, %v1119_v44  ;;  %v1172_v6 = vrot.slane %v1171_v58, 2  ;;  %v1112_v7 = vadd.f32 %v1111_v59, %v1110_v49  ;;  %v1163_v8 = vrot.slane %v1162_v61, 2 }
 0x22b   :  { %v1104_v12 = vrot.slane %v1103_v62, 1  ;;  %v1155_v13 = vadd.f32 %v1154_v0, %v1153_v53  ;;  %v1130_v14 = vadd.f32 %v1129_v1, %v1128_v54  ;;  %v1181_v17 = vrot.slane %v1180_v3, 2 }
 0x22c   :  { %v1122_v16 = vrot.slane %v1121_v4, 1  ;;  %v1173_v20 = vadd.f32 %v1172_v6, %v1171_v58  ;;  %v1113_v15 = vrot.slane %v1112_v7, 1  ;;  %v1164_v22 = vadd.f32 %v1163_v8, %v1162_v61 }
 0x22d   :  { %v1105_v23 = vadd.f32 %v1104_v12, %v1103_v62  ;;  %v1156_v25 = vrot.slane %v1155_v13, 1  ;;  %v1131_v26 = vrot.slane %v1130_v14, 1  ;;  %v1182_v27 = vadd.f32 %v1181_v17, %v1180_v3 }
 0x22e   :  { %v1123_v31 = vadd.f32 %v1122_v16, %v1121_v4  ;;  %v1174_v32 = vrot.slane %v1173_v20, 1  ;;  %v1114_v33 = vadd.f32 %v1113_v15, %v1112_v7  ;;  %v1165_v34 = vrot.slane %v1164_v22, 1 }
 0x22f   :  { %v1157_v36 = vadd.f32 %v1156_v25, %v1155_v13  ;;  %v1185_v37 = vmul.f32 0.03125, %v1105_v23  ;;  %v1132_v38 = vadd.f32 %v1131_v26, %v1130_v14  ;;  %v1183_v39 = vrot.slane %v1182_v27, 1  ;;  %v1095_v25 = vld [vmem:[#allocation6] sm:$0xf] }
 0x230   :  { %v1175_v40 = vadd.f32 %v1174_v32, %v1173_v20  ;;  %v1187_v41 = vmul.f32 0.03125, %v1123_v31  ;;  %v1166_v42 = vadd.f32 %v1165_v34, %v1164_v22  ;;  %v1186_v43 = vmul.f32 0.03125, %v1114_v33 }
 0x231   :  { %v1189_v2 = vmul.f32 0.03125, %v1157_v36  ;;  %v1193_v21 = vmul.f32 %v1185_v37, %v1185_v37  ;;  %v1184_v30 = vadd.f32 %v1183_v39, %v1182_v27  ;;  %v1188_v9 = vmul.f32 0.03125, %v1132_v38 }
 0x232   :  { %v1191_v44 = vmul.f32 0.03125, %v1175_v40  ;;  %v1195_v45 = vmul.f32 %v1187_v41, %v1187_v41  ;;  %v1190_v49 = vmul.f32 0.03125, %v1166_v42  ;;  %v1194_v51 = vmul.f32 %v1186_v43, %v1186_v43 }
 0x233   :  { %v1197_v52 = vsub.f32 %v1189_v2, %v1193_v21  ;;  %v1192_v53 = vmul.f32 0.03125, %v1184_v30  ;;  %v1196_v54 = vmul.f32 %v1188_v9, %v1188_v9  ;;  %v4045_v1 = vmov 1966171168  }
 0x234   :  { %v1199_v57 = vsub.f32 %v1191_v44, %v1195_v45  ;;  %v1198_v63 = vsub.f32 %v1190_v49, %v1194_v51  ;;  %v1216_v3 = vunpack.c.l.s4 %v4045_v1  ;;  %v1218_v4 = vlaneseq }
 0x235   :  { %v1201_v58 = vadd.f32 1e-05, %v1197_v52  ;;  %v1200_v59 = vsub.f32 %v1192_v53, %v1196_v54 }
 0x236   :  { %v1203_v61 = vadd.f32 1e-05, %v1199_v57  ;;  %v1202_v62 = vadd.f32 1e-05, %v1198_v63  ;;  %v1217_v6 = vunpack.c.0.s8 %v1216_v3  ;;  %v4759_v7 = vshrl.u32 %v1218_v4, 7 }
 0x237   :  { %3809 = vrsqrt.f32 %v1201_v58  ;;  %v1204_v0 = vadd.f32 1e-05, %v1200_v59  ;;  %v4046_v58 = vmov 1983009808  }
 0x238   :  { %3811 = vrsqrt.f32 %v1203_v61  ;;  %v4762_v13 = vsub.s32 %v1217_v6, %v4759_v7  ;;  %v4767_v26 = vsub.s32 0, %v4759_v7  ;;  %v4771_v31 = vsub.s32 1, %v4759_v7 }
 0x239   :  { %3813 = vrsqrt.f32 %v1202_v62  ;;  %v4774_v32 = vsub.s32 2, %v4759_v7  ;;  %v4777_v33 = vsub.s32 3, %v4759_v7  ;;  %v4802_v59 = vunpack.c.l.s4 %v4046_v58 }
 0x23a   :  { %3815 = vrsqrt.f32 %v1204_v0 }
 0x241   :  { %v3810_v8 = vpop.eup %3809 }
 0x242   :  { %v3812_v12 = vpop.eup %3811 }
 0x243   :  { %v3814_v14 = vpop.eup %3813 }
 0x244   :  { %v3816_v17 = vpop.eup %3815  ;;  %v1213_v16 = vcombine.low %v3810_v8, %v3814_v14 }
 0x245   :  { %v1214_v20 = vcombine.low %v3812_v12, %v3816_v17 }
 0x246   :  { %v1221_v15 = vrot.slane %v1213_v16, %v4762_v13 }
 0x247   :  { %v1228_v22 = vrot.slane %v1214_v20, %v4762_v13 }
 0x249   :  { %v1229_v23 = vcombine.low %v1221_v15, %v1228_v22 }
 0x24b   :  { %v1236_v27 = vrot.slane %v1229_v23, %v4762_v13 }
 0x24d   :  { %v1238_v34 = vmul.f32 %v1236_v27, %v1095_v25 }
 0x24f   :  { %v1243_v36 = vrot.slane %v1238_v34, %v4767_v26  ;;  %v1247_v38 = vrot.slane %v1238_v34, %v4771_v31  ;;  %v1251_v39 = vrot.slane %v1238_v34, %v4774_v32  ;;  %v1255_v40 = vrot.slane %v1238_v34, %v4777_v33 }
 0x251   :  { %v1260_v42 = vmul.f32 %v1243_v36, %v1185_v37  ;;  %v1261_v2 = vmul.f32 %v1247_v38, %v1186_v43  ;;  %v1262_v21 = vmul.f32 %v1251_v39, %v1187_v41  ;;  %v1263_v30 = vmul.f32 %v1255_v40, %v1188_v9 }
 0x252   :  { %v1305_v44 = vmul.f32 %v1255_v40, %v4734_v19  ;;  %v1309_v45 = vmul.f32 %v1255_v40, %v4754_v35  ;;  %v1294_v49 = vmul.f32 %v1243_v36, %v4679_v18  ;;  %v1295_v51 = vmul.f32 %v1247_v38, %v4683_v47 }
 0x253   :  { %v1268_v52 = vcombine.low %v1260_v42, %v1261_v2  ;;  %v1269_v53 = vcombine.low %v1262_v21, %v1263_v30  ;;  %v1298_v54 = vmul.f32 %v1243_v36, %v4689_v50  ;;  %v1299_v57 = vmul.f32 %v1247_v38, %v4701_v56 }
 0x254   :  { %v1302_v63 = vmul.f32 %v1243_v36, %v4719_v5  ;;  %v1303_v37 = vmul.f32 %v1247_v38, %v4726_v11  ;;  %v1306_v41 = vmul.f32 %v1243_v36, %v4739_v24  ;;  %v1307_v19 = vmul.f32 %v1247_v38, %v4746_v29  ;;  %v1096_v24 = vld [vmem:[#allocation8] sm:$0xf] }
 0x255   :  { %v1276_v35 = vrot.slane %v1268_v52, %v4762_v13  ;;  %v1283_v18 = vrot.slane %v1269_v53, %v4762_v13  ;;  %v1297_v47 = vmul.f32 %v1255_v40, %v4685_v48  ;;  %v1301_v43 = vmul.f32 %v1255_v40, %v4711_v60 }
 0x256   :  { %v1296_v50 = vmul.f32 %v1251_v39, %v4681_v46  ;;  %v1300_v56 = vmul.f32 %v1251_v39, %v4699_v55  ;;  %v1304_v5 = vmul.f32 %v1251_v39, %v4724_v10  ;;  %v1308_v11 = vmul.f32 %v1251_v39, %v4744_v28 }
 0x257   :  { %v1284_v9 = vcombine.low %v1276_v35, %v1283_v18  ;;  %v1440_v55 = vunpack.c.0.s8 %v4802_v59  ;;  %v1633_v59 = vld [vmem:[%s5303_s4 + $0x4a0] sm:$0xff] }
 0x259   :  { %v1291_v29 = vrot.slane %v1284_v9, %v4762_v13 }
 0x25b   :  { %v1293_v61 = vsub.f32 %v1096_v24, %v1291_v29 }
 0x25d   :  { %v1326_v48 = vrot.slane %v1293_v61, %v4777_v33  ;;  %v1314_v60 = vrot.slane %v1293_v61, %v4767_v26  ;;  %v1318_v46 = vrot.slane %v1293_v61, %v4771_v31  ;;  %v1322_v10 = vrot.slane %v1293_v61, %v4774_v32 }
 0x25f   :  { %v1342_v62 = vadd.f32 %v1326_v48, %v1305_v44  ;;  %v1346_v28 = vadd.f32 %v1326_v48, %v1309_v45  ;;  %v1331_v0 = vadd.f32 %v1314_v60, %v1294_v49  ;;  %v1332_v1 = vadd.f32 %v1318_v46, %v1295_v51 }
 0x260   :  { %v1335_v3 = vadd.f32 %v1314_v60, %v1298_v54  ;;  %v1336_v4 = vadd.f32 %v1318_v46, %v1299_v57  ;;  %v1339_v6 = vadd.f32 %v1314_v60, %v1302_v63  ;;  %v1340_v8 = vadd.f32 %v1318_v46, %v1303_v37 }
 0x261   :  { %v1358_v12 = vmax.f32 %v1342_v62, 0.0  ;;  %v1362_v14 = vmax.f32 %v1346_v28, 0.0  ;;  %v1343_v17 = vadd.f32 %v1314_v60, %v1306_v41  ;;  %v1344_v16 = vadd.f32 %v1318_v46, %v1307_v19 }
 0x262   :  { %v1347_v20 = vmax.f32 %v1331_v0, 0.0  ;;  %v1348_v15 = vmax.f32 %v1332_v1, 0.0  ;;  %v1351_v22 = vmax.f32 %v1335_v3, 0.0  ;;  %v1352_v23 = vmax.f32 %v1336_v4, 0.0 }
 0x263   :  { %v1412_v25 = vadd.f32 %v1362_v14, %v1358_v12  ;;  %v1355_v27 = vmax.f32 %v1339_v6, 0.0  ;;  %v1356_v34 = vmax.f32 %v1340_v8, 0.0  ;;  %v1359_v36 = vmax.f32 %v1343_v17, 0.0 }
 0x264   :  { %v1360_v38 = vmax.f32 %v1344_v16, 0.0  ;;  %v1363_v39 = vadd.f32 %v1351_v22, %v1347_v20  ;;  %v1370_v40 = vadd.f32 %v1352_v23, %v1348_v15  ;;  %v1334_v42 = vadd.f32 %v1326_v48, %v1297_v47  ;;  %v1613_v22 = vld [vmem:[%s5303_s4 + $0x400] sm:$0xff] }
 0x265   :  { %v1413_v2 = vrot.slane %v1412_v25, 4  ;;  %v1391_v21 = vadd.f32 %v1359_v36, %v1355_v27  ;;  %v1338_v30 = vadd.f32 %v1326_v48, %v1301_v43  ;;  %v1333_v44 = vadd.f32 %v1322_v10, %v1296_v50  ;;  %v1617_v23 = vld [vmem:[%s5303_s4 + $0x420] sm:$0xff]  ;;  %v1619_v36 = vld [vmem:[%s5303_s4 + $0x430] sm:$0xff] }
 0x266   :  { %v1364_v45 = vrot.slane %v1363_v39, 4  ;;  %v1371_v49 = vrot.slane %v1370_v40, 4  ;;  %v1398_v51 = vadd.f32 %v1360_v38, %v1356_v34  ;;  %v1350_v52 = vmax.f32 %v1334_v42, 0.0  ;;  %v1615_v34 = vld [vmem:[%s5303_s4 + $0x410] sm:$0xff] }
 0x267   :  { %v1414_v53 = vadd.f32 %v1413_v2, %v1412_v25  ;;  %v1392_v54 = vrot.slane %v1391_v21, 4  ;;  %v1354_v57 = vmax.f32 %v1338_v30, 0.0  ;;  %v1337_v63 = vadd.f32 %v1322_v10, %v1300_v56 }
 0x268   :  { %v1365_v37 = vadd.f32 %v1364_v45, %v1363_v39  ;;  %v1372_v41 = vadd.f32 %v1371_v49, %v1370_v40  ;;  %v1399_v19 = vrot.slane %v1398_v51, 4  ;;  %v1341_v35 = vadd.f32 %v1322_v10, %v1304_v5 }
 0x269   :  { %v1393_v18 = vadd.f32 %v1392_v54, %v1391_v21  ;;  %v1384_v9 = vadd.f32 %v1354_v57, %v1350_v52  ;;  %v1415_v24 = vrot.slane %v1414_v53, 2  ;;  %v1345_v47 = vadd.f32 %v1322_v10, %v1308_v11 }
 0x26a   :  { %v1366_v29 = vrot.slane %v1365_v37, 2  ;;  %v1373_v58 = vrot.slane %v1372_v41, 2  ;;  %v1400_v43 = vadd.f32 %v1399_v19, %v1398_v51  ;;  %v1349_v50 = vmax.f32 %v1333_v44, 0.0  ;;  %v1622_v51 = vld [vmem:[%s5303_s4 + $0x448] sm:$0xff] }
 0x26b   :  { %v1394_v61 = vrot.slane %v1393_v18, 2  ;;  %v1385_v48 = vrot.slane %v1384_v9, 4  ;;  %v1416_v60 = vadd.f32 %v1415_v24, %v1414_v53  ;;  %v1353_v46 = vmax.f32 %v1337_v63, 0.0  ;;  %v1626_v63 = vld [vmem:[%s5303_s4 + $0x468] sm:$0xff]  ;;  %v1621_v24 = vld [vmem:[%s5303_s4 + $0x440] sm:$0xff] }
 0x26c   :  { %v1367_v62 = vadd.f32 %v1366_v29, %v1365_v37  ;;  %v1374_v28 = vadd.f32 %v1373_v58, %v1372_v41  ;;  %v1401_v0 = vrot.slane %v1400_v43, 2  ;;  %v1357_v56 = vmax.f32 %v1341_v35, 0.0  ;;  %v1624_v37 = vld [vmem:[%s5303_s4 + $0x458] sm:$0xff] }
 0x26d   :  { %v1395_v1 = vadd.f32 %v1394_v61, %v1393_v18  ;;  %v1386_v3 = vadd.f32 %v1385_v48, %v1384_v9  ;;  %v1417_v4 = vrot.slane %v1416_v60, 1  ;;  %v1361_v5 = vmax.f32 %v1345_v47, 0.0  ;;  %v1628_v41 = vld [vmem:[%s5303_s4 + $0x478] sm:$0xff]  ;;  %v1625_v47 = vld [vmem:[%s5303_s4 + $0x460] sm:$0xff]  ;;  %v1627_v61 = vld [vmem:[%s5303_s4 + $0x470] sm:$0xff] }
 0x26e   :  { %v1368_v6 = vrot.slane %v1367_v62, 1  ;;  %v1375_v8 = vrot.slane %v1374_v28, 1  ;;  %v1402_v12 = vadd.f32 %v1401_v0, %v1400_v43  ;;  %v1377_v11 = vadd.f32 %v1353_v46, %v1349_v50  ;;  %v1623_v50 = vld [vmem:[%s5303_s4 + $0x450] sm:$0xff]  ;;  %v1630_v48 = vld [vmem:[%s5303_s4 + $0x488] sm:$0xff] }
 0x26f   :  { %v1396_v10 = vrot.slane %v1395_v1, 1  ;;  %v1387_v14 = vrot.slane %v1386_v3, 2  ;;  %v1405_v17 = vadd.f32 %v1361_v5, %v1357_v56  ;;  %v1418_v39 = vadd.f32 %v1417_v4, %v1416_v60  ;;  %v1634_v0 = vld [vmem:[%s5303_s4 + $0x4a8] sm:$0xff]  ;;  %v1632_v56 = vld [vmem:[%s5303_s4 + $0x498] sm:$0xff] }
 0x270   :  { %v1369_v16 = vadd.f32 %v1368_v6, %v1367_v62  ;;  %v1376_v20 = vadd.f32 %v1375_v8, %v1374_v28  ;;  %v1403_v15 = vrot.slane %v1402_v12, 1  ;;  %v1378_v25 = vrot.slane %v1377_v11, 4 }
 0x271   :  { %v1397_v27 = vadd.f32 %v1396_v10, %v1395_v1  ;;  %v1388_v38 = vadd.f32 %v1387_v14, %v1386_v3  ;;  %v1406_v40 = vrot.slane %v1405_v17, 4  ;;  %v3305_v45 = vpack.c.bf16 %v1617_v23, %v1613_v22  ;;  %v1636_v1 = vld [vmem:[%s5303_s4 + $0x4b8] sm:$0xff] }
 0x272   :  { %v1404_v42 = vadd.f32 %v1403_v15, %v1402_v12  ;;  %v4821_v2 = vmul.f32 0.0625, %v1369_v16  ;;  %v4823_v21 = vmul.f32 0.0625, %v1376_v20  ;;  %v1379_v30 = vadd.f32 %v1378_v25, %v1377_v11  ;;  %v1629_v11 = vld [vmem:[%s5303_s4 + $0x480] sm:$0xff]  ;;  %v1638_v16 = vld [vmem:[%s5303_s4 + $0x4c8] sm:$0xff]  ;;  %v1640_v22 = vld [vmem:[%s5303_s4 + $0x4d8] sm:$0xff] }
 0x273   :  { %v4825_v44 = vmul.f32 0.0625, %v1397_v27  ;;  %v1389_v49 = vrot.slane %v1388_v38, 1  ;;  %v1407_v52 = vadd.f32 %v1406_v40, %v1405_v17  ;;  %v3433_v57 = vpack.c.bf16 %v1619_v36, %v1615_v34  ;;  %v1635_v17 = vld [vmem:[%s5303_s4 + $0x4b0] sm:$0xff]  ;;  %v1642_v20 = vld [vmem:[%s5303_s4 + $0x4e8] sm:$0xff]  ;;  %v1644_v23 = vld [vmem:[%s5303_s4 + $0x4f8] sm:$0xff] }
 0x274   :  { %v4830_v53 = vmul.f32 0.0625, %v1404_v42  ;;  %v1436_v54 = vcombine.low %v4821_v2, %v4823_v21  ;;  %v1380_v19 = vrot.slane %v1379_v30, 2  ;;  %v4846_v9 = vmul.f32 0.0625, %v1418_v39  ;;  %v1637_v39 = vld [vmem:[%s5303_s4 + $0x4c0] sm:$0xff] }
 0x275   :  { %v1741_v35 = vsel %vm1475_vm0, %v4825_v44, %v4821_v2  ;;  %v1390_v18 = vadd.f32 %v1389_v49, %v1388_v38  ;;  %v1408_v29 = vrot.slane %v1407_v52, 2  ;;  %v3307_v62 = vpack.c.bf16 %v1626_v63, %v1622_v51  ;;  %v1641_v40 = vld [vmem:[%s5303_s4 + $0x4e0] sm:$0xff] }
 0x276   :  { %v1453_v58 = vcombine.low %v4825_v44, %v4830_v53  ;;  %v1742_v43 = vsel %vm1475_vm0, %v4830_v53, %v4823_v21  ;;  %v1381_v60 = vadd.f32 %v1380_v19, %v1379_v30  ;;  %v3435_v28 = vpack.c.bf16 %v1628_v41, %v1624_v37  ;;  %v1639_v30 = vld [vmem:[%s5303_s4 + $0x4d0] sm:$0xff]  ;;  %v1648_v53 = vld [vmem:[%s5303_s4 + $0x518] sm:$0xff] }
 0x277   :  { %1813 = vmatprep.mubr.f32.mxu0 %v1742_v43  ;;  %1955 = vmatprep.mubr.f32.mxu1 %v1742_v43  ;;  %v1423_v46 = vmul.f32 0.0625, %v1390_v18  ;;  %v1409_v3 = vadd.f32 %v1408_v29, %v1407_v52  ;;  %v4880_v4 = vsub.s32 %v1440_v55, %v4759_v7  ;;  %v3309_v8 = vpack.c.bf16 %v1625_v47, %v1621_v24  ;;  %v1631_v7 = vld [vmem:[%s5303_s4 + $0x490] sm:$0xff]  ;;  %v1650_v52 = vld [vmem:[%s5303_s4 + $0x528] sm:$0xff]  ;;  %v1649_v18 = vld [vmem:[%s5303_s4 + $0x520] sm:$0xff] }
 0x278   :  { %1814 = vmatmul.mubr.f32.vlgmr.msra.gmra.mrb[8].mxu0 %v1741_v35  ;;  %1956 = vmatmul.mubr.f32.vlgmr.msra.gmra.mrb[8].mxu1 %v1741_v35  ;;  %v1382_v5 = vrot.slane %v1381_v60, 1  ;;  %v3437_v12 = vpack.c.bf16 %v1627_v61, %v1623_v50  ;;  %v3311_v10 = vpack.c.bf16 %v1634_v0, %v1630_v48  ;;  %v3439_v14 = vpack.c.bf16 %v1636_v1, %v1632_v56  ;;  %v1643_v44 = vld [vmem:[%s5303_s4 + $0x4f0] sm:$0xff]  ;;  %v1645_v35 = vld [vmem:[%s5303_s4 + $0x500] sm:$0xff]  ;;  %v1654_v43 = vld [vmem:[%s5303_s4 + $0x548] sm:$0xff] }
 0x279   :  { %3306 = vmatpush1.bf16.msra.mxu0 %v3305_v45  ;;  %3434 = vmatpush1.bf16.msra.mxu1 %v3433_v57  ;;  %v1744_v6 = vsel %vm1475_vm0, %v4846_v9, %v1423_v46  ;;  %v1410_v55 = vrot.slane %v1409_v3, 1  ;;  %v3313_v34 = vpack.c.bf16 %v1633_v59, %v1629_v11  ;;  %v3441_v36 = vpack.c.bf16 %v1635_v17, %v1631_v7  ;;  %v1646_v45 = vld [vmem:[%s5303_s4 + $0x508] sm:$0xff]  ;;  %v1647_v29 = vld [vmem:[%s5303_s4 + $0x510] sm:$0xff]  ;;  %v1656_v48 = vld [vmem:[%s5303_s4 + $0x558] sm:$0xff] }
 0x27a   :  { %1884 = vmatprep.mubr.f32.mxu0 %v1744_v6  ;;  %2026 = vmatprep.mubr.f32.mxu1 %v1744_v6  ;;  %v1383_v15 = vadd.f32 %v1382_v5, %v1381_v60  ;;  %v3315_v38 = vpack.c.bf16 %v1642_v20, %v1638_v16  ;;  %v1444_v2 = vrot.slane %v1436_v54, %v4880_v4  ;;  %v1652_v54 = vld [vmem:[%s5303_s4 + $0x538] sm:$0xff]  ;;  %v1658_v61 = vld [vmem:[%s5303_s4 + $0x568] sm:$0xff]  ;;  %v1653_v0 = vld [vmem:[%s5303_s4 + $0x540] sm:$0xff] }
 0x27b   :  { %3308 = vmatprep.subr.bf16.mxu0 %v3307_v62  ;;  %3436 = vmatprep.subr.bf16.mxu1 %v3435_v28  ;;  %v1411_v25 = vadd.f32 %v1410_v55, %v1409_v3  ;;  %v3443_v21 = vpack.c.bf16 %v1644_v23, %v1640_v22  ;;  %v1461_v51 = vrot.slane %v1453_v58, %v4880_v4  ;;  %v1651_v58 = vld [vmem:[%s5303_s4 + $0x530] sm:$0xff]  ;;  %v1660_v60 = vld [vmem:[%s5303_s4 + $0x578] sm:$0xff]  ;;  %v1657_v56 = vld [vmem:[%s5303_s4 + $0x560] sm:$0xff] }
 0x27c   :  { %v1422_v27 = vmul.f32 0.0625, %v1383_v15  ;;  %v3317_v41 = vpack.c.bf16 %v1641_v40, %v1637_v39  ;;  %v3445_v19 = vpack.c.bf16 %v1643_v44, %v1639_v30  ;;  %v3447_v47 = vpack.c.bf16 %v1652_v54, %v1648_v53  ;;  %v1655_v6 = vld [vmem:[%s5303_s4 + $0x550] sm:$0xff]  ;;  %v1666_v11 = vld [vmem:[%s5303_s4 + $0x5a8] sm:$0xff]  ;;  %v1664_v59 = vld [vmem:[%s5303_s4 + $0x598] sm:$0xff] }
 0x27d   :  { %3310 = vmatpush1.bf16.msra.mxu0 %v3309_v8  ;;  %3438 = vmatpush1.bf16.msra.mxu1 %v3437_v12  ;;  %v1426_v42 = vmul.f32 0.0625, %v1411_v25  ;;  %v3321_v62 = vpack.c.bf16 %v1649_v18, %v1645_v35  ;;  %v3449_v28 = vpack.c.bf16 %v1651_v58, %v1647_v29  ;;  %v3323_v3 = vpack.c.bf16 %v1658_v61, %v1654_v43  ;;  %v1659_v8 = vld [vmem:[%s5303_s4 + $0x570] sm:$0xff]  ;;  %v1662_v12 = vld [vmem:[%s5303_s4 + $0x588] sm:$0xff]  ;;  %v1668_v7 = vld [vmem:[%s5303_s4 + $0x5b8] sm:$0xff] }
 0x27e   :  { %3312 = vmatprep.subr.bf16.mxu0 %v3311_v10  ;;  %3440 = vmatprep.subr.bf16.mxu1 %v3439_v14  ;;  %v1437_v49 = vcombine.low %v1422_v27, %v1423_v46  ;;  %v3451_v5 = vpack.c.bf16 %v1660_v60, %v1656_v48  ;;  %v3325_v14 = vpack.c.bf16 %v1657_v56, %v1653_v0  ;;  %v1661_v16 = vld [vmem:[%s5303_s4 + $0x580] sm:$0xff]  ;;  %v1663_v25 = vld [vmem:[%s5303_s4 + $0x590] sm:$0xff]  ;;  %v1672_v39 = vld [vmem:[%s5303_s4 + $0x5d8] sm:$0xff] }
 0x27f   :  { %v1454_v57 = vcombine.low %v1426_v42, %v4846_v9  ;;  %v4936_v63 = vsel %vm1475_vm0, %v1426_v42, %v1422_v27  ;;  %v3319_v9 = vpack.c.bf16 %v1650_v52, %v1646_v45  ;;  %v3453_v17 = vpack.c.bf16 %v1659_v8, %v1655_v6  ;;  %v1665_v20 = vld [vmem:[%s5303_s4 + $0x5a0] sm:$0xff]  ;;  %v1667_v27 = vld [vmem:[%s5303_s4 + $0x5b0] sm:$0xff]  ;;  %v1676_v40 = vld [vmem:[%s5303_s4 + $0x5f8] sm:$0xff] }
 0x280   :  { %v1451_v37 = vrot.slane %v1437_v49, %v4880_v4  ;;  %v3327_v22 = vpack.c.bf16 %v1666_v11, %v1662_v12  ;;  %v3455_v23 = vpack.c.bf16 %v1668_v7, %v1664_v59  ;;  %v3329_v42 = vpack.c.bf16 %v1665_v20, %v1661_v16  ;;  %v1673_v30 = vld [vmem:[%s5303_s4 + $0x5e0] sm:$0xff]  ;;  %v1671_v49 = vld [vmem:[%s5303_s4 + $0x5d0] sm:$0xff]  ;;  %v1678_v52 = vld [vmem:[%s5303_s4 + $0x608] sm:$0xff] }
 0x281   :  { %3314 = vmatpush1.bf16.msra.mxu0 %v3313_v34  ;;  %3442 = vmatpush1.bf16.msra.mxu1 %v3441_v36  ;;  %v1468_v24 = vrot.slane %v1454_v57, %v4880_v4  ;;  %v1670_v34 = vld [vmem:[%s5303_s4 + $0x5c8] sm:$0xff]  ;;  %v3459_v45 = vpack.c.bf16 %v1676_v40, %v1672_v39  ;;  %v1680_v54 = vld [vmem:[%s5303_s4 + $0x618] sm:$0xff]  ;;  %v1681_v35 = vld [vmem:[%s5303_s4 + $0x620] sm:$0xff] }
 0x282   :  { %3316 = vmatprep.subr.bf16.mxu0 %v3315_v38  ;;  %3444 = vmatprep.subr.bf16.mxu1 %v3443_v21  ;;  %v1452_v50 = vcombine.low %v1444_v2, %v1451_v37  ;;  %v1674_v38 = vld [vmem:[%s5303_s4 + $0x5e8] sm:$0xff]  ;;  %v3457_v2 = vpack.c.bf16 %v1667_v27, %v1663_v25  ;;  %v1669_v21 = vld [vmem:[%s5303_s4 + $0x5c0] sm:$0xff]  ;;  %v1684_v57 = vld [vmem:[%s5303_s4 + $0x638] sm:$0xff] }
 0x283   :  { %v1469_v46 = vcombine.low %v1461_v51, %v1468_v24  ;;  %v3331_v44 = vpack.c.bf16 %v1674_v38, %v1670_v34  ;;  %v1675_v51 = vld [vmem:[%s5303_s4 + $0x5f0] sm:$0xff]  ;;  %v1682_v53 = vld [vmem:[%s5303_s4 + $0x628] sm:$0xff]  ;;  %v3333_v37 = vpack.c.bf16 %v1673_v30, %v1669_v21  ;;  %v3463_v24 = vpack.c.bf16 %v1684_v57, %v1680_v54  ;;  %v1688_v43 = vld [vmem:[%s5303_s4 + $0x658] sm:$0xff] }
 0x284   :  { %v3335_v18 = vpack.c.bf16 %v1682_v53, %v1678_v52  ;;  %v1686_v29 = vld [vmem:[%s5303_s4 + $0x648] sm:$0xff]  ;;  %v1685_v60 = vld [vmem:[%s5303_s4 + $0x640] sm:$0xff]  ;;  %v1687_v0 = vld [vmem:[%s5303_s4 + $0x650] sm:$0xff] }
 0x285   :  { %3318 = vmatpush1.bf16.msra.mxu0 %v3317_v41  ;;  %3446 = vmatpush1.bf16.msra.mxu1 %v3445_v19  ;;  %v1474_v1 = vrot.slane %v1469_v46, 7  ;;  %v3461_v41 = vpack.c.bf16 %v1675_v51, %v1671_v49  ;;  %v1677_v19 = vld [vmem:[%s5303_s4 + $0x600] sm:$0xff]  ;;  %v1690_v58 = vld [vmem:[%s5303_s4 + $0x668] sm:$0xff]  ;;  %v1691_v56 = vld [vmem:[%s5303_s4 + $0x670] sm:$0xff] }
 0x286   :  { %3320 = vmatprep.subr.bf16.mxu0 %v3319_v9  ;;  %3448 = vmatprep.subr.bf16.mxu1 %v3447_v47  ;;  %v1679_v9 = vld [vmem:[%s5303_s4 + $0x610] sm:$0xff]  ;;  %v3337_v61 = vpack.c.bf16 %v1681_v35, %v1677_v19  ;;  %v1689_v46 = vld [vmem:[%s5303_s4 + $0x660] sm:$0xff]  ;;  %v1700_v6 = vld [vmem:[%s5303_s4 + $0x6b8] sm:$0xff]  ;;  %v3469_v12 = vpack.c.bf16 %v1691_v56, %v1687_v0 }
 0x287   :  { %v1476_v55 = vsel %vm1475_vm0, %v1474_v1, %v1452_v50  ;;  %v1683_v47 = vld [vmem:[%s5303_s4 + $0x630] sm:$0xff]  ;;  %v1692_v50 = vld [vmem:[%s5303_s4 + $0x678] sm:$0xff]  ;;  %v3341_v8 = vpack.c.bf16 %v1689_v46, %v1685_v60  ;;  %v1693_v11 = vld [vmem:[%s5303_s4 + $0x680] sm:$0xff] }
 0x288   :  { %v1478_v10 = vsel %vm1477_vm1, %v1474_v1, %v1476_v55  ;;  %v3465_v48 = vpack.c.bf16 %v1683_v47, %v1679_v9  ;;  %v1697_v59 = vld [vmem:[%s5303_s4 + $0x6a0] sm:$0xff]  ;;  %v1706_v16 = vld [vmem:[%s5303_s4 + $0x6e8] sm:$0xff]  ;;  %v1704_v20 = vld [vmem:[%s5303_s4 + $0x6d8] sm:$0xff] }
 0x289   :  { %3322 = vmatpush1.bf16.msra.mxu0 %v3321_v62  ;;  %3450 = vmatpush1.bf16.msra.mxu1 %v3449_v28  ;;  %v1480_v15 = vsel %vm1479_vm2, %v1474_v1, %v1478_v10  ;;  %v3339_v62 = vpack.c.bf16 %v1690_v58, %v1686_v29  ;;  %v3467_v28 = vpack.c.bf16 %v1692_v50, %v1688_v43  ;;  %v1695_v10 = vld [vmem:[%s5303_s4 + $0x690] sm:$0xff]  ;;  %v1701_v25 = vld [vmem:[%s5303_s4 + $0x6c0] sm:$0xff]  ;;  %v1710_v40 = vld [vmem:[%s5303_s4 + $0x708] sm:$0xff] }
 0x28a   :  { %3324 = vmatprep.subr.bf16.mxu0 %v3323_v3  ;;  %3452 = vmatprep.subr.bf16.mxu1 %v3451_v5  ;;  %v1482_v36 = vsel %vm1481_vm3, %v1474_v1, %v1480_v15  ;;  %v1694_v1 = vld [vmem:[%s5303_s4 + $0x688] sm:$0xff]  ;;  %v1696_v5 = vld [vmem:[%s5303_s4 + $0x698] sm:$0xff]  ;;  %v1705_v27 = vld [vmem:[%s5303_s4 + $0x6e0] sm:$0xff] }
 0x28b   :  { %1484 = vst [vmem:[#allocation16] sm:$0xff] %v1482_v36  ;;  %v1698_v3 = vld [vmem:[%s5303_s4 + $0x6a8] sm:$0xff]  ;;  %v3471_v55 = vpack.c.bf16 %v1700_v6, %v1696_v5  ;;  %v1708_v15 = vld [vmem:[%s5303_s4 + $0x6f8] sm:$0xff]  ;;  %v1703_v38 = vld [vmem:[%s5303_s4 + $0x6d0] sm:$0xff]  ;;  %v3349_v30 = vpack.c.bf16 %v1705_v27, %v1701_v25 }
 0x28c   :  { %v3343_v7 = vpack.c.bf16 %v1698_v3, %v1694_v1  ;;  %v3475_v36 = vpack.c.bf16 %v1708_v15, %v1704_v20  ;;  %v1707_v39 = vld [vmem:[%s5303_s4 + $0x6f0] sm:$0xff]  ;;  %v1716_v21 = vld [vmem:[%s5303_s4 + $0x738] sm:$0xff]  ;;  %v1713_v49 = vld [vmem:[%s5303_s4 + $0x720] sm:$0xff] }
 0x28d   :  { %3326 = vmatpush1.bf16.msra.mxu0 %v3325_v14  ;;  %3454 = vmatpush1.bf16.msra.mxu1 %v3453_v17  ;;  %v1699_v14 = vld [vmem:[%s5303_s4 + $0x6b0] sm:$0xff]  ;;  %v1702_v17 = vld [vmem:[%s5303_s4 + $0x6c8] sm:$0xff]  ;;  %v1724_v19 = vld [vmem:[%s5303_s4 + $0x778] sm:$0xff] }
 0x28e   :  { %3328 = vmatprep.subr.bf16.mxu0 %v3327_v22  ;;  %3456 = vmatprep.subr.bf16.mxu1 %v3455_v23  ;;  %v3345_v22 = vpack.c.bf16 %v1697_v59, %v1693_v11  ;;  %v3473_v23 = vpack.c.bf16 %v1699_v14, %v1695_v10  ;;  %v3347_v34 = vpack.c.bf16 %v1706_v16, %v1702_v17  ;;  %v1711_v53 = vld [vmem:[%s5303_s4 + $0x710] sm:$0xff]  ;;  %v1718_v57 = vld [vmem:[%s5303_s4 + $0x748] sm:$0xff]  ;;  %v1721_v9 = vld [vmem:[%s5303_s4 + $0x760] sm:$0xff] }
 0x28f   :  { %v1715_v54 = vld [vmem:[%s5303_s4 + $0x730] sm:$0xff]  ;;  %v1726_v50 = vld [vmem:[%s5303_s4 + $0x788] sm:$0xff]  ;;  %v1732_v60 = vld [vmem:[%s5303_s4 + $0x7b8] sm:$0xff] }
 0x290   :  { %v1719_v58 = vld [vmem:[%s5303_s4 + $0x750] sm:$0xff]  ;;  %v1729_v0 = vld [vmem:[%s5303_s4 + $0x7a0] sm:$0xff]  ;;  %v1734_v6 = vld [vmem:[%s5303_s4 + $0x7c8] sm:$0xff] }
 0x291   :  { %3330 = vmatpush1.bf16.msra.mxu0 %v3329_v42  ;;  %3458 = vmatpush1.bf16.msra.mxu1 %v3457_v2  ;;  %v1714_v42 = vld [vmem:[%s5303_s4 + $0x728] sm:$0xff]  ;;  %v1712_v2 = vld [vmem:[%s5303_s4 + $0x718] sm:$0xff]  ;;  %v1723_v43 = vld [vmem:[%s5303_s4 + $0x770] sm:$0xff] }
 0x292   :  { %3332 = vmatprep.subr.bf16.mxu0 %v3331_v44  ;;  %3460 = vmatprep.subr.bf16.mxu1 %v3459_v45  ;;  %v3477_v44 = vpack.c.bf16 %v1707_v39, %v1703_v38  ;;  %v1709_v45 = vld [vmem:[%s5303_s4 + $0x700] sm:$0xff]  ;;  %v3351_v51 = vpack.c.bf16 %v1714_v42, %v1710_v40  ;;  %v3479_v52 = vpack.c.bf16 %v1716_v21, %v1712_v2  ;;  %v1727_v3 = vld [vmem:[%s5303_s4 + $0x790] sm:$0xff]  ;;  %v1740_v11 = vld [vmem:[%s5303_s4 + $0x7f8] sm:$0xff] }
 0x293   :  { %v3353_v35 = vpack.c.bf16 %v1713_v49, %v1709_v45  ;;  %v1731_v5 = vld [vmem:[%s5303_s4 + $0x7b0] sm:$0xff]  ;;  %v1737_v17 = vld [vmem:[%s5303_s4 + $0x7e0] sm:$0xff]  ;;  %v2243_v25 = vld [vmem:[#allocation12 + $0x28] sm:$0xff] }
 0x294   :  { %v1735_v16 = vld [vmem:[%s5303_s4 + $0x7d0] sm:$0xff]  ;;  %v2241_v27 = vld [vmem:[#allocation12 + $0x18] sm:$0xff]  ;;  %v2240_v2 = vld [vmem:[#allocation12 + $0x10] sm:$0xff] }
 0x295   :  { %3334 = vmatpush1.bf16.msra.mxu0 %v3333_v37  ;;  %3462 = vmatpush1.bf16.msra.mxu1 %v3461_v41  ;;  %v1722_v37 = vld [vmem:[%s5303_s4 + $0x768] sm:$0xff]  ;;  %v1720_v41 = vld [vmem:[%s5303_s4 + $0x758] sm:$0xff]  ;;  %v1739_v20 = vld [vmem:[%s5303_s4 + $0x7f0] sm:$0xff] }
 0x296   :  { %3336 = vmatprep.subr.bf16.mxu0 %v3335_v18  ;;  %3464 = vmatprep.subr.bf16.mxu1 %v3463_v24  ;;  %v3481_v18 = vpack.c.bf16 %v1715_v54, %v1711_v53  ;;  %v1717_v24 = vld [vmem:[%s5303_s4 + $0x740] sm:$0xff]  ;;  %v3355_v47 = vpack.c.bf16 %v1722_v37, %v1718_v57  ;;  %v3483_v29 = vpack.c.bf16 %v1724_v19, %v1720_v41  ;;  %v2238_v38 = vld [vmem:[#allocation12] sm:$0xff]  ;;  %v2251_v45 = vld [vmem:[#allocation12 + $0x68] sm:$0xff] }
 0x297   :  { %v3357_v46 = vpack.c.bf16 %v1721_v9, %v1717_v24  ;;  %v2242_v39 = vld [vmem:[#allocation12 + $0x20] sm:$0xff]  ;;  %v2244_v21 = vld [vmem:[#allocation12 + $0x30] sm:$0xff]  ;;  %v2249_v49 = vld [vmem:[#allocation12 + $0x58] sm:$0xff] }
 0x298   :  { %v3497_v42 = vpack.c.bf16 %v2242_v39, %v2238_v38  ;;  %v2250_v53 = vld [vmem:[#allocation12 + $0x60] sm:$0xff]  ;;  %v2248_v37 = vld [vmem:[#allocation12 + $0x50] sm:$0xff]  ;;  %v2257_v24 = vld [vmem:[#allocation12 + $0x98] sm:$0xff] }
 0x299   :  { %3338 = vmatpush1.bf16.msra.mxu0 %v3337_v61  ;;  %3466 = vmatpush1.bf16.msra.mxu1 %v3465_v48  ;;  %v1730_v61 = vld [vmem:[%s5303_s4 + $0x7a8] sm:$0xff]  ;;  %v1728_v48 = vld [vmem:[%s5303_s4 + $0x798] sm:$0xff]  ;;  %v2252_v41 = vld [vmem:[#allocation12 + $0x70] sm:$0xff] }
 0x29a   :  { %3340 = vmatprep.subr.bf16.mxu0 %v3339_v62  ;;  %3468 = vmatprep.subr.bf16.mxu1 %v3467_v28  ;;  %v3485_v62 = vpack.c.bf16 %v1723_v43, %v1719_v58  ;;  %v1725_v28 = vld [vmem:[%s5303_s4 + $0x780] sm:$0xff]  ;;  %v3359_v56 = vpack.c.bf16 %v1730_v61, %v1726_v50  ;;  %v3487_v1 = vpack.c.bf16 %v1732_v60, %v1728_v48  ;;  %v2258_v58 = vld [vmem:[#allocation12 + $0xa0] sm:$0xff]  ;;  %v2281_v38 = vld [vmem:[#allocation12 + $0x158] sm:$0xff] }
 0x29b   :  { %v3361_v59 = vpack.c.bf16 %v1729_v0, %v1725_v28  ;;  %v3629_v19 = vpack.c.bf16 %v2252_v41, %v2248_v37  ;;  %v2256_v61 = vld [vmem:[#allocation12 + $0x90] sm:$0xff]  ;;  %v2265_v28 = vld [vmem:[#allocation12 + $0xd8] sm:$0xff] }
 0x29c   :  { %v2260_v48 = vld [vmem:[#allocation12 + $0xb0] sm:$0xff]  ;;  %v2285_v39 = vld [vmem:[#allocation12 + $0x178] sm:$0xff] }
 0x29d   :  { %3342 = vmatpush1.bf16.msra.mxu0 %v3341_v8  ;;  %3470 = vmatpush1.bf16.msra.mxu1 %v3469_v12  ;;  %v1738_v8 = vld [vmem:[%s5303_s4 + $0x7e8] sm:$0xff]  ;;  %v1736_v12 = vld [vmem:[%s5303_s4 + $0x7d8] sm:$0xff]  ;;  %v3633_v60 = vpack.c.bf16 %v2260_v48, %v2256_v61 }
 0x29e   :  { %3344 = vmatprep.subr.bf16.mxu0 %v3343_v7  ;;  %3472 = vmatprep.subr.bf16.mxu1 %v3471_v55  ;;  %v3489_v7 = vpack.c.bf16 %v1731_v5, %v1727_v3  ;;  %v1733_v55 = vld [vmem:[%s5303_s4 + $0x7c0] sm:$0xff]  ;;  %v3363_v10 = vpack.c.bf16 %v1738_v8, %v1734_v6  ;;  %v3491_v14 = vpack.c.bf16 %v1740_v11, %v1736_v12  ;;  %v2266_v3 = vld [vmem:[#allocation12 + $0xe0] sm:$0xff]  ;;  %s4047_s4 = smov [#allocation16]  }
 0x29f   :  { %v3365_v15 = vpack.c.bf16 %v1737_v17, %v1733_v55  ;;  %v2264_v8 = vld [vmem:[#allocation12 + $0xd0] sm:$0xff]  ;;  %v2273_v55 = vld [vmem:[#allocation12 + $0x118] sm:$0xff]  ;;  %v2270_v17 = vld [vmem:[#allocation12 + $0x100] sm:$0xff]  ;;  %s2839_s29 = sshll.u32 %s4047_s4, 4  ;;  %s2840_s29 = int_to_ptr.vmem [resolvable:$true] %s2839_s29 }
 0x2a0   :  { %v2268_v12 = vld [vmem:[#allocation12 + $0xf0] sm:$0xff]  ;;  %s3979_s30 = scalar_lea.vmem %s2840_s29, 128  ;;  %p3984_p1 = scmp.lt.s32.totalorder %s2840_s29, %s2840_s29 }
 0x2a1   :  { %3346 = vmatpush1.bf16.msra.mxu0 %v3345_v22  ;;  %3474 = vmatpush1.bf16.msra.mxu1 %v3473_v23  ;;  %v3493_v22 = vpack.c.bf16 %v1739_v20, %v1735_v16  ;;  %v2239_v23 = vld [vmem:[#allocation12 + $0x8] sm:$0xff]  ;;  %v3637_v11 = vpack.c.bf16 %v2268_v12, %v2264_v8  ;;  %v2274_v16 = vld [vmem:[#allocation12 + $0x120] sm:$0xff]  ;;  %p3980_p0 = scmp.ne.s32.totalorder %s2840_s29, %s3979_s30  ;;  %p3985_p2 = scmp.lt.s32.totalorder %s3979_s30, %s3979_s30 }
 0x2a2   :  { %3348 = vmatprep.subr.bf16.mxu0 %v3347_v34  ;;  %3476 = vmatprep.subr.bf16.mxu1 %v3475_v36  ;;  %v3495_v34 = vpack.c.bf16 %v2243_v25, %v2239_v23  ;;  %v2245_v36 = vld [vmem:[#allocation12 + $0x38] sm:$0xff]  ;;  %v2276_v23 = vld [vmem:[#allocation12 + $0x130] sm:$0xff] }
 0x2a3   :  { %v3623_v40 = vpack.c.bf16 %v2245_v36, %v2241_v27  ;;  %v2279_v27 = vld [vmem:[#allocation12 + $0x148] sm:$0xff]  ;;  %p3986_p3 = por %p3985_p2, %p3984_p1 }
 0x2a5   :  { %3350 = vmatpush1.bf16.msra.mxu0 %v3349_v30  ;;  %3478 = vmatpush1.bf16.msra.mxu1 %v3477_v44  ;;  %v3625_v30 = vpack.c.bf16 %v2244_v21, %v2240_v2  ;;  %v2247_v44 = vld [vmem:[#allocation12 + $0x48] sm:$0xff]  ;;  %v2282_v2 = vld [vmem:[#allocation12 + $0x160] sm:$0xff]  ;;  %v2280_v21 = vld [vmem:[#allocation12 + $0x150] sm:$0xff]  ;;  %p3987_p4 = pnand %p3986_p3, %p3980_p0 }
 0x2a6   :  { %3352 = vmatprep.subr.bf16.mxu0 %v3351_v51  ;;  %3480 = vmatprep.subr.bf16.mxu1 %v3479_v52  ;;  %v2253_v51 = vld [vmem:[#allocation12 + $0x78] sm:$0xff]  ;;  %v2246_v52 = vld [vmem:[#allocation12 + $0x40] sm:$0xff] }
 0x2a7   :  { %v3627_v54 = vpack.c.bf16 %v2253_v51, %v2249_v49  ;;  %v3501_v57 = vpack.c.bf16 %v2250_v53, %v2246_v52  ;;  %v2287_v49 = vld [vmem:[#allocation12 + $0x188] sm:$0xff]  ;;  %v2289_v51 = vld [vmem:[#allocation12 + $0x198] sm:$0xff] }
 0x2a8   :  { %v2293_v53 = vld [vmem:[#allocation12 + $0x1b8] sm:$0xff] }
 0x2a9   :  { %3354 = vmatpush1.bf16.msra.mxu0 %v3353_v35  ;;  %3482 = vmatpush1.bf16.msra.mxu1 %v3481_v18  ;;  %v2255_v35 = vld [vmem:[#allocation12 + $0x88] sm:$0xff]  ;;  %v3647_v37 = vpack.c.bf16 %v2293_v53, %v2289_v51  ;;  %v2329_v53 = vld [vmem:[#allocation12 + $0x2d8] sm:$0xff] }
 0x2aa   :  { %3356 = vmatprep.subr.bf16.mxu0 %v3355_v47  ;;  %3484 = vmatprep.subr.bf16.mxu1 %v3483_v29  ;;  %v2259_v18 = vld [vmem:[#allocation12 + $0xa8] sm:$0xff]  ;;  %v2261_v47 = vld [vmem:[#allocation12 + $0xb8] sm:$0xff]  ;;  %v2254_v29 = vld [vmem:[#allocation12 + $0x80] sm:$0xff] }
 0x2ab   :  { %v3503_v9 = vpack.c.bf16 %v2259_v18, %v2255_v35  ;;  %v3631_v43 = vpack.c.bf16 %v2261_v47, %v2257_v24  ;;  %v3505_v50 = vpack.c.bf16 %v2258_v58, %v2254_v29  ;;  %v2292_v35 = vld [vmem:[#allocation12 + $0x1b0] sm:$0xff]  ;;  %v2295_v24 = vld [vmem:[#allocation12 + $0x1c8] sm:$0xff]  ;;  %v2297_v47 = vld [vmem:[#allocation12 + $0x1d8] sm:$0xff] }
 0x2ac   :  { %v2301_v58 = vld [vmem:[#allocation12 + $0x1f8] sm:$0xff]  ;;  %v2327_v51 = vld [vmem:[#allocation12 + $0x2c8] sm:$0xff] }
 0x2ad   :  { %3358 = vmatpush1.bf16.msra.mxu0 %v3357_v46  ;;  %3486 = vmatpush1.bf16.msra.mxu1 %v3485_v62  ;;  %v2263_v46 = vld [vmem:[#allocation12 + $0xc8] sm:$0xff]  ;;  %v3651_v61 = vpack.c.bf16 %v2301_v58, %v2297_v47  ;;  %v2337_v58 = vld [vmem:[#allocation12 + $0x318] sm:$0xff] }
 0x2ae   :  { %3360 = vmatprep.subr.bf16.mxu0 %v3359_v56  ;;  %3488 = vmatprep.subr.bf16.mxu1 %v3487_v1  ;;  %v2267_v62 = vld [vmem:[#allocation12 + $0xe8] sm:$0xff]  ;;  %v2269_v56 = vld [vmem:[#allocation12 + $0xf8] sm:$0xff]  ;;  %v2262_v1 = vld [vmem:[#allocation12 + $0xc0] sm:$0xff] }
 0x2af   :  { %v3507_v0 = vpack.c.bf16 %v2267_v62, %v2263_v46  ;;  %v3635_v5 = vpack.c.bf16 %v2269_v56, %v2265_v28  ;;  %v3509_v6 = vpack.c.bf16 %v2266_v3, %v2262_v1  ;;  %v2300_v46 = vld [vmem:[#allocation12 + $0x1f0] sm:$0xff]  ;;  %v2303_v28 = vld [vmem:[#allocation12 + $0x208] sm:$0xff]  ;;  %v2305_v56 = vld [vmem:[#allocation12 + $0x218] sm:$0xff] }
 0x2b0   :  { %v2309_v3 = vld [vmem:[#allocation12 + $0x238] sm:$0xff]  ;;  %v2335_v47 = vld [vmem:[#allocation12 + $0x308] sm:$0xff] }
 0x2b1   :  { %3362 = vmatpush1.bf16.msra.mxu0 %v3361_v59  ;;  %3490 = vmatpush1.bf16.msra.mxu1 %v3489_v7  ;;  %v2271_v59 = vld [vmem:[#allocation12 + $0x108] sm:$0xff]  ;;  %v3655_v8 = vpack.c.bf16 %v2309_v3, %v2305_v56  ;;  %v2345_v3 = vld [vmem:[#allocation12 + $0x358] sm:$0xff] }
 0x2b2   :  { %3364 = vmatprep.subr.bf16.mxu0 %v3363_v10  ;;  %3492 = vmatprep.subr.bf16.mxu1 %v3491_v14  ;;  %v2275_v7 = vld [vmem:[#allocation12 + $0x128] sm:$0xff]  ;;  %v2277_v14 = vld [vmem:[#allocation12 + $0x138] sm:$0xff] }
 0x2b3   :  { %v3511_v10 = vpack.c.bf16 %v2275_v7, %v2271_v59  ;;  %v3639_v20 = vpack.c.bf16 %v2277_v14, %v2273_v55  ;;  %v2308_v59 = vld [vmem:[#allocation12 + $0x230] sm:$0xff]  ;;  %v2311_v55 = vld [vmem:[#allocation12 + $0x248] sm:$0xff]  ;;  %v2313_v14 = vld [vmem:[#allocation12 + $0x258] sm:$0xff] }
 0x2b5   :  { %3366 = vmatpush1.bf16.msra.mxu0 %v3365_v15  ;;  %3494 = vmatpush1.bf16.msra.mxu1 %v3493_v22  ;;  %v3513_v15 = vpack.c.bf16 %v2274_v16, %v2270_v17  ;;  %v2272_v22 = vld [vmem:[#allocation12 + $0x110] sm:$0xff]  ;;  %v2317_v16 = vld [vmem:[#allocation12 + $0x278] sm:$0xff] }
 0x2b6   :  { %3496 = vmatprep.subr.bf16.mxu0 %v3495_v34  ;;  %3624 = vmatprep.subr.bf16.mxu1 %v3623_v40  ;;  %v3641_v25 = vpack.c.bf16 %v2276_v23, %v2272_v22  ;;  %v2283_v34 = vld [vmem:[#allocation12 + $0x168] sm:$0xff]  ;;  %v2278_v40 = vld [vmem:[#allocation12 + $0x140] sm:$0xff]  ;;  %v3659_v22 = vpack.c.bf16 %v2317_v16, %v2313_v14 }
 0x2b7   :  { %v3515_v36 = vpack.c.bf16 %v2283_v34, %v2279_v27  ;;  %v2316_v27 = vld [vmem:[#allocation12 + $0x270] sm:$0xff]  ;;  %v2355_v14 = vld [vmem:[#allocation12 + $0x3a8] sm:$0xff] }
 0x2b8   :  { %1885 = vmatmul.mubr.f32.vlgmr.msra.gmra.mrb[8].mxu0 %v4936_v63  ;;  %2027 = vmatmul.mubr.f32.vlgmr.msra.gmra.mrb[8].mxu1 %v4936_v63  ;;  %v3499_v63 = vpack.c.bf16 %v2251_v45, %v2247_v44  ;;  %v3517_v44 = vpack.c.bf16 %v2282_v2, %v2278_v40  ;;  %v2318_v2 = vld [vmem:[#allocation12 + $0x280] sm:$0xff] }
 0x2b9   :  { %3498 = vmatpush1.bf16.msra.mxu0 %v3497_v42  ;;  %3626 = vmatpush1.bf16.msra.mxu1 %v3625_v30  ;;  %v3643_v42 = vpack.c.bf16 %v2285_v39, %v2281_v38  ;;  %v2284_v30 = vld [vmem:[#allocation12 + $0x170] sm:$0xff]  ;;  %v2323_v38 = vld [vmem:[#allocation12 + $0x2a8] sm:$0xff]  ;;  %v2321_v39 = vld [vmem:[#allocation12 + $0x298] sm:$0xff] }
 0x2ba   :  { %3500 = vmatprep.subr.bf16.mxu0 %v3499_v63  ;;  %3628 = vmatprep.subr.bf16.mxu1 %v3627_v54  ;;  %v3645_v45 = vpack.c.bf16 %v2284_v30, %v2280_v21  ;;  %v2291_v63 = vld [vmem:[#allocation12 + $0x1a8] sm:$0xff]  ;;  %v2286_v54 = vld [vmem:[#allocation12 + $0x180] sm:$0xff] }
 0x2bb   :  { %v3519_v52 = vpack.c.bf16 %v2291_v63, %v2287_v49  ;;  %v2322_v21 = vld [vmem:[#allocation12 + $0x2a0] sm:$0xff]  ;;  %v2324_v49 = vld [vmem:[#allocation12 + $0x2b0] sm:$0xff] }
 0x2bd   :  { %3502 = vmatpush1.bf16.msra.mxu0 %v3501_v57  ;;  %3630 = vmatpush1.bf16.msra.mxu1 %v3629_v19  ;;  %v2290_v57 = vld [vmem:[#allocation12 + $0x1a0] sm:$0xff]  ;;  %v2288_v19 = vld [vmem:[#allocation12 + $0x190] sm:$0xff] }
 0x2be   :  { %3504 = vmatprep.subr.bf16.mxu0 %v3503_v9  ;;  %3632 = vmatprep.subr.bf16.mxu1 %v3631_v43  ;;  %v3521_v41 = vpack.c.bf16 %v2290_v57, %v2286_v54  ;;  %v3649_v18 = vpack.c.bf16 %v2292_v35, %v2288_v19  ;;  %v2299_v9 = vld [vmem:[#allocation12 + $0x1e8] sm:$0xff]  ;;  %v2294_v43 = vld [vmem:[#allocation12 + $0x1c0] sm:$0xff]  ;;  %v2333_v57 = vld [vmem:[#allocation12 + $0x2f8] sm:$0xff] }
 0x2bf   :  { %v3523_v29 = vpack.c.bf16 %v2299_v9, %v2295_v24  ;;  %v3667_v19 = vpack.c.bf16 %v2333_v57, %v2329_v53  ;;  %v2332_v24 = vld [vmem:[#allocation12 + $0x2f0] sm:$0xff]  ;;  %v2367_v53 = vld [vmem:[#allocation12 + $0x408] sm:$0xff]  ;;  %v2369_v57 = vld [vmem:[#allocation12 + $0x418] sm:$0xff] }
 0x2c1   :  { %3506 = vmatpush1.bf16.msra.mxu0 %v3505_v50  ;;  %3634 = vmatpush1.bf16.msra.mxu1 %v3633_v60  ;;  %v2298_v50 = vld [vmem:[#allocation12 + $0x1e0] sm:$0xff]  ;;  %v2296_v60 = vld [vmem:[#allocation12 + $0x1d0] sm:$0xff] }
 0x2c2   :  { %3508 = vmatprep.subr.bf16.mxu0 %v3507_v0  ;;  %3636 = vmatprep.subr.bf16.mxu1 %v3635_v5  ;;  %v3525_v48 = vpack.c.bf16 %v2298_v50, %v2294_v43  ;;  %v3653_v62 = vpack.c.bf16 %v2300_v46, %v2296_v60  ;;  %v2307_v0 = vld [vmem:[#allocation12 + $0x228] sm:$0xff]  ;;  %v2302_v5 = vld [vmem:[#allocation12 + $0x200] sm:$0xff]  ;;  %v2341_v50 = vld [vmem:[#allocation12 + $0x338] sm:$0xff] }
 0x2c3   :  { %v3527_v1 = vpack.c.bf16 %v2307_v0, %v2303_v28  ;;  %v3671_v60 = vpack.c.bf16 %v2341_v50, %v2337_v58  ;;  %v2340_v28 = vld [vmem:[#allocation12 + $0x330] sm:$0xff]  ;;  %v2343_v0 = vld [vmem:[#allocation12 + $0x348] sm:$0xff] }
 0x2c5   :  { %3510 = vmatpush1.bf16.msra.mxu0 %v3509_v6  ;;  %3638 = vmatpush1.bf16.msra.mxu1 %v3637_v11  ;;  %v2306_v6 = vld [vmem:[#allocation12 + $0x220] sm:$0xff]  ;;  %v2304_v11 = vld [vmem:[#allocation12 + $0x210] sm:$0xff] }
 0x2c6   :  { %3512 = vmatprep.subr.bf16.mxu0 %v3511_v10  ;;  %3640 = vmatprep.subr.bf16.mxu1 %v3639_v20  ;;  %v3529_v12 = vpack.c.bf16 %v2306_v6, %v2302_v5  ;;  %v3657_v7 = vpack.c.bf16 %v2308_v59, %v2304_v11  ;;  %v2315_v10 = vld [vmem:[#allocation12 + $0x268] sm:$0xff]  ;;  %v2310_v20 = vld [vmem:[#allocation12 + $0x240] sm:$0xff]  ;;  %v2349_v5 = vld [vmem:[#allocation12 + $0x378] sm:$0xff] }
 0x2c7   :  { %v3531_v17 = vpack.c.bf16 %v2315_v10, %v2311_v55  ;;  %v2346_v11 = vld [vmem:[#allocation12 + $0x360] sm:$0xff]  ;;  %v2344_v59 = vld [vmem:[#allocation12 + $0x350] sm:$0xff]  ;;  %v2351_v10 = vld [vmem:[#allocation12 + $0x388] sm:$0xff] }
 0x2c8   :  { %v2348_v55 = vld [vmem:[#allocation12 + $0x370] sm:$0xff]  ;;  %v3551_v16 = vpack.c.bf16 %v2355_v14, %v2351_v10 }
 0x2c9   :  { %3514 = vmatpush1.bf16.msra.mxu0 %v3513_v15  ;;  %3642 = vmatpush1.bf16.msra.mxu1 %v3641_v25  ;;  %v2314_v15 = vld [vmem:[#allocation12 + $0x260] sm:$0xff]  ;;  %v2312_v25 = vld [vmem:[#allocation12 + $0x250] sm:$0xff] }
 0x2ca   :  { %3516 = vmatprep.subr.bf16.mxu0 %v3515_v36  ;;  %3644 = vmatprep.subr.bf16.mxu1 %v3643_v42  ;;  %v3533_v23 = vpack.c.bf16 %v2314_v15, %v2310_v20  ;;  %v3661_v34 = vpack.c.bf16 %v2316_v27, %v2312_v25  ;;  %v2319_v36 = vld [vmem:[#allocation12 + $0x288] sm:$0xff]  ;;  %v2325_v42 = vld [vmem:[#allocation12 + $0x2b8] sm:$0xff]  ;;  %v2354_v25 = vld [vmem:[#allocation12 + $0x3a0] sm:$0xff] }
 0x2cb   :  { %v3535_v40 = vpack.c.bf16 %v2323_v38, %v2319_v36  ;;  %v3663_v30 = vpack.c.bf16 %v2325_v42, %v2321_v39  ;;  %v2353_v20 = vld [vmem:[#allocation12 + $0x398] sm:$0xff]  ;;  %v2352_v27 = vld [vmem:[#allocation12 + $0x390] sm:$0xff]  ;;  %v2359_v36 = vld [vmem:[#allocation12 + $0x3c8] sm:$0xff] }
 0x2cc   :  { %v2357_v15 = vld [vmem:[#allocation12 + $0x3b8] sm:$0xff]  ;;  %v2363_v38 = vld [vmem:[#allocation12 + $0x3e8] sm:$0xff] }
 0x2cd   :  { %3518 = vmatpush1.bf16.msra.mxu0 %v3517_v44  ;;  %3646 = vmatpush1.bf16.msra.mxu1 %v3645_v45  ;;  %v3537_v44 = vpack.c.bf16 %v2322_v21, %v2318_v2  ;;  %v2320_v45 = vld [vmem:[#allocation12 + $0x290] sm:$0xff]  ;;  %v2361_v39 = vld [vmem:[#allocation12 + $0x3d8] sm:$0xff]  ;;  %v2358_v21 = vld [vmem:[#allocation12 + $0x3c0] sm:$0xff] }
 0x2ce   :  { %3520 = vmatprep.subr.bf16.mxu0 %v3519_v52  ;;  %3648 = vmatprep.subr.bf16.mxu1 %v3647_v37  ;;  %v3665_v63 = vpack.c.bf16 %v2324_v49, %v2320_v45  ;;  %v2331_v52 = vld [vmem:[#allocation12 + $0x2e8] sm:$0xff]  ;;  %v2326_v37 = vld [vmem:[#allocation12 + $0x2c0] sm:$0xff]  ;;  %v2365_v2 = vld [vmem:[#allocation12 + $0x3f8] sm:$0xff] }
 0x2cf   :  { %v3539_v54 = vpack.c.bf16 %v2331_v52, %v2327_v51  ;;  %v2362_v45 = vld [vmem:[#allocation12 + $0x3e0] sm:$0xff]  ;;  %v2360_v49 = vld [vmem:[#allocation12 + $0x3d0] sm:$0xff] }
 0x2d0   :  { %v3557_v51 = vpack.c.bf16 %v2362_v45, %v2358_v21 }
 0x2d1   :  { %3522 = vmatpush1.bf16.msra.mxu0 %v3521_v41  ;;  %3650 = vmatpush1.bf16.msra.mxu1 %v3649_v18  ;;  %v2330_v41 = vld [vmem:[#allocation12 + $0x2e0] sm:$0xff]  ;;  %v2328_v18 = vld [vmem:[#allocation12 + $0x2d0] sm:$0xff] }
 0x2d2   :  { %3524 = vmatprep.subr.bf16.mxu0 %v3523_v29  ;;  %3652 = vmatprep.subr.bf16.mxu1 %v3651_v61  ;;  %v3541_v35 = vpack.c.bf16 %v2330_v41, %v2326_v37  ;;  %v3669_v9 = vpack.c.bf16 %v2332_v24, %v2328_v18  ;;  %v2339_v29 = vld [vmem:[#allocation12 + $0x328] sm:$0xff]  ;;  %v2334_v61 = vld [vmem:[#allocation12 + $0x300] sm:$0xff]  ;;  %v2373_v41 = vld [vmem:[#allocation12 + $0x438] sm:$0xff] }
 0x2d3   :  { %v3543_v43 = vpack.c.bf16 %v2339_v29, %v2335_v47 }
 0x2d5   :  { %3526 = vmatpush1.bf16.msra.mxu0 %v3525_v48  ;;  %3654 = vmatpush1.bf16.msra.mxu1 %v3653_v62  ;;  %v2338_v48 = vld [vmem:[#allocation12 + $0x320] sm:$0xff]  ;;  %v2336_v62 = vld [vmem:[#allocation12 + $0x310] sm:$0xff] }
 0x2d6   :  { %3528 = vmatprep.subr.bf16.mxu0 %v3527_v1  ;;  %3656 = vmatprep.subr.bf16.mxu1 %v3655_v8  ;;  %v3545_v46 = vpack.c.bf16 %v2338_v48, %v2334_v61  ;;  %v3673_v56 = vpack.c.bf16 %v2340_v28, %v2336_v62  ;;  %v2347_v1 = vld [vmem:[#allocation12 + $0x368] sm:$0xff]  ;;  %v3675_v8 = vpack.c.bf16 %v2349_v5, %v2345_v3 }
 0x2d7   :  { %v3547_v6 = vpack.c.bf16 %v2347_v1, %v2343_v0 }
 0x2d9   :  { %3530 = vmatpush1.bf16.msra.mxu0 %v3529_v12  ;;  %3658 = vmatpush1.bf16.msra.mxu1 %v3657_v7  ;;  %v2342_v12 = vld [vmem:[#allocation12 + $0x340] sm:$0xff] }
 0x2da   :  { %3532 = vmatprep.subr.bf16.mxu0 %v3531_v17  ;;  %3660 = vmatprep.subr.bf16.mxu1 %v3659_v22  ;;  %v3549_v7 = vpack.c.bf16 %v2346_v11, %v2342_v12  ;;  %v3677_v17 = vpack.c.bf16 %v2348_v55, %v2344_v59  ;;  %v2350_v22 = vld [vmem:[#allocation12 + $0x380] sm:$0xff] }
 0x2dd   :  { %3534 = vmatpush1.bf16.msra.mxu0 %v3533_v23  ;;  %3662 = vmatpush1.bf16.msra.mxu1 %v3661_v34  ;;  %v3679_v23 = vpack.c.bf16 %v2357_v15, %v2353_v20  ;;  %v2356_v34 = vld [vmem:[#allocation12 + $0x3b0] sm:$0xff] }
 0x2de   :  { %3536 = vmatprep.subr.bf16.mxu0 %v3535_v40  ;;  %3664 = vmatprep.subr.bf16.mxu1 %v3663_v30  ;;  %v3553_v40 = vpack.c.bf16 %v2354_v25, %v2350_v22  ;;  %v3681_v42 = vpack.c.bf16 %v2356_v34, %v2352_v27  ;;  %v3555_v30 = vpack.c.bf16 %v2363_v38, %v2359_v36 }
 0x2e1   :  { %3538 = vmatpush1.bf16.msra.mxu0 %v3537_v44  ;;  %3666 = vmatpush1.bf16.msra.mxu1 %v3665_v63  ;;  %v3683_v44 = vpack.c.bf16 %v2365_v2, %v2361_v39  ;;  %v2364_v63 = vld [vmem:[#allocation12 + $0x3f0] sm:$0xff] }
 0x2e2   :  { %3540 = vmatprep.subr.bf16.mxu0 %v3539_v54  ;;  %3668 = vmatprep.subr.bf16.mxu1 %v3667_v19  ;;  %v3685_v52 = vpack.c.bf16 %v2364_v63, %v2360_v49  ;;  %v2371_v54 = vld [vmem:[#allocation12 + $0x428] sm:$0xff]  ;;  %v3687_v19 = vpack.c.bf16 %v2373_v41, %v2369_v57 }
 0x2e3   :  { %v3559_v37 = vpack.c.bf16 %v2371_v54, %v2367_v53 }
 0x2e5   :  { %3542 = vmatpush1.bf16.msra.mxu0 %v3541_v35  ;;  %3670 = vmatpush1.bf16.msra.mxu1 %v3669_v9 }
 0x2e6   :  { %3544 = vmatprep.subr.bf16.mxu0 %v3543_v43  ;;  %3672 = vmatprep.subr.bf16.mxu1 %v3671_v60 }
 0x2e9   :  { %3546 = vmatpush1.bf16.msra.mxu0 %v3545_v46  ;;  %3674 = vmatpush1.bf16.msra.mxu1 %v3673_v56 }
 0x2ea   :  { %3548 = vmatprep.subr.bf16.mxu0 %v3547_v6  ;;  %3676 = vmatprep.subr.bf16.mxu1 %v3675_v8 }
 0x2ed   :  { %3550 = vmatpush1.bf16.msra.mxu0 %v3549_v7  ;;  %3678 = vmatpush1.bf16.msra.mxu1 %v3677_v17 }
 0x2ee   :  { %3552 = vmatprep.subr.bf16.mxu0 %v3551_v16  ;;  %3680 = vmatprep.subr.bf16.mxu1 %v3679_v23 }
 0x2f1   :  { %3554 = vmatpush1.bf16.msra.mxu0 %v3553_v40  ;;  %3682 = vmatpush1.bf16.msra.mxu1 %v3681_v42 }
 0x2f2   :  { %3556 = vmatprep.subr.bf16.mxu0 %v3555_v30  ;;  %3684 = vmatprep.subr.bf16.mxu1 %v3683_v44 }
 0x2f5   :  { %3558 = vmatpush1.bf16.msra.mxu0 %v3557_v51  ;;  %3686 = vmatpush1.bf16.msra.mxu1 %v3685_v52 }
 0x2f6   :  { %3560 = vmatprep.subr.bf16.mxu0 %v3559_v37  ;;  %3688 = vmatprep.subr.bf16.mxu1 %v3687_v19 }
 0x38b   :  { %v5220_v35 = vpop.f32.mrb[8].mxu0  ;;  %v5222_v18 = vpop.f32.mrb[8].mxu1 }
 0x38c   :  { %v2036_v24 = vsel %vm2035_vm4, %v5220_v35, 0.0  ;;  %v2064_v9 = vmul.f32 %v5220_v35, %v5220_v35  ;;  %v2050_v47 = vsel %vm2035_vm4, %v5222_v18, 0.0  ;;  %v2066_v29 = vmul.f32 %v5222_v18, %v5222_v18  ;;  %v5232_v58 = vpop.f32.mrb[9].mxu0  ;;  %v5234_v43 = vpop.f32.mrb[9].mxu1 }
 0x38d   :  { %v2037_v50 = vrot.slane %v2036_v24, 4  ;;  %v2051_v61 = vrot.slane %v2050_v47, 4  ;;  %v2043_v48 = vsel %vm2035_vm4, %v5232_v58, 0.0  ;;  %v2065_v60 = vmul.f32 %v5232_v58, %v5232_v58 }
 0x38e   :  { %v2068_v46 = vsel %vm2035_vm4, %v2064_v9, 0.0  ;;  %v2082_v62 = vsel %vm2035_vm4, %v2066_v29, 0.0  ;;  %v2044_v28 = vrot.slane %v2043_v48, 4  ;;  %v2057_v0 = vsel %vm2035_vm4, %v5234_v43, 0.0 }
 0x38f   :  { %v2038_v56 = vadd.f32 %v2037_v50, %v2036_v24  ;;  %v2069_v1 = vrot.slane %v2068_v46, 4  ;;  %v2052_v3 = vadd.f32 %v2051_v61, %v2050_v47  ;;  %v2083_v5 = vrot.slane %v2082_v62, 4 }
 0x390   :  { %v2045_v6 = vadd.f32 %v2044_v28, %v2043_v48  ;;  %v2075_v8 = vsel %vm2035_vm4, %v2065_v60, 0.0  ;;  %v2058_v12 = vrot.slane %v2057_v0, 4  ;;  %v2067_v11 = vmul.f32 %v5234_v43, %v5234_v43 }
 0x391   :  { %v2039_v59 = vrot.slane %v2038_v56, 2  ;;  %v2070_v7 = vadd.f32 %v2069_v1, %v2068_v46  ;;  %v2053_v55 = vrot.slane %v2052_v3, 2  ;;  %v2084_v10 = vadd.f32 %v2083_v5, %v2082_v62 }
 0x392   :  { %v2046_v14 = vrot.slane %v2045_v6, 2  ;;  %v2076_v17 = vrot.slane %v2075_v8, 4  ;;  %v2059_v16 = vadd.f32 %v2058_v12, %v2057_v0  ;;  %v2089_v20 = vsel %vm2035_vm4, %v2067_v11, 0.0 }
 0x393   :  { %v2040_v15 = vadd.f32 %v2039_v59, %v2038_v56  ;;  %v2071_v22 = vrot.slane %v2070_v7, 2  ;;  %v2054_v23 = vadd.f32 %v2053_v55, %v2052_v3  ;;  %v2085_v25 = vrot.slane %v2084_v10, 2 }
 0x394   :  { %v2047_v27 = vadd.f32 %v2046_v14, %v2045_v6  ;;  %v2077_v34 = vadd.f32 %v2076_v17, %v2075_v8  ;;  %v2060_v36 = vrot.slane %v2059_v16, 2  ;;  %v2090_v38 = vrot.slane %v2089_v20, 4 }
 0x395   :  { %v2041_v39 = vrot.slane %v2040_v15, 1  ;;  %v2072_v40 = vadd.f32 %v2071_v22, %v2070_v7  ;;  %v2055_v42 = vrot.slane %v2054_v23, 1  ;;  %v2086_v2 = vadd.f32 %v2085_v25, %v2084_v10 }
 0x396   :  { %v2048_v21 = vrot.slane %v2047_v27, 1  ;;  %v2078_v30 = vrot.slane %v2077_v34, 2  ;;  %v2061_v44 = vadd.f32 %v2060_v36, %v2059_v16  ;;  %v2091_v45 = vadd.f32 %v2090_v38, %v2089_v20  ;;  %v2033_v38 = vld [vmem:[#allocation9] sm:$0xf] }
 0x397   :  { %v2042_v49 = vadd.f32 %v2041_v39, %v2040_v15  ;;  %v2073_v63 = vrot.slane %v2072_v40, 1  ;;  %v2056_v51 = vadd.f32 %v2055_v42, %v2054_v23  ;;  %v2087_v52 = vrot.slane %v2086_v2, 1 }
 0x398   :  { %v2049_v53 = vadd.f32 %v2048_v21, %v2047_v27  ;;  %v2079_v54 = vadd.f32 %v2078_v30, %v2077_v34  ;;  %v2062_v57 = vrot.slane %v2061_v44, 1  ;;  %v2092_v37 = vrot.slane %v2091_v45, 2 }
 0x399   :  { %v2074_v41 = vadd.f32 %v2073_v63, %v2072_v40  ;;  %v2096_v19 = vmul.f32 0.5, %v2042_v49  ;;  %v2088_v24 = vadd.f32 %v2087_v52, %v2086_v2  ;;  %v2098_v9 = vmul.f32 0.5, %v2056_v51 }
 0x39a   :  { %v2080_v47 = vrot.slane %v2079_v54, 1  ;;  %v2097_v29 = vmul.f32 0.5, %v2049_v53  ;;  %v2063_v50 = vadd.f32 %v2062_v57, %v2061_v44  ;;  %v2093_v61 = vadd.f32 %v2092_v37, %v2091_v45 }
 0x39b   :  { %v2100_v48 = vmul.f32 0.5, %v2074_v41  ;;  %v2104_v60 = vmul.f32 %v2096_v19, %v2096_v19  ;;  %v2102_v46 = vmul.f32 0.5, %v2088_v24  ;;  %v2106_v62 = vmul.f32 %v2098_v9, %v2098_v9 }
 0x39c   :  { %v2081_v28 = vadd.f32 %v2080_v47, %v2079_v54  ;;  %v2105_v0 = vmul.f32 %v2097_v29, %v2097_v29  ;;  %v2094_v56 = vrot.slane %v2093_v61, 1  ;;  %v2099_v1 = vmul.f32 0.5, %v2063_v50  ;;  %v2034_v50 = vld [vmem:[#allocation11] sm:$0xf] }
 0x39d   :  { %v2108_v3 = vsub.f32 %v2100_v48, %v2104_v60  ;;  %v2110_v5 = vsub.f32 %v2102_v46, %v2106_v62  ;;  %v2368_v48 = vld [vmem:[#allocation12 + $0x410] sm:$0xff] }
 0x39e   :  { %v2101_v6 = vmul.f32 0.5, %v2081_v28  ;;  %v2095_v8 = vadd.f32 %v2094_v56, %v2093_v61  ;;  %v2107_v12 = vmul.f32 %v2099_v1, %v2099_v1  ;;  %v2372_v60 = vld [vmem:[#allocation12 + $0x430] sm:$0xff] }
 0x39f   :  { %v2112_v11 = vadd.f32 1e-05, %v2108_v3  ;;  %v2114_v59 = vadd.f32 1e-05, %v2110_v5  ;;  %v2381_v3 = vld [vmem:[#allocation12 + $0x478] sm:$0xff] }
 0x3a0   :  { %v2109_v7 = vsub.f32 %v2101_v6, %v2105_v0  ;;  %v2103_v55 = vmul.f32 0.5, %v2095_v8  ;;  %v2375_v0 = vld [vmem:[#allocation12 + $0x448] sm:$0xff] }
 0x3a1   :  { %3817 = vrsqrt.f32 %v2112_v11  ;;  %v2374_v11 = vld [vmem:[#allocation12 + $0x440] sm:$0xff] }
 0x3a2   :  { %v2113_v10 = vadd.f32 1e-05, %v2109_v7  ;;  %v2111_v14 = vsub.f32 %v2103_v55, %v2107_v12  ;;  %3819 = vrsqrt.f32 %v2114_v59  ;;  %v3689_v12 = vpack.c.bf16 %v2372_v60, %v2368_v48  ;;  %v2378_v59 = vld [vmem:[#allocation12 + $0x460] sm:$0xff]  ;;  %v2376_v7 = vld [vmem:[#allocation12 + $0x450] sm:$0xff]  ;;  %v2409_v48 = vld [vmem:[#allocation12 + $0x558] sm:$0xff] }
 0x3a3   :  { %v2380_v55 = vld [vmem:[#allocation12 + $0x470] sm:$0xff]  ;;  %v2413_v60 = vld [vmem:[#allocation12 + $0x578] sm:$0xff] }
 0x3a4   :  { %3821 = vrsqrt.f32 %v2113_v10  ;;  %v2115_v17 = vadd.f32 1e-05, %v2111_v14  ;;  %v2383_v10 = vld [vmem:[#allocation12 + $0x488] sm:$0xff] }
 0x3a6   :  { %3823 = vrsqrt.f32 %v2115_v17 }
 0x3ab   :  { %v3818_v16 = vpop.eup %3817 }
 0x3ac   :  { %v3820_v20 = vpop.eup %3819 }
 0x3ae   :  { %v3822_v15 = vpop.eup %3821 }
 0x3af   :  { %v2124_v22 = vcombine.low %v3818_v16, %v3822_v15  ;;  %v2387_v16 = vld [vmem:[#allocation12 + $0x4a8] sm:$0xff]  ;;  %v2389_v15 = vld [vmem:[#allocation12 + $0x4b8] sm:$0xff] }
 0x3b0   :  { %v3824_v23 = vpop.eup %3823 }
 0x3b1   :  { %v2125_v25 = vcombine.low %v3820_v20, %v3824_v23  ;;  %v2132_v27 = vrot.slane %v2124_v22, %v4762_v13  ;;  %v2385_v20 = vld [vmem:[#allocation12 + $0x498] sm:$0xff]  ;;  %v3565_v23 = vpack.c.bf16 %v2378_v59, %v2374_v11 }
 0x3b2   :  { %v2421_v11 = vld [vmem:[#allocation12 + $0x5b8] sm:$0xff] }
 0x3b3   :  { %v2139_v34 = vrot.slane %v2125_v25, %v4762_v13  ;;  %v3693_v25 = vpack.c.bf16 %v2380_v55, %v2376_v7  ;;  %v2414_v55 = vld [vmem:[#allocation12 + $0x580] sm:$0xff] }
 0x3b5   :  { %v2140_v36 = vcombine.low %v2132_v27, %v2139_v34  ;;  %v2382_v27 = vld [vmem:[#allocation12 + $0x480] sm:$0xff] }
 0x3b6   :  { %v2386_v34 = vld [vmem:[#allocation12 + $0x4a0] sm:$0xff] }
 0x3b7   :  { %v2147_v39 = vrot.slane %v2140_v36, %v4762_v13  ;;  %v3567_v36 = vpack.c.bf16 %v2387_v16, %v2383_v10  ;;  %v2418_v10 = vld [vmem:[#allocation12 + $0x5a0] sm:$0xff]  ;;  %v2416_v16 = vld [vmem:[#allocation12 + $0x590] sm:$0xff] }
 0x3b9   :  { %v2149_v40 = vmul.f32 %v2147_v39, %v2033_v38  ;;  %v3695_v38 = vpack.c.bf16 %v2389_v15, %v2385_v20  ;;  %v2384_v39 = vld [vmem:[#allocation12 + $0x490] sm:$0xff]  ;;  %v2423_v15 = vld [vmem:[#allocation12 + $0x5c8] sm:$0xff] }
 0x3ba   :  { %v2420_v20 = vld [vmem:[#allocation12 + $0x5b0] sm:$0xff] }
 0x3bb   :  { %v2162_v42 = vrot.slane %v2149_v40, %v4774_v32  ;;  %v2166_v2 = vrot.slane %v2149_v40, %v4777_v33  ;;  %v2154_v21 = vrot.slane %v2149_v40, %v4767_v26  ;;  %v2158_v30 = vrot.slane %v2149_v40, %v4771_v31  ;;  %v2388_v40 = vld [vmem:[#allocation12 + $0x4b0] sm:$0xff] }
 0x3bd   :  { %v2173_v44 = vmul.f32 %v2162_v42, %v2098_v9  ;;  %v2174_v45 = vmul.f32 %v2166_v2, %v2099_v1  ;;  %v2208_v49 = vmul.f32 %v2166_v2, %v5234_v43  ;;  %v2171_v63 = vmul.f32 %v2154_v21, %v2096_v19  ;;  %v2377_v1 = vld [vmem:[#allocation12 + $0x458] sm:$0xff]  ;;  %v2395_v2 = vld [vmem:[#allocation12 + $0x4e8] sm:$0xff] }
 0x3be   :  { %v2172_v51 = vmul.f32 %v2158_v30, %v2097_v29  ;;  %v2206_v52 = vmul.f32 %v2158_v30, %v5232_v58  ;;  %v2205_v53 = vmul.f32 %v2154_v21, %v5220_v35  ;;  %v2207_v54 = vmul.f32 %v2162_v42, %v5222_v18  ;;  %v2366_v58 = vld [vmem:[#allocation12 + $0x400] sm:$0xff]  ;;  %v2391_v42 = vld [vmem:[#allocation12 + $0x4c8] sm:$0xff]  ;;  %v2393_v21 = vld [vmem:[#allocation12 + $0x4d8] sm:$0xff] }
 0x3bf   :  { %v2180_v57 = vcombine.low %v2173_v44, %v2174_v45  ;;  %v2370_v29 = vld [vmem:[#allocation12 + $0x420] sm:$0xff]  ;;  %v3691_v17 = vpack.c.bf16 %v2381_v3, %v2377_v1  ;;  %v2397_v30 = vld [vmem:[#allocation12 + $0x4f8] sm:$0xff]  ;;  %v3569_v44 = vpack.c.bf16 %v2386_v34, %v2382_v27  ;;  %v3697_v45 = vpack.c.bf16 %v2388_v40, %v2384_v39  ;;  %v2408_v3 = vld [vmem:[#allocation12 + $0x550] sm:$0xff] }
 0x3c0   :  { %v2179_v37 = vcombine.low %v2171_v63, %v2172_v51  ;;  %v3561_v8 = vpack.c.bf16 %v2370_v29, %v2366_v58  ;;  %v2394_v63 = vld [vmem:[#allocation12 + $0x4e0] sm:$0xff]  ;;  %v3571_v51 = vpack.c.bf16 %v2395_v2, %v2391_v42  ;;  %v2400_v58 = vld [vmem:[#allocation12 + $0x510] sm:$0xff]  ;;  %v2411_v29 = vld [vmem:[#allocation12 + $0x568] sm:$0xff]  ;;  %v3707_v1 = vpack.c.bf16 %v2413_v60, %v2409_v48 }
 0x3c1   :  { %v2194_v41 = vrot.slane %v2180_v57, %v4762_v13  ;;  %v2399_v57 = vld [vmem:[#allocation12 + $0x508] sm:$0xff]  ;;  %v3585_v27 = vpack.c.bf16 %v2418_v10, %v2414_v55  ;;  %v3713_v34 = vpack.c.bf16 %v2420_v20, %v2416_v16  ;;  %v2424_v42 = vld [vmem:[#allocation12 + $0x5d0] sm:$0xff] }
 0x3c2   :  { %v2187_v24 = vrot.slane %v2179_v37, %v4762_v13  ;;  %v2403_v37 = vld [vmem:[#allocation12 + $0x528] sm:$0xff]  ;;  %v2428_v2 = vld [vmem:[#allocation12 + $0x5f0] sm:$0xff] }
 0x3c3   :  { %v2447_v48 = vld [vmem:[#allocation12 + $0x688] sm:$0xff] }
 0x3c4   :  { %v2195_v47 = vcombine.low %v2187_v24, %v2194_v41  ;;  %v2401_v41 = vld [vmem:[#allocation12 + $0x518] sm:$0xff]  ;;  %v2451_v60 = vld [vmem:[#allocation12 + $0x6a8] sm:$0xff] }
 0x3c5   :  { %v2405_v24 = vld [vmem:[#allocation12 + $0x538] sm:$0xff] }
 0x3c6   :  { %v2202_v9 = vrot.slane %v2195_v47, %v4762_v13  ;;  %v2379_v13 = vld [vmem:[#allocation12 + $0x468] sm:$0xff] }
 0x3c7   :  { %v3563_v14 = vpack.c.bf16 %v2379_v13, %v2375_v0  ;;  %v2410_v0 = vld [vmem:[#allocation12 + $0x560] sm:$0xff] }
 0x3c8   :  { %v2204_v61 = vsub.f32 %v2034_v50, %v2202_v9  ;;  %v2398_v9 = vld [vmem:[#allocation12 + $0x500] sm:$0xff] }
 0x3ca   :  { %v2217_v43 = vrot.slane %v2204_v61, %v4771_v31  ;;  %v2213_v19 = vrot.slane %v2204_v61, %v4767_v26  ;;  %v2225_v35 = vrot.slane %v2204_v61, %v4777_v33  ;;  %v2221_v18 = vrot.slane %v2204_v61, %v4774_v32  ;;  %v2402_v61 = vld [vmem:[#allocation12 + $0x520] sm:$0xff] }
 0x3cc   :  { %v2231_v46 = vadd.f32 %v2217_v43, %v2206_v52  ;;  %v2230_v62 = vadd.f32 %v2213_v19, %v2205_v53  ;;  %v2233_v28 = vadd.f32 %v2225_v35, %v2208_v49  ;;  %v5266_v56 = vadd.f32 %v2221_v18, %v2207_v54  ;;  %v2390_v49 = vld [vmem:[#allocation12 + $0x4c0] sm:$0xff]  ;;  %v2392_v53 = vld [vmem:[#allocation12 + $0x4d0] sm:$0xff]  ;;  %v2407_v18 = vld [vmem:[#allocation12 + $0x548] sm:$0xff] }
 0x3cd   :  { %v3699_v52 = vpack.c.bf16 %v2397_v30, %v2393_v21  ;;  %v2396_v54 = vld [vmem:[#allocation12 + $0x4f0] sm:$0xff]  ;;  %v3573_v47 = vpack.c.bf16 %v2394_v63, %v2390_v49  ;;  %v3575_v43 = vpack.c.bf16 %v2403_v37, %v2399_v57  ;;  %v3703_v19 = vpack.c.bf16 %v2405_v24, %v2401_v41  ;;  %v2431_v21 = vld [vmem:[#allocation12 + $0x608] sm:$0xff] }
 0x3ce   :  { %v2235_v5 = vmax.f32 %v2231_v46, 0.0  ;;  %v2234_v6 = vmax.f32 %v2230_v62, 0.0  ;;  %v2237_v22 = vmax.f32 %v2233_v28, 0.0  ;;  %v3701_v50 = vpack.c.bf16 %v2396_v54, %v2392_v53  ;;  %v2404_v35 = vld [vmem:[#allocation12 + $0x530] sm:$0xff]  ;;  %v2406_v28 = vld [vmem:[#allocation12 + $0x540] sm:$0xff]  ;;  %v2435_v30 = vld [vmem:[#allocation12 + $0x628] sm:$0xff] }
 0x3cf   :  { %v3577_v46 = vpack.c.bf16 %v2402_v61, %v2398_v9  ;;  %v3705_v62 = vpack.c.bf16 %v2404_v35, %v2400_v58  ;;  %v3579_v13 = vpack.c.bf16 %v2411_v29, %v2407_v18  ;;  %v3581_v59 = vpack.c.bf16 %v2410_v0, %v2406_v28  ;;  %v2432_v57 = vld [vmem:[#allocation12 + $0x610] sm:$0xff]  ;;  %v2439_v41 = vld [vmem:[#allocation12 + $0x648] sm:$0xff] }
 0x3d0   :  { %2580 = vmatprep.mubr.f32.mxu0 %v2235_v5  ;;  %2722 = vmatprep.mubr.f32.mxu1 %v2235_v5  ;;  %v2412_v5 = vld [vmem:[#allocation12 + $0x570] sm:$0xff]  ;;  %v3717_v63 = vpack.c.bf16 %v2428_v2, %v2424_v42  ;;  %v3591_v53 = vpack.c.bf16 %v2435_v30, %v2431_v21  ;;  %v2443_v24 = vld [vmem:[#allocation12 + $0x668] sm:$0xff] }
 0x3d1   :  { %2581 = vmatmul.mubr.f32.vlgmr.msra.gmra.mrb[10].mxu0 %v2234_v6  ;;  %2723 = vmatmul.mubr.f32.vlgmr.msra.gmra.mrb[10].mxu1 %v2234_v6  ;;  %v2415_v6 = vld [vmem:[#allocation12 + $0x588] sm:$0xff]  ;;  %v3709_v7 = vpack.c.bf16 %v2412_v5, %v2408_v3  ;;  %v2436_v37 = vld [vmem:[#allocation12 + $0x630] sm:$0xff]  ;;  %v3595_v58 = vpack.c.bf16 %v2443_v24, %v2439_v41  ;;  %v3599_v3 = vpack.c.bf16 %v2451_v60, %v2447_v48 }
 0x3d2   :  { %3562 = vmatpush1.bf16.msra.mxu0 %v3561_v8  ;;  %3690 = vmatpush1.bf16.msra.mxu1 %v3689_v12  ;;  %v2419_v8 = vld [vmem:[#allocation12 + $0x5a8] sm:$0xff]  ;;  %v2417_v12 = vld [vmem:[#allocation12 + $0x598] sm:$0xff]  ;;  %v3721_v61 = vpack.c.bf16 %v2436_v37, %v2432_v57  ;;  %v2440_v18 = vld [vmem:[#allocation12 + $0x650] sm:$0xff] }
 0x3d3   :  { %2651 = vmatprep.mubr.f32.mxu0 %v2237_v22  ;;  %2793 = vmatprep.mubr.f32.mxu1 %v2237_v22  ;;  %v2427_v22 = vld [vmem:[#allocation12 + $0x5e8] sm:$0xff]  ;;  %v2444_v29 = vld [vmem:[#allocation12 + $0x670] sm:$0xff] }
 0x3d4   :  { %3564 = vmatprep.subr.bf16.mxu0 %v3563_v14  ;;  %3692 = vmatprep.subr.bf16.mxu1 %v3691_v17  ;;  %v3583_v14 = vpack.c.bf16 %v2419_v8, %v2415_v6  ;;  %v3711_v17 = vpack.c.bf16 %v2421_v11, %v2417_v12  ;;  %v3587_v39 = vpack.c.bf16 %v2427_v22, %v2423_v15  ;;  %v2448_v6 = vld [vmem:[#allocation12 + $0x690] sm:$0xff]  ;;  %v2455_v12 = vld [vmem:[#allocation12 + $0x6c8] sm:$0xff] }
 0x3d5   :  { %v3725_v0 = vpack.c.bf16 %v2444_v29, %v2440_v18  ;;  %v2452_v8 = vld [vmem:[#allocation12 + $0x6b0] sm:$0xff]  ;;  %v2459_v11 = vld [vmem:[#allocation12 + $0x6e8] sm:$0xff] }
 0x3d6   :  { %3566 = vmatpush1.bf16.msra.mxu0 %v3565_v23  ;;  %3694 = vmatpush1.bf16.msra.mxu1 %v3693_v25  ;;  %v2425_v23 = vld [vmem:[#allocation12 + $0x5d8] sm:$0xff]  ;;  %v3729_v10 = vpack.c.bf16 %v2452_v8, %v2448_v6  ;;  %v3603_v16 = vpack.c.bf16 %v2459_v11, %v2455_v12  ;;  %v2456_v15 = vld [vmem:[#allocation12 + $0x6d0] sm:$0xff]  ;;  %v2490_v8 = vld [vmem:[#allocation12 + $0x7e0] sm:$0xff] }
 0x3d7   :  { %3568 = vmatprep.subr.bf16.mxu0 %v3567_v36  ;;  %3696 = vmatprep.subr.bf16.mxu1 %v3695_v38  ;;  %v2429_v25 = vld [vmem:[#allocation12 + $0x5f8] sm:$0xff]  ;;  %v2422_v36 = vld [vmem:[#allocation12 + $0x5c0] sm:$0xff]  ;;  %v2460_v22 = vld [vmem:[#allocation12 + $0x6f0] sm:$0xff] }
 0x3d8   :  { %v2426_v38 = vld [vmem:[#allocation12 + $0x5e0] sm:$0xff]  ;;  %v3715_v40 = vpack.c.bf16 %v2429_v25, %v2425_v23  ;;  %v2463_v23 = vld [vmem:[#allocation12 + $0x708] sm:$0xff]  ;;  %v2464_v21 = vld [vmem:[#allocation12 + $0x710] sm:$0xff] }
 0x3d9   :  { %v3589_v49 = vpack.c.bf16 %v2426_v38, %v2422_v36  ;;  %v2467_v25 = vld [vmem:[#allocation12 + $0x728] sm:$0xff]  ;;  %v3733_v38 = vpack.c.bf16 %v2460_v22, %v2456_v15  ;;  %v2468_v30 = vld [vmem:[#allocation12 + $0x730] sm:$0xff] }
 0x3da   :  { %3570 = vmatpush1.bf16.msra.mxu0 %v3569_v44  ;;  %3698 = vmatpush1.bf16.msra.mxu1 %v3697_v45  ;;  %v2433_v44 = vld [vmem:[#allocation12 + $0x618] sm:$0xff]  ;;  %v3607_v42 = vpack.c.bf16 %v2467_v25, %v2463_v23  ;;  %v2472_v41 = vld [vmem:[#allocation12 + $0x750] sm:$0xff] }
 0x3db   :  { %3572 = vmatprep.subr.bf16.mxu0 %v3571_v51  ;;  %3700 = vmatprep.subr.bf16.mxu1 %v3699_v52  ;;  %v2437_v45 = vld [vmem:[#allocation12 + $0x638] sm:$0xff]  ;;  %v2430_v51 = vld [vmem:[#allocation12 + $0x600] sm:$0xff]  ;;  %v2476_v24 = vld [vmem:[#allocation12 + $0x770] sm:$0xff] }
 0x3dc   :  { %v2434_v52 = vld [vmem:[#allocation12 + $0x620] sm:$0xff]  ;;  %v3719_v54 = vpack.c.bf16 %v2437_v45, %v2433_v44  ;;  %v2471_v44 = vld [vmem:[#allocation12 + $0x748] sm:$0xff]  ;;  %v2480_v48 = vld [vmem:[#allocation12 + $0x790] sm:$0xff] }
 0x3dd   :  { %v3593_v9 = vpack.c.bf16 %v2434_v52, %v2430_v51  ;;  %v2475_v45 = vld [vmem:[#allocation12 + $0x768] sm:$0xff]  ;;  %v3737_v52 = vpack.c.bf16 %v2468_v30, %v2464_v21  ;;  %v2484_v60 = vld [vmem:[#allocation12 + $0x7b0] sm:$0xff] }
 0x3de   :  { %3574 = vmatpush1.bf16.msra.mxu0 %v3573_v47  ;;  %3702 = vmatpush1.bf16.msra.mxu1 %v3701_v50  ;;  %v2441_v47 = vld [vmem:[#allocation12 + $0x658] sm:$0xff]  ;;  %v3611_v57 = vpack.c.bf16 %v2475_v45, %v2471_v44  ;;  %v2488_v12 = vld [vmem:[#allocation12 + $0x7d0] sm:$0xff] }
 0x3df   :  { %3576 = vmatprep.subr.bf16.mxu0 %v3575_v43  ;;  %3704 = vmatprep.subr.bf16.mxu1 %v3703_v19  ;;  %v2445_v50 = vld [vmem:[#allocation12 + $0x678] sm:$0xff]  ;;  %v2438_v43 = vld [vmem:[#allocation12 + $0x640] sm:$0xff]  ;;  %v2492_v11 = vld [vmem:[#allocation12 + $0x7f0] sm:$0xff] }
 0x3e0   :  { %v2442_v19 = vld [vmem:[#allocation12 + $0x660] sm:$0xff]  ;;  %v3723_v35 = vpack.c.bf16 %v2445_v50, %v2441_v47  ;;  %v2479_v47 = vld [vmem:[#allocation12 + $0x788] sm:$0xff] }
 0x3e1   :  { %v3597_v28 = vpack.c.bf16 %v2442_v19, %v2438_v43  ;;  %v2483_v50 = vld [vmem:[#allocation12 + $0x7a8] sm:$0xff]  ;;  %v3741_v19 = vpack.c.bf16 %v2476_v24, %v2472_v41 }
 0x3e2   :  { %3578 = vmatpush1.bf16.msra.mxu0 %v3577_v46  ;;  %3706 = vmatpush1.bf16.msra.mxu1 %v3705_v62  ;;  %v2449_v46 = vld [vmem:[#allocation12 + $0x698] sm:$0xff]  ;;  %v3615_v18 = vpack.c.bf16 %v2483_v50, %v2479_v47 }
 0x3e3   :  { %3580 = vmatprep.subr.bf16.mxu0 %v3579_v13  ;;  %3708 = vmatprep.subr.bf16.mxu1 %v3707_v1  ;;  %v2453_v62 = vld [vmem:[#allocation12 + $0x6b8] sm:$0xff]  ;;  %v2446_v13 = vld [vmem:[#allocation12 + $0x680] sm:$0xff] }
 0x3e4   :  { %v2450_v1 = vld [vmem:[#allocation12 + $0x6a0] sm:$0xff]  ;;  %v3727_v5 = vpack.c.bf16 %v2453_v62, %v2449_v46  ;;  %v2487_v46 = vld [vmem:[#allocation12 + $0x7c8] sm:$0xff] }
 0x3e5   :  { %v3601_v55 = vpack.c.bf16 %v2450_v1, %v2446_v13  ;;  %v2491_v62 = vld [vmem:[#allocation12 + $0x7e8] sm:$0xff]  ;;  %v3745_v1 = vpack.c.bf16 %v2484_v60, %v2480_v48 }
 0x3e6   :  { %3582 = vmatpush1.bf16.msra.mxu0 %v3581_v59  ;;  %3710 = vmatpush1.bf16.msra.mxu1 %v3709_v7  ;;  %v2457_v59 = vld [vmem:[#allocation12 + $0x6d8] sm:$0xff] }
 0x3e7   :  { %3584 = vmatprep.subr.bf16.mxu0 %v3583_v14  ;;  %3712 = vmatprep.subr.bf16.mxu1 %v3711_v17  ;;  %v2461_v7 = vld [vmem:[#allocation12 + $0x6f8] sm:$0xff]  ;;  %v2454_v14 = vld [vmem:[#allocation12 + $0x6c0] sm:$0xff] }
 0x3e8   :  { %v2458_v17 = vld [vmem:[#allocation12 + $0x6e0] sm:$0xff]  ;;  %v3731_v20 = vpack.c.bf16 %v2461_v7, %v2457_v59  ;;  %v3749_v7 = vpack.c.bf16 %v2492_v11, %v2488_v12 }
 0x3e9   :  { %v3605_v36 = vpack.c.bf16 %v2458_v17, %v2454_v14 }
 0x3ea   :  { %3586 = vmatpush1.bf16.msra.mxu0 %v3585_v27  ;;  %3714 = vmatpush1.bf16.msra.mxu1 %v3713_v34  ;;  %v2465_v27 = vld [vmem:[#allocation12 + $0x718] sm:$0xff] }
 0x3eb   :  { %3588 = vmatprep.subr.bf16.mxu0 %v3587_v39  ;;  %3716 = vmatprep.subr.bf16.mxu1 %v3715_v40  ;;  %v2469_v34 = vld [vmem:[#allocation12 + $0x738] sm:$0xff]  ;;  %v2462_v39 = vld [vmem:[#allocation12 + $0x700] sm:$0xff] }
 0x3ec   :  { %v2466_v40 = vld [vmem:[#allocation12 + $0x720] sm:$0xff]  ;;  %v3735_v2 = vpack.c.bf16 %v2469_v34, %v2465_v27 }
 0x3ed   :  { %v3609_v51 = vpack.c.bf16 %v2466_v40, %v2462_v39 }
 0x3ee   :  { %3590 = vmatpush1.bf16.msra.mxu0 %v3589_v49  ;;  %3718 = vmatpush1.bf16.msra.mxu1 %v3717_v63  ;;  %v2473_v49 = vld [vmem:[#allocation12 + $0x758] sm:$0xff] }
 0x3ef   :  { %3592 = vmatprep.subr.bf16.mxu0 %v3591_v53  ;;  %3720 = vmatprep.subr.bf16.mxu1 %v3719_v54  ;;  %v2477_v63 = vld [vmem:[#allocation12 + $0x778] sm:$0xff]  ;;  %v2470_v53 = vld [vmem:[#allocation12 + $0x740] sm:$0xff] }
 0x3f0   :  { %v2474_v54 = vld [vmem:[#allocation12 + $0x760] sm:$0xff]  ;;  %v3739_v37 = vpack.c.bf16 %v2477_v63, %v2473_v49 }
 0x3f1   :  { %v3613_v43 = vpack.c.bf16 %v2474_v54, %v2470_v53 }
 0x3f2   :  { %3594 = vmatpush1.bf16.msra.mxu0 %v3593_v9  ;;  %3722 = vmatpush1.bf16.msra.mxu1 %v3721_v61  ;;  %v2481_v9 = vld [vmem:[#allocation12 + $0x798] sm:$0xff] }
 0x3f3   :  { %3596 = vmatprep.subr.bf16.mxu0 %v3595_v58  ;;  %3724 = vmatprep.subr.bf16.mxu1 %v3723_v35  ;;  %v2485_v61 = vld [vmem:[#allocation12 + $0x7b8] sm:$0xff]  ;;  %v2478_v58 = vld [vmem:[#allocation12 + $0x780] sm:$0xff] }
 0x3f4   :  { %v2482_v35 = vld [vmem:[#allocation12 + $0x7a0] sm:$0xff]  ;;  %v3743_v29 = vpack.c.bf16 %v2485_v61, %v2481_v9 }
 0x3f5   :  { %v3617_v13 = vpack.c.bf16 %v2482_v35, %v2478_v58 }
 0x3f6   :  { %3598 = vmatpush1.bf16.msra.mxu0 %v3597_v28  ;;  %3726 = vmatpush1.bf16.msra.mxu1 %v3725_v0  ;;  %v2489_v28 = vld [vmem:[#allocation12 + $0x7d8] sm:$0xff] }
 0x3f7   :  { %3600 = vmatprep.subr.bf16.mxu0 %v3599_v3  ;;  %3728 = vmatprep.subr.bf16.mxu1 %v3727_v5  ;;  %v2493_v0 = vld [vmem:[#allocation12 + $0x7f8] sm:$0xff]  ;;  %v2486_v3 = vld [vmem:[#allocation12 + $0x7c0] sm:$0xff]  ;;  %v3619_v5 = vpack.c.bf16 %v2491_v62, %v2487_v46 }
 0x3f8   :  { %v3747_v6 = vpack.c.bf16 %v2493_v0, %v2489_v28  ;;  %v3621_v59 = vpack.c.bf16 %v2490_v8, %v2486_v3 }
 0x3fa   :  { %3602 = vmatpush1.bf16.msra.mxu0 %v3601_v55  ;;  %3730 = vmatpush1.bf16.msra.mxu1 %v3729_v10  ;;  %v2236_v55 = vmax.f32 %v5266_v56, 0.0 }
 0x3fb   :  { %3604 = vmatprep.subr.bf16.mxu0 %v3603_v16  ;;  %3732 = vmatprep.subr.bf16.mxu1 %v3731_v20 }
 0x3fe   :  { %3606 = vmatpush1.bf16.msra.mxu0 %v3605_v36  ;;  %3734 = vmatpush1.bf16.msra.mxu1 %v3733_v38 }
 0x3ff   :  { %3608 = vmatprep.subr.bf16.mxu0 %v3607_v42  ;;  %3736 = vmatprep.subr.bf16.mxu1 %v3735_v2 }
 0x402   :  { %3610 = vmatpush1.bf16.msra.mxu0 %v3609_v51  ;;  %3738 = vmatpush1.bf16.msra.mxu1 %v3737_v52 }
 0x403   :  { %3612 = vmatprep.subr.bf16.mxu0 %v3611_v57  ;;  %3740 = vmatprep.subr.bf16.mxu1 %v3739_v37 }
 0x406   :  { %3614 = vmatpush1.bf16.msra.mxu0 %v3613_v43  ;;  %3742 = vmatpush1.bf16.msra.mxu1 %v3741_v19 }
 0x407   :  { %3616 = vmatprep.subr.bf16.mxu0 %v3615_v18  ;;  %3744 = vmatprep.subr.bf16.mxu1 %v3743_v29 }
 0x40a   :  { %3618 = vmatpush1.bf16.msra.mxu0 %v3617_v13  ;;  %3746 = vmatpush1.bf16.msra.mxu1 %v3745_v1 }
 0x40b   :  { %3620 = vmatprep.subr.bf16.mxu0 %v3619_v5  ;;  %3748 = vmatprep.subr.bf16.mxu1 %v3747_v6 }
 0x40e   :  { %3622 = vmatpush1.bf16.msra.mxu0 %v3621_v59  ;;  %3750 = vmatpush1.bf16.msra.mxu1 %v3749_v7 }
 0x411   :  { %2652 = vmatmul.mubr.f32.vlgmr.msra.gmra.mrb[10].mxu0 %v2236_v55  ;;  %2794 = vmatmul.mubr.f32.vlgmr.msra.gmra.mrb[10].mxu1 %v2236_v55 }
 0x412   :  { %3990 = shalt.err (!%p3987_p4)
}
 0x413   :  { %s3991_s8 = scalar_lea.hbm %s5309_s10, 128 }
 0x414   :  { %p3992_p5 = scmp.ne.s32.totalorder %s5309_s10, %s3991_s8  ;;  %p3995_p6 = scmp.lt.u32.totalorder %s3991_s8, %s5309_s10 }
 0x416   :  { %p3997_p7 = pnand %p3995_p6, %p3992_p5 }
 0x418   :  { %4000 = shalt.err (!%p3997_p7)
}
 0x419   :  { %2842 = dma.vmem_to_hbm [thread:$0]  %s2840_s29, 128, %s5309_s10, [#allocation17]   ;;  %v2494_v56 = vld [vmem:[#allocation14] sm:$0xf] }
 0x41a   :  { %v2499_v10 = vrot.slane %v2494_v56, %v4767_v26  ;;  %v2507_v14 = vrot.slane %v2494_v56, %v4774_v32  ;;  %v2503_v17 = vrot.slane %v2494_v56, %v4771_v31  ;;  %v2511_v16 = vrot.slane %v2494_v56, %v4777_v33  ;;  %s4048_s10 = smov [#allocation15]  }
 0x41b   :  { %s2829_s13 = sshll.u32 %s4048_s10, 4  ;;  %s2830_s13 = int_to_ptr.vmem [resolvable:$true] %s2829_s13 }
 0x41c   :  { %s4001_s15 = scalar_lea.vmem %s2830_s13, 128  ;;  %p4006_p9 = scmp.lt.s32.totalorder %s2830_s13, %s2830_s13 }
 0x41d   :  { %p4002_p8 = scmp.ne.s32.totalorder %s2830_s13, %s4001_s15  ;;  %p4007_p10 = scmp.lt.s32.totalorder %s4001_s15, %s4001_s15 }
 0x41f   :  { %p4008_p11 = por %p4007_p10, %p4006_p9 }
 0x421   :  { %p4009_p12 = pnand %p4008_p11, %p4002_p8 }
 0x4e4   :  { %v2653_v20 = vpop.f32.mrb[10].mxu0  ;;  %v2795_v15 = vpop.f32.mrb[10].mxu1 }
 0x4e5   :  { %v3751_v22 = vadd.f32 %v2653_v20, %v2499_v10  ;;  %v3753_v23 = vadd.f32 %v2795_v15, %v2507_v14  ;;  %v2655_v25 = vpop.f32.mrb[11].mxu0  ;;  %v2797_v27 = vpop.f32.mrb[11].mxu1 }
 0x4e6   :  { %v3752_v34 = vadd.f32 %v2655_v25, %v2503_v17  ;;  %v3754_v36 = vadd.f32 %v2797_v27, %v2511_v16 }
 0x4e8   :  { %v2804_v38 = vcombine.low %v3751_v22, %v3752_v34  ;;  %v2805_v39 = vcombine.low %v3753_v23, %v3754_v36 }
 0x4ea   :  { %v2812_v26 = vrot.slane %v2804_v38, %v4880_v4  ;;  %v2819_v32 = vrot.slane %v2805_v39, %v4880_v4 }
 0x4ec   :  { %v2820_v40 = vcombine.low %v2812_v26, %v2819_v32 }
 0x4ee   :  { %2822 = vst [vmem:[#allocation15] sm:$0xff] %v2820_v40 }
 0x4ef   :  { %4012 = shalt.err (!%p4009_p12)
}
 0x4f0   :  { %s4013_s17 = scalar_lea.hbm %s5308_s9, 128 }
 0x4f1   :  { %p4014_p13 = scmp.ne.s32.totalorder %s5308_s9, %s4013_s17  ;;  %p4017_p0 = scmp.lt.u32.totalorder %s4013_s17, %s5308_s9 }
 0x4f3   :  { %p4019_p1 = pnand %p4017_p0, %p4014_p13 }
 0x4f5   :  { %4022 = shalt.err (!%p4019_p1)
}
 0x4f6   :  { %2832 = dma.vmem_to_hbm [thread:$0]  %s2830_s13, 128, %s5308_s9, [#allocation5]  }
 0x4f7   :  { %4031 = dma.done.wait [#allocation5], 128  }
 0x4f8   :  { %4032 = vsyncadd [#allocation5], 4294967168 }
 0x4f9   :  { %4033 = dma.done.wait [#allocation17], 128  }
 0x4fa   :  { %4034 = vsyncadd [#allocation17], 4294967168 }
 0x4fb   :  { %2849 = vsyncpa [#allocation4], 1 }
 0x4fc   :  { %2850 = vsyncpa [#allocation7], 1 }
 0x4fd   :  { %2851 = vsyncpa [#allocation10], 1 }
 0x4fe   :  { %2852 = vsyncpa [#allocation13], 1 }
 0x4ff   :  { %2853 = vsyncpa [#allocation5], 1 }
 0x500   :  { %2854 = vsyncpa [#allocation17], 1 }

</bundles_post_ra>
